<compile_context>
chip_gen: v5e
topology: v5e:2x2
jax: 0.10.0
libtpu: 0.0.40
codegen_flags: <defaults>
</compile_context>

<pallas_src>
import math

import jax
import jax.numpy as jnp
from jax.experimental import pallas as pl
from jax.experimental.pallas import tpu as pltpu


def _vmem():
    return pl.BlockSpec(memory_space=pltpu.MemorySpace.VMEM)


# ----------------------------- fused inference kernel -----------------------------

def _fused_inference_kernel(
    # prologue (encoder stub + attention keys + init hidden)
    patches_ref, w_enc_ref, b_enc_ref, w_feat_ref, b_feat_ref, pos_ref,
    w_init_ref, b_init_ref,
    # greedy decode loop
    emb_ref, w_gru_ref, b_gru_ref, w_q_ref, b_q_ref, w_cov_ref, w_e_ref, b_e_ref,
    w_heads_ref, b_heads_ref, w_conv_ref, b_conv_ref,
    # tail: language encoder stub + detached gated fusion
    lang_emb_ref, w_lang_ref, b_lang_ref, w_g1_ref, w_g2_ref, wz1_ref, wz2_ref,
    w_gout_ref, b_gout_ref,
    # outputs
    cwords_ref, count_ref,
    # VMEM scratch: per-step slabs + decoder state (resident across the whole decode)
    onehot_s, states_s, h_s, asum_s, emb_s, flag_s, cnt_s,
):
    f32 = jnp.float32
    hs = w_q_ref.shape[0]            # hidden_size
    wn = onehot_s.shape[1]           # word_num
    max_steps = onehot_s.shape[0]
    L = patches_ref.shape[0]

    # ---------- prologue: runs once, results stay resident for the whole decode ----------
    cnn = jnp.tanh(jnp.dot(patches_ref[...], w_enc_ref[...],
                           preferred_element_type=f32) + b_enc_ref[...])          # (L, C)
    trans = (jnp.dot(cnn, w_feat_ref[...], preferred_element_type=f32)
             + b_feat_ref[...] + pos_ref[...])                                    # (L, A)
    avg = jnp.mean(cnn, axis=0, keepdims=True)                                    # masked mean (mask==1)
    h_s[...] = jnp.tanh(jnp.dot(avg, w_init_ref[...], preferred_element_type=f32)
                        + b_init_ref[...])                                        # (1, H)
    emb_s[...] = emb_ref[pl.ds(1, 1), :]                                          # start token = 1
    asum_s[...] = jnp.zeros((L, 1), f32)
    flag_s[...] = jnp.zeros((1, 1), f32)                                          # 1.0 once <eos> seen
    cnt_s[...] = jnp.zeros((1, 1), f32)                                           # emitted-token count
    onehot_s[...] = jnp.zeros((max_steps, wn), f32)
    states_s[...] = jnp.zeros((max_steps, hs), f32)

    lane_iota = jax.lax.broadcasted_iota(jnp.int32, (1, wn), 1).astype(f32)       # hoisted (1, WN)

    def step(i, carry):
        # Early exit: once <eos> has been emitted the predicate is false and the remaining
        # iterations are a scalar branch only (matches the PyTorch while-loop `return`).
        @pl.when(flag_s[0, 0] == 0.0)
        def _active():
            emb = emb_s[...]
            h = h_s[...]
            alpha_sum = asum_s[...]

            # --- GRUCell: one block-diagonal matmul producing [gi | gh] (gate order r,z,n)
            xh = jnp.concatenate([emb, h], axis=1)                                # (1, E+H)
            g = jnp.dot(xh, w_gru_ref[...], preferred_element_type=f32) + b_gru_ref[...]
            i_r, i_z, i_n = g[:, 0:hs], g[:, hs:2 * hs], g[:, 2 * hs:3 * hs]
            h_r, h_z, h_n = g[:, 3 * hs:4 * hs], g[:, 4 * hs:5 * hs], g[:, 5 * hs:6 * hs]
            r = jax.nn.sigmoid(i_r + h_r)
            z = jax.nn.sigmoid(i_z + h_z)
            n = jnp.tanh(i_n + r * h_n)
            h_new = (1.0 - z) * n + z * h

            # --- coverage attention (coverage "conv" = VPU broadcast, no K=1 matmul)
            query = jnp.dot(h_new, w_q_ref[...], preferred_element_type=f32) + b_q_ref[...]   # (1, A)
            coverage = alpha_sum * w_cov_ref[...]                                              # (L,1)*(1,A)->(L,A)
            att = jnp.tanh(query + coverage + trans)                                           # (L, A)
            energy = jnp.dot(att, w_e_ref[...], preferred_element_type=f32) + b_e_ref[...]     # (L, 1)
            energy = energy - jnp.max(energy, axis=(0, 1), keepdims=True)
            e_exp = jnp.exp(energy)
            alpha = e_exp / (jnp.sum(e_exp, axis=(0, 1), keepdims=True) + 1e-10)               # (L, 1)
            context = jnp.sum(alpha * cnn, axis=0, keepdims=True)                              # (1, C)

            # --- output heads: one stacked matmul for state/embedding/context projections
            hec = jnp.concatenate([h_new, emb, context], axis=1)                   # (1, H+E+C)
            out_state = (jnp.dot(hec, w_heads_ref[...], preferred_element_type=f32)
                         + b_heads_ref[...])                                       # (1, H)  (no dropout)
            prob = (jnp.dot(out_state, w_conv_ref[...], preferred_element_type=f32)
                    + b_conv_ref[...])                                              # (1, WN)

            # --- greedy argmax (lowest index on ties, like torch.max) + one-hot gather
            pmax = jnp.max(prob, axis=1, keepdims=True)
            widx = jnp.min(jnp.where(prob == pmax, lane_iota, float(wn)),
                           axis=1, keepdims=True)                                   # (1,1)
            onehot = (lane_iota == widx).astype(f32)                                # (1, WN)
            emb_next = jnp.dot(onehot, emb_ref[...], preferred_element_type=f32)    # (1, E)
            is_eos = onehot[:, 0:1]                                                 # 1.0 iff word == 0

            # The EOS step's row is overwritten here but excluded by the count (ref loop
            # discards the EOS step's outputs); the host slices to `count` rows.
            onehot_s[pl.ds(i, 1), :] = onehot
            states_s[pl.ds(i, 1), :] = out_state
            h_s[...] = h_new
            asum_s[...] = alpha_sum + alpha
            emb_s[...] = emb_next
            cnt_s[...] = cnt_s[...] + (1.0 - is_eos)
            flag_s[...] = is_eos

        return carry

    jax.lax.fori_loop(0, max_steps, step, 0)
    count_ref[...] = cnt_s[...].astype(jnp.int32)

    # ---------- tail: language encoder + detached gated fusion on the padded slabs ----------
    # Rows past the emitted-token count are zeros / EOS-step leftovers and are sliced away
    # on the host; every tail op is row-wise so they cannot contaminate valid rows.
    p_onehot = onehot_s[...]                                                       # (T_max, WN)
    all_states = states_s[...]                                                     # (T_max, H)
    lang = jnp.dot(p_onehot, lang_emb_ref[...], preferred_element_type=f32)        # (T_max, S2)
    lang = jnp.tanh(jnp.dot(lang, w_lang_ref[...], preferred_element_type=f32) + b_lang_ref[...])

    # TODO(synk): GatedMultimodalLayer definition not provided -> scalar gate per token.
    h1 = jnp.tanh(jnp.dot(all_states, w_g1_ref[...], preferred_element_type=f32))
    h2 = jnp.tanh(jnp.dot(lang, w_g2_ref[...], preferred_element_type=f32))
    zg = jax.nn.sigmoid(jnp.dot(h1, wz1_ref[...], preferred_element_type=f32)
                        + jnp.dot(h2, wz2_ref[...], preferred_element_type=f32))
    fused = zg * h1 + (1.0 - zg) * h2
    fprob = jnp.dot(fused, w_gout_ref[...], preferred_element_type=f32) + b_gout_ref[...]
    idx = jax.lax.broadcasted_iota(jnp.int32, (max_steps, wn), 1).astype(f32)
    fmax = jnp.max(fprob, axis=1, keepdims=True)
    cw = jnp.min(jnp.where(fprob == fmax, idx, float(wn)), axis=1, keepdims=True)  # (T_max, 1)
    cwords_ref[...] = cw.astype(jnp.int32)


# ----------------------------- plain-JAX (host-side) helpers -----------------------

def position_embedding_sine(b, h, w, num_pos_feats, temperature=10000.0):
    mask = jnp.ones((b, h, w), jnp.float32)
    y_embed = jnp.cumsum(mask, axis=1)
    x_embed = jnp.cumsum(mask, axis=2)
    eps = 1e-6
    scale = 2.0 * math.pi
    y_embed = y_embed / (y_embed[:, -1:, :] + eps) * scale
    x_embed = x_embed / (x_embed[:, :, -1:] + eps) * scale
    dim_t = jnp.arange(num_pos_feats, dtype=jnp.float32)
    dim_t = temperature ** (2.0 * jnp.floor(dim_t / 2.0) / num_pos_feats)
    pos_x = x_embed[:, :, :, None] / dim_t
    pos_y = y_embed[:, :, :, None] / dim_t
    pos_x = jnp.stack((jnp.sin(pos_x[..., 0::2]), jnp.cos(pos_x[..., 1::2])), axis=4).reshape(b, h, w, -1)
    pos_y = jnp.stack((jnp.sin(pos_y[..., 0::2]), jnp.cos(pos_y[..., 1::2])), axis=4).reshape(b, h, w, -1)
    return jnp.concatenate((pos_y, pos_x), axis=3)     # (B, H, W, 2*num_pos_feats) NHWC


# ----------------------------- driver ---------------------------------------------

if __name__ == "__main__":
    # small, self-consistent config
    B, H_IMG, W_IMG = 1, 16, 16
    PATCH = 4
    HS, WS = H_IMG // PATCH, W_IMG // PATCH            # 4 x 4 feature map
    L = HS * WS
    C = 32        # encoder out_channel
    E = 32        # decoder input_size (embedding dim)
    HID = 32      # decoder hidden_size
    A = 32        # attention_dim
    WN = 16       # word_num / words_num
    S1, S2, SO = HID, 32, 32                            # fusion sizein1/sizein2/sizeout
    MAX_STEPS = 200

    root = jax.random.PRNGKey(0)
    keys = list(jax.random.split(root, 40))
    _k = iter(keys)

    def mk(shape, scale=None):
        s = scale if scale is not None else 1.0 / math.sqrt(shape[0])
        return jax.random.normal(next(_k), shape, jnp.float32) * s

    # encoder stub (patch-embed)  -- see TODO(synk) above
    w_enc = mk((PATCH * PATCH * 1, C)); b_enc = jnp.zeros((1, C), jnp.float32)
    # AttDecoder parameters
    w_init = mk((C, HID)); b_init = jnp.zeros((1, HID), jnp.float32)
    emb_table = mk((WN, E), scale=1.0)
    w_ih = mk((E, 3 * HID)); b_ih = jnp.zeros((1, 3 * HID), jnp.float32)
    w_hh = mk((HID, 3 * HID)); b_hh = jnp.zeros((1, 3 * HID), jnp.float32)
    w_feat = mk((C, A)); b_feat = jnp.zeros((1, A), jnp.float32)
    w_q = mk((HID, A)); b_q = jnp.zeros((1, A), jnp.float32)
    w_cov = mk((1, A))
    w_e = mk((A, 1)); b_e = jnp.zeros((1, 1), jnp.float32)
    w_state = mk((HID, HID)); b_state = jnp.zeros((1, HID), jnp.float32)
    w_wemb = mk((E, HID)); b_wemb = jnp.zeros((1, HID), jnp.float32)
    w_ctx = mk((C, HID)); b_ctx = jnp.zeros((1, HID), jnp.float32)
    w_conv = mk((HID, WN)); b_conv = jnp.zeros((1, WN), jnp.float32)
    # language-encoder stub
    lang_emb = mk((WN, S2), scale=1.0)
    w_lang = mk((S2, S2)); b_lang = jnp.zeros((1, S2), jnp.float32)
    # detached gated multimodal fusion
    w_g1 = mk((S1, SO)); w_g2 = mk((S2, SO))
    w_gz1 = mk((SO, 1)); w_gz2 = mk((SO, 1))
    w_gout = mk((SO, WN)); b_gout = jnp.zeros((1, WN), jnp.float32)

    # ---- offline weight fusion (stacked once on the host) ----
    # GRU: block-diagonal so [emb|h] @ w_gru = [emb@w_ih | h@w_hh]
    w_gru = jnp.zeros((E + HID, 6 * HID), jnp.float32)
    w_gru = w_gru.at[:E, :3 * HID].set(w_ih)
    w_gru = w_gru.at[E:, 3 * HID:].set(w_hh)
    b_gru = jnp.concatenate([b_ih, b_hh], axis=1)
    # output heads: [h|emb|ctx] @ w_heads = h@w_state + emb@w_wemb + ctx@w_ctx
    w_heads = jnp.concatenate([w_state, w_wemb, w_ctx], axis=0)   # (HID+E+C, HID)
    b_heads = b_state + b_wemb + b_ctx

    # input images (NCHW, like the PyTorch module)
    images = jax.random.normal(next(_k), (B, 1, H_IMG, W_IMG), jnp.float32)

    # NCHW -> NHWC -> non-overlapping PATCHxPATCH patches flattened to (L, P*P)
    x = jnp.transpose(images, (0, 2, 3, 1))
    patches = x.reshape(B, HS, PATCH, WS, PATCH, 1)
    patches = jnp.transpose(patches, (0, 1, 3, 2, 4, 5)).reshape(B * L, PATCH * PATCH)

    pos = position_embedding_sine(B, HS, WS, A // 2).reshape(L, A)

    fused_call = pl.pallas_call(
        _fused_inference_kernel,
        out_shape=(jax.ShapeDtypeStruct((MAX_STEPS, 1), jnp.int32),   # corrected words (padded)
                   jax.ShapeDtypeStruct((1, 1), jnp.int32)),          # emitted-token count
        in_specs=[_vmem()] * 29,
        out_specs=(_vmem(), _vmem()),
        scratch_shapes=[pltpu.VMEM((MAX_STEPS, WN), jnp.float32),     # per-step one-hot predictions
                        pltpu.VMEM((MAX_STEPS, HID), jnp.float32),    # per-step out_states
                        pltpu.VMEM((1, HID), jnp.float32),            # hidden state
                        pltpu.VMEM((L, 1), jnp.float32),              # alpha_sum (coverage)
                        pltpu.VMEM((1, E), jnp.float32),              # current word embedding
                        pltpu.VMEM((1, 1), jnp.float32),              # <eos>/done flag
                        pltpu.VMEM((1, 1), jnp.float32)],             # emitted-token count
    )

    cwords, count = jax.jit(fused_call)(
        patches, w_enc, b_enc, w_feat, b_feat, pos, w_init, b_init,
        emb_table, w_gru, b_gru, w_q, b_q, w_cov, w_e, b_e,
        w_heads, b_heads, w_conv, b_conv,
        lang_emb, w_lang, b_lang, w_g1, w_g2, w_gz1, w_gz2, w_gout, b_gout)

    cwords = jax.block_until_ready(cwords)
    count = jax.block_until_ready(count)
    t = int(count[0, 0])                 # number of tokens emitted before <eos> (0..MAX_STEPS)
    correct_words = cwords[:t, 0]        # final `correct_words`; empty if first token is <eos>
    print("KERNEL_OK")
</pallas_src>

<mosaic_0001>
module attributes {stable_mosaic.version = 11 : i64} {
  func.func @_fused_inference_kernel(%arg0: memref<16x16xf32, #tpu.memory_space<vmem>>, %arg1: memref<16x32xf32, #tpu.memory_space<vmem>>, %arg2: memref<1x32xf32, #tpu.memory_space<vmem>>, %arg3: memref<32x32xf32, #tpu.memory_space<vmem>>, %arg4: memref<1x32xf32, #tpu.memory_space<vmem>>, %arg5: memref<16x32xf32, #tpu.memory_space<vmem>>, %arg6: memref<32x32xf32, #tpu.memory_space<vmem>>, %arg7: memref<1x32xf32, #tpu.memory_space<vmem>>, %arg8: memref<16x32xf32, #tpu.memory_space<vmem>>, %arg9: memref<64x192xf32, #tpu.memory_space<vmem>>, %arg10: memref<1x192xf32, #tpu.memory_space<vmem>>, %arg11: memref<32x32xf32, #tpu.memory_space<vmem>>, %arg12: memref<1x32xf32, #tpu.memory_space<vmem>>, %arg13: memref<1x32xf32, #tpu.memory_space<vmem>>, %arg14: memref<32x1xf32, #tpu.memory_space<vmem>>, %arg15: memref<1x1xf32, #tpu.memory_space<vmem>>, %arg16: memref<96x32xf32, #tpu.memory_space<vmem>>, %arg17: memref<1x32xf32, #tpu.memory_space<vmem>>, %arg18: memref<32x16xf32, #tpu.memory_space<vmem>>, %arg19: memref<1x16xf32, #tpu.memory_space<vmem>>, %arg20: memref<16x32xf32, #tpu.memory_space<vmem>>, %arg21: memref<32x32xf32, #tpu.memory_space<vmem>>, %arg22: memref<1x32xf32, #tpu.memory_space<vmem>>, %arg23: memref<32x32xf32, #tpu.memory_space<vmem>>, %arg24: memref<32x32xf32, #tpu.memory_space<vmem>>, %arg25: memref<32x1xf32, #tpu.memory_space<vmem>>, %arg26: memref<32x1xf32, #tpu.memory_space<vmem>>, %arg27: memref<32x16xf32, #tpu.memory_space<vmem>>, %arg28: memref<1x16xf32, #tpu.memory_space<vmem>>, %arg29: memref<200x1xi32, #tpu.memory_space<vmem>>, %arg30: memref<1x1xi32, #tpu.memory_space<vmem>>, %arg31: memref<200x16xf32, #tpu.memory_space<vmem>>, %arg32: memref<200x32xf32, #tpu.memory_space<vmem>>, %arg33: memref<1x32xf32, #tpu.memory_space<vmem>>, %arg34: memref<16x1xf32, #tpu.memory_space<vmem>>, %arg35: memref<1x32xf32, #tpu.memory_space<vmem>>, %arg36: memref<1x1xf32, #tpu.memory_space<vmem>>, %arg37: memref<1x1xf32, #tpu.memory_space<vmem>>) attributes {dimension_semantics = [], scalar_prefetch = 0 : i64, scratch_operands = 7 : i64, tpu.core_type = #tpu.core_type<tc>} {
    %c0 = arith.constant 0 : index
    %c0_0 = arith.constant 0 : index
    %0 = vector.load %arg0[%c0, %c0_0] : memref<16x16xf32, #tpu.memory_space<vmem>>, vector<16x16xf32>
    %c0_1 = arith.constant 0 : index
    %c0_2 = arith.constant 0 : index
    %1 = vector.load %arg1[%c0_1, %c0_2] : memref<16x32xf32, #tpu.memory_space<vmem>>, vector<16x32xf32>
    %cst = arith.constant dense<0.000000e+00> : vector<16x32xf32>
    %2 = tpu.matmul %0, %1, %cst {dimension_numbers = #tpu.dot_dimension_numbers<[1], [0], [0], [1], [0, 0, 1, 1], [], []>} : vector<16x16xf32>, vector<16x32xf32>, vector<16x32xf32> -> vector<16x32xf32>
    %c0_3 = arith.constant 0 : index
    %c0_4 = arith.constant 0 : index
    %3 = vector.load %arg2[%c0_3, %c0_4] : memref<1x32xf32, #tpu.memory_space<vmem>>, vector<1x32xf32>
    %4 = vector.broadcast %3 : vector<1x32xf32> to vector<16x32xf32>
    %5 = arith.addf %2, %4 : vector<16x32xf32>
    %6 = math.tanh %5 : vector<16x32xf32>
    %c0_5 = arith.constant 0 : index
    %c0_6 = arith.constant 0 : index
    %7 = vector.load %arg3[%c0_5, %c0_6] : memref<32x32xf32, #tpu.memory_space<vmem>>, vector<32x32xf32>
    %cst_7 = arith.constant dense<0.000000e+00> : vector<16x32xf32>
    %8 = tpu.matmul %6, %7, %cst_7 {dimension_numbers = #tpu.dot_dimension_numbers<[1], [0], [0], [1], [0, 0, 1, 1], [], []>} : vector<16x32xf32>, vector<32x32xf32>, vector<16x32xf32> -> vector<16x32xf32>
    %c0_8 = arith.constant 0 : index
    %c0_9 = arith.constant 0 : index
    %9 = vector.load %arg4[%c0_8, %c0_9] : memref<1x32xf32, #tpu.memory_space<vmem>>, vector<1x32xf32>
    %10 = vector.broadcast %9 : vector<1x32xf32> to vector<16x32xf32>
    %11 = arith.addf %8, %10 : vector<16x32xf32>
    %c0_10 = arith.constant 0 : index
    %c0_11 = arith.constant 0 : index
    %12 = vector.load %arg5[%c0_10, %c0_11] : memref<16x32xf32, #tpu.memory_space<vmem>>, vector<16x32xf32>
    %13 = arith.addf %11, %12 : vector<16x32xf32>
    %cst_12 = arith.constant dense<0.000000e+00> : vector<32xf32>
    %14 = vector.multi_reduction <add>, %6, %cst_12 [0] : vector<16x32xf32> to vector<32xf32>
    %15 = vector.shape_cast %14 : vector<32xf32> to vector<1x32xf32>
    %cst_13 = arith.constant 1.600000e+01 : f32
    %16 = vector.broadcast %cst_13 : f32 to vector<1x32xf32>
    %17 = arith.divf %15, %16 : vector<1x32xf32>
    %c0_14 = arith.constant 0 : index
    %c0_15 = arith.constant 0 : index
    %18 = vector.load %arg6[%c0_14, %c0_15] : memref<32x32xf32, #tpu.memory_space<vmem>>, vector<32x32xf32>
    %cst_16 = arith.constant dense<0.000000e+00> : vector<1x32xf32>
    %19 = tpu.matmul %17, %18, %cst_16 {dimension_numbers = #tpu.dot_dimension_numbers<[1], [0], [0], [1], [0, 0, 1, 1], [], []>} : vector<1x32xf32>, vector<32x32xf32>, vector<1x32xf32> -> vector<1x32xf32>
    %c0_17 = arith.constant 0 : index
    %c0_18 = arith.constant 0 : index
    %20 = vector.load %arg7[%c0_17, %c0_18] : memref<1x32xf32, #tpu.memory_space<vmem>>, vector<1x32xf32>
    %21 = arith.addf %19, %20 : vector<1x32xf32>
    %22 = math.tanh %21 : vector<1x32xf32>
    %c0_19 = arith.constant 0 : index
    %c0_20 = arith.constant 0 : index
    %23 = vector.load %arg33[%c0_19, %c0_20] : memref<1x32xf32, #tpu.memory_space<vmem>>, vector<1x32xf32>
    tpu.vector_store %arg33[%c0_19, %c0_20], %22 {strides = array<i32>} : memref<1x32xf32, #tpu.memory_space<vmem>>, vector<1x32xf32>,
    %c1 = arith.constant 1 : index
    %c0_21 = arith.constant 0 : index
    %24 = vector.load %arg8[%c1, %c0_21] : memref<16x32xf32, #tpu.memory_space<vmem>>, vector<1x32xf32>
    %c0_22 = arith.constant 0 : index
    %c0_23 = arith.constant 0 : index
    %25 = vector.load %arg35[%c0_22, %c0_23] : memref<1x32xf32, #tpu.memory_space<vmem>>, vector<1x32xf32>
    tpu.vector_store %arg35[%c0_22, %c0_23], %24 {strides = array<i32>} : memref<1x32xf32, #tpu.memory_space<vmem>>, vector<1x32xf32>,
    %cst_24 = arith.constant 0.000000e+00 : f32
    %26 = vector.broadcast %cst_24 : f32 to vector<16x1xf32>
    %c0_25 = arith.constant 0 : index
    %c0_26 = arith.constant 0 : index
    %27 = vector.load %arg34[%c0_25, %c0_26] : memref<16x1xf32, #tpu.memory_space<vmem>>, vector<16x1xf32>
    tpu.vector_store %arg34[%c0_25, %c0_26], %26 {strides = array<i32>} : memref<16x1xf32, #tpu.memory_space<vmem>>, vector<16x1xf32>,
    %cst_27 = arith.constant 0.000000e+00 : f32
    %28 = vector.broadcast %cst_27 : f32 to vector<1x1xf32>
    %c0_28 = arith.constant 0 : index
    %c0_29 = arith.constant 0 : index
    %29 = vector.load %arg36[%c0_28, %c0_29] : memref<1x1xf32, #tpu.memory_space<vmem>>, vector<1x1xf32>
    tpu.vector_store %arg36[%c0_28, %c0_29], %28 {strides = array<i32>} : memref<1x1xf32, #tpu.memory_space<vmem>>, vector<1x1xf32>,
    %cst_30 = arith.constant 0.000000e+00 : f32
    %30 = vector.broadcast %cst_30 : f32 to vector<1x1xf32>
    %c0_31 = arith.constant 0 : index
    %c0_32 = arith.constant 0 : index
    %31 = vector.load %arg37[%c0_31, %c0_32] : memref<1x1xf32, #tpu.memory_space<vmem>>, vector<1x1xf32>
    tpu.vector_store %arg37[%c0_31, %c0_32], %30 {strides = array<i32>} : memref<1x1xf32, #tpu.memory_space<vmem>>, vector<1x1xf32>,
    %cst_33 = arith.constant 0.000000e+00 : f32
    %32 = vector.broadcast %cst_33 : f32 to vector<200x16xf32>
    %c0_34 = arith.constant 0 : index
    %c0_35 = arith.constant 0 : index
    %33 = vector.load %arg31[%c0_34, %c0_35] : memref<200x16xf32, #tpu.memory_space<vmem>>, vector<200x16xf32>
    tpu.vector_store %arg31[%c0_34, %c0_35], %32 {strides = array<i32>} : memref<200x16xf32, #tpu.memory_space<vmem>>, vector<200x16xf32>,
    %cst_36 = arith.constant 0.000000e+00 : f32
    %34 = vector.broadcast %cst_36 : f32 to vector<200x32xf32>
    %c0_37 = arith.constant 0 : index
    %c0_38 = arith.constant 0 : index
    %35 = vector.load %arg32[%c0_37, %c0_38] : memref<200x32xf32, #tpu.memory_space<vmem>>, vector<200x32xf32>
    tpu.vector_store %arg32[%c0_37, %c0_38], %34 {strides = array<i32>} : memref<200x32xf32, #tpu.memory_space<vmem>>, vector<200x32xf32>,
    %36 = tpu.iota {dimensions = array<i32: 1>} : vector<1x16xi32>
    %37 = arith.sitofp %36 : vector<1x16xi32> to vector<1x16xf32>
    %c0_i32 = arith.constant 0 : i32
    %c200_i32 = arith.constant 200 : i32
    %38 = arith.addi %c0_i32, %c200_i32 : i32
    %c1_i32 = arith.constant 1 : i32
    scf.for %arg38 = %c0_i32 to %38 step %c1_i32  : i32 {
      %c0_80 = arith.constant 0 : index
      %c0_81 = arith.constant 0 : index
      %92 = vector.load %arg36[%c0_80, %c0_81] : memref<1x1xf32, #tpu.memory_space<vmem>>, vector<1x1xf32>
      %93 = vector.extract %92[0, 0] : f32 from vector<1x1xf32>
      %cst_82 = arith.constant 0.000000e+00 : f32
      %94 = arith.cmpf oeq, %93, %cst_82 : f32
      %95 = arith.extui %94 : i1 to i32
      %c0_i32_83 = arith.constant 0 : i32
      %96 = arith.cmpi ne, %95, %c0_i32_83 : i32
      scf.if %96 {
        %c0_84 = arith.constant 0 : index
        %c0_85 = arith.constant 0 : index
        %97 = vector.load %arg35[%c0_84, %c0_85] : memref<1x32xf32, #tpu.memory_space<vmem>>, vector<1x32xf32>
        %c0_86 = arith.constant 0 : index
        %c0_87 = arith.constant 0 : index
        %98 = vector.load %arg33[%c0_86, %c0_87] : memref<1x32xf32, #tpu.memory_space<vmem>>, vector<1x32xf32>
        %c0_88 = arith.constant 0 : index
        %c0_89 = arith.constant 0 : index
        %99 = vector.load %arg34[%c0_88, %c0_89] : memref<16x1xf32, #tpu.memory_space<vmem>>, vector<16x1xf32>
        %100 = tpu.concatenate %97, %98 in 1 : vector<1x32xf32>, vector<1x32xf32> -> vector<1x64xf32>
        %c0_90 = arith.constant 0 : index
        %c0_91 = arith.constant 0 : index
        %101 = vector.load %arg9[%c0_90, %c0_91] : memref<64x192xf32, #tpu.memory_space<vmem>>, vector<64x192xf32>
        %cst_92 = arith.constant dense<0.000000e+00> : vector<1x192xf32>
        %102 = tpu.matmul %100, %101, %cst_92 {dimension_numbers = #tpu.dot_dimension_numbers<[1], [0], [0], [1], [0, 0, 1, 1], [], []>} : vector<1x64xf32>, vector<64x192xf32>, vector<1x192xf32> -> vector<1x192xf32>
        %c0_93 = arith.constant 0 : index
        %c0_94 = arith.constant 0 : index
        %103 = vector.load %arg10[%c0_93, %c0_94] : memref<1x192xf32, #tpu.memory_space<vmem>>, vector<1x192xf32>
        %104 = arith.addf %102, %103 : vector<1x192xf32>
        %105 = vector.extract_strided_slice %104 {offsets = [0, 0], sizes = [1, 32], strides = [1, 1]} : vector<1x192xf32> to vector<1x32xf32>
        %106 = vector.extract_strided_slice %104 {offsets = [0, 32], sizes = [1, 32], strides = [1, 1]} : vector<1x192xf32> to vector<1x32xf32>
        %107 = vector.extract_strided_slice %104 {offsets = [0, 64], sizes = [1, 32], strides = [1, 1]} : vector<1x192xf32> to vector<1x32xf32>
        %108 = vector.extract_strided_slice %104 {offsets = [0, 96], sizes = [1, 32], strides = [1, 1]} : vector<1x192xf32> to vector<1x32xf32>
        %109 = vector.extract_strided_slice %104 {offsets = [0, 128], sizes = [1, 32], strides = [1, 1]} : vector<1x192xf32> to vector<1x32xf32>
        %110 = vector.extract_strided_slice %104 {offsets = [0, 160], sizes = [1, 32], strides = [1, 1]} : vector<1x192xf32> to vector<1x32xf32>
        %111 = arith.addf %105, %108 : vector<1x32xf32>
        %112 = arith.negf %111 : vector<1x32xf32>
        %113 = math.exp %112 : vector<1x32xf32>
        %cst_95 = arith.constant 1.000000e+00 : f32
        %114 = vector.broadcast %cst_95 : f32 to vector<1x32xf32>
        %115 = arith.addf %114, %113 : vector<1x32xf32>
        %116 = arith.divf %114, %115 : vector<1x32xf32>
        %117 = arith.addf %106, %109 : vector<1x32xf32>
        %118 = arith.negf %117 : vector<1x32xf32>
        %119 = math.exp %118 : vector<1x32xf32>
        %cst_96 = arith.constant 1.000000e+00 : f32
        %120 = vector.broadcast %cst_96 : f32 to vector<1x32xf32>
        %121 = arith.addf %120, %119 : vector<1x32xf32>
        %122 = arith.divf %120, %121 : vector<1x32xf32>
        %123 = arith.mulf %116, %110 : vector<1x32xf32>
        %124 = arith.addf %107, %123 : vector<1x32xf32>
        %125 = math.tanh %124 : vector<1x32xf32>
        %cst_97 = arith.constant 1.000000e+00 : f32
        %126 = vector.broadcast %cst_97 : f32 to vector<1x32xf32>
        %127 = arith.subf %126, %122 : vector<1x32xf32>
        %128 = arith.mulf %127, %125 : vector<1x32xf32>
        %129 = arith.mulf %122, %98 : vector<1x32xf32>
        %130 = arith.addf %128, %129 : vector<1x32xf32>
        %c0_98 = arith.constant 0 : index
        %c0_99 = arith.constant 0 : index
        %131 = vector.load %arg11[%c0_98, %c0_99] : memref<32x32xf32, #tpu.memory_space<vmem>>, vector<32x32xf32>
        %cst_100 = arith.constant dense<0.000000e+00> : vector<1x32xf32>
        %132 = tpu.matmul %130, %131, %cst_100 {dimension_numbers = #tpu.dot_dimension_numbers<[1], [0], [0], [1], [0, 0, 1, 1], [], []>} : vector<1x32xf32>, vector<32x32xf32>, vector<1x32xf32> -> vector<1x32xf32>
        %c0_101 = arith.constant 0 : index
        %c0_102 = arith.constant 0 : index
        %133 = vector.load %arg12[%c0_101, %c0_102] : memref<1x32xf32, #tpu.memory_space<vmem>>, vector<1x32xf32>
        %134 = arith.addf %132, %133 : vector<1x32xf32>
        %c0_103 = arith.constant 0 : index
        %c0_104 = arith.constant 0 : index
        %135 = vector.load %arg13[%c0_103, %c0_104] : memref<1x32xf32, #tpu.memory_space<vmem>>, vector<1x32xf32>
        %136 = vector.broadcast %99 : vector<16x1xf32> to vector<16x32xf32>
        %137 = vector.broadcast %135 : vector<1x32xf32> to vector<16x32xf32>
        %138 = arith.mulf %136, %137 : vector<16x32xf32>
        %139 = vector.broadcast %134 : vector<1x32xf32> to vector<16x32xf32>
        %140 = arith.addf %139, %138 : vector<16x32xf32>
        %141 = arith.addf %140, %13 : vector<16x32xf32>
        %142 = math.tanh %141 : vector<16x32xf32>
        %c0_105 = arith.constant 0 : index
        %c0_106 = arith.constant 0 : index
        %143 = vector.load %arg14[%c0_105, %c0_106] : memref<32x1xf32, #tpu.memory_space<vmem>>, vector<32x1xf32>
        %cst_107 = arith.constant dense<0.000000e+00> : vector<16x1xf32>
        %144 = tpu.matmul %142, %143, %cst_107 {dimension_numbers = #tpu.dot_dimension_numbers<[1], [0], [0], [1], [0, 0, 1, 1], [], []>} : vector<16x32xf32>, vector<32x1xf32>, vector<16x1xf32> -> vector<16x1xf32>
        %c0_108 = arith.constant 0 : index
        %c0_109 = arith.constant 0 : index
        %145 = vector.load %arg15[%c0_108, %c0_109] : memref<1x1xf32, #tpu.memory_space<vmem>>, vector<1x1xf32>
        %146 = vector.broadcast %145 : vector<1x1xf32> to vector<16x1xf32>
        %147 = arith.addf %144, %146 : vector<16x1xf32>
        %148 = vector.shape_cast %147 : vector<16x1xf32> to vector<1x16x1xf32>
        %cst_110 = arith.constant dense<0xFF800000> : vector<1xf32>
        %149 = vector.multi_reduction <maximumf>, %148, %cst_110 [1, 2] : vector<1x16x1xf32> to vector<1xf32>
        %150 = vector.shape_cast %149 : vector<1xf32> to vector<1x1x1xf32>
        %151 = vector.extract %150[0, 0, 0] : f32 from vector<1x1x1xf32>
        %152 = vector.broadcast %151 : f32 to vector<1x1xf32>
        %153 = vector.broadcast %152 : vector<1x1xf32> to vector<16x1xf32>
        %154 = arith.subf %147, %153 : vector<16x1xf32>
        %155 = math.exp %154 : vector<16x1xf32>
        %156 = vector.shape_cast %155 : vector<16x1xf32> to vector<1x16x1xf32>
        %cst_111 = arith.constant dense<0.000000e+00> : vector<1xf32>
        %157 = vector.multi_reduction <add>, %156, %cst_111 [1, 2] : vector<1x16x1xf32> to vector<1xf32>
        %158 = vector.shape_cast %157 : vector<1xf32> to vector<1x1x1xf32>
        %159 = vector.extract %158[0, 0, 0] : f32 from vector<1x1x1xf32>
        %160 = vector.broadcast %159 : f32 to vector<1x1xf32>
        %cst_112 = arith.constant 1.000000e-10 : f32
        %161 = vector.broadcast %cst_112 : f32 to vector<1x1xf32>
        %162 = arith.addf %160, %161 : vector<1x1xf32>
        %163 = vector.broadcast %162 : vector<1x1xf32> to vector<16x1xf32>
        %164 = arith.divf %155, %163 : vector<16x1xf32>
        %165 = vector.broadcast %164 : vector<16x1xf32> to vector<16x32xf32>
        %166 = arith.mulf %165, %6 : vector<16x32xf32>
        %cst_113 = arith.constant dense<0.000000e+00> : vector<32xf32>
        %167 = vector.multi_reduction <add>, %166, %cst_113 [0] : vector<16x32xf32> to vector<32xf32>
        %168 = vector.shape_cast %167 : vector<32xf32> to vector<1x32xf32>
        %169 = tpu.concatenate %130, %97, %168 in 1 : vector<1x32xf32>, vector<1x32xf32>, vector<1x32xf32> -> vector<1x96xf32>
        %c0_114 = arith.constant 0 : index
        %c0_115 = arith.constant 0 : index
        %170 = vector.load %arg16[%c0_114, %c0_115] : memref<96x32xf32, #tpu.memory_space<vmem>>, vector<96x32xf32>
        %cst_116 = arith.constant dense<0.000000e+00> : vector<1x32xf32>
        %171 = tpu.matmul %169, %170, %cst_116 {dimension_numbers = #tpu.dot_dimension_numbers<[1], [0], [0], [1], [0, 0, 1, 1], [], []>} : vector<1x96xf32>, vector<96x32xf32>, vector<1x32xf32> -> vector<1x32xf32>
        %c0_117 = arith.constant 0 : index
        %c0_118 = arith.constant 0 : index
        %172 = vector.load %arg17[%c0_117, %c0_118] : memref<1x32xf32, #tpu.memory_space<vmem>>, vector<1x32xf32>
        %173 = arith.addf %171, %172 : vector<1x32xf32>
        %c0_119 = arith.constant 0 : index
        %c0_120 = arith.constant 0 : index
        %174 = vector.load %arg18[%c0_119, %c0_120] : memref<32x16xf32, #tpu.memory_space<vmem>>, vector<32x16xf32>
        %cst_121 = arith.constant dense<0.000000e+00> : vector<1x16xf32>
        %175 = tpu.matmul %173, %174, %cst_121 {dimension_numbers = #tpu.dot_dimension_numbers<[1], [0], [0], [1], [0, 0, 1, 1], [], []>} : vector<1x32xf32>, vector<32x16xf32>, vector<1x16xf32> -> vector<1x16xf32>
        %c0_122 = arith.constant 0 : index
        %c0_123 = arith.constant 0 : index
        %176 = vector.load %arg19[%c0_122, %c0_123] : memref<1x16xf32, #tpu.memory_space<vmem>>, vector<1x16xf32>
        %177 = arith.addf %175, %176 : vector<1x16xf32>
        %cst_124 = arith.constant dense<0xFF800000> : vector<1xf32>
        %178 = vector.multi_reduction <maximumf>, %177, %cst_124 [1] : vector<1x16xf32> to vector<1xf32>
        %179 = vector.shape_cast %178 : vector<1xf32> to vector<1x1xf32>
        %180 = vector.broadcast %179 : vector<1x1xf32> to vector<1x16xf32>
        %181 = arith.cmpf oeq, %177, %180 : vector<1x16xf32>
        %cst_125 = arith.constant 1.600000e+01 : f32
        %182 = vector.broadcast %cst_125 : f32 to vector<1x16xf32>
        %183 = arith.select %181, %37, %182 : vector<1x16xi1>, vector<1x16xf32>
        %cst_126 = arith.constant dense<0x7F800000> : vector<1xf32>
        %184 = vector.multi_reduction <minimumf>, %183, %cst_126 [1] : vector<1x16xf32> to vector<1xf32>
        %185 = vector.shape_cast %184 : vector<1xf32> to vector<1x1xf32>
        %186 = vector.broadcast %185 : vector<1x1xf32> to vector<1x16xf32>
        %187 = arith.cmpf oeq, %37, %186 : vector<1x16xf32>
        %188 = arith.extui %187 : vector<1x16xi1> to vector<1x16xi32>
        %189 = arith.sitofp %188 : vector<1x16xi32> to vector<1x16xf32>
        %c0_127 = arith.constant 0 : index
        %c0_128 = arith.constant 0 : index
        %190 = vector.load %arg8[%c0_127, %c0_128] : memref<16x32xf32, #tpu.memory_space<vmem>>, vector<16x32xf32>
        %cst_129 = arith.constant dense<0.000000e+00> : vector<1x32xf32>
        %191 = tpu.matmul %189, %190, %cst_129 {dimension_numbers = #tpu.dot_dimension_numbers<[1], [0], [0], [1], [0, 0, 1, 1], [], []>} : vector<1x16xf32>, vector<16x32xf32>, vector<1x32xf32> -> vector<1x32xf32>
        %192 = vector.extract_strided_slice %189 {offsets = [0, 0], sizes = [1, 1], strides = [1, 1]} : vector<1x16xf32> to vector<1x1xf32>
        %193 = arith.index_cast %arg38 : i32 to index
        %c0_130 = arith.constant 0 : index
        %194 = vector.load %arg31[%193, %c0_130] : memref<200x16xf32, #tpu.memory_space<vmem>>, vector<1x16xf32>
        tpu.vector_store %arg31[%193, %c0_130], %189 {strides = array<i32>} : memref<200x16xf32, #tpu.memory_space<vmem>>, vector<1x16xf32>,
        %195 = arith.index_cast %arg38 : i32 to index
        %c0_131 = arith.constant 0 : index
        %196 = vector.load %arg32[%195, %c0_131] : memref<200x32xf32, #tpu.memory_space<vmem>>, vector<1x32xf32>
        tpu.vector_store %arg32[%195, %c0_131], %173 {strides = array<i32>} : memref<200x32xf32, #tpu.memory_space<vmem>>, vector<1x32xf32>,
        %c0_132 = arith.constant 0 : index
        %c0_133 = arith.constant 0 : index
        %197 = vector.load %arg33[%c0_132, %c0_133] : memref<1x32xf32, #tpu.memory_space<vmem>>, vector<1x32xf32>
        tpu.vector_store %arg33[%c0_132, %c0_133], %130 {strides = array<i32>} : memref<1x32xf32, #tpu.memory_space<vmem>>, vector<1x32xf32>,
        %198 = arith.addf %99, %164 : vector<16x1xf32>
        %c0_134 = arith.constant 0 : index
        %c0_135 = arith.constant 0 : index
        %199 = vector.load %arg34[%c0_134, %c0_135] : memref<16x1xf32, #tpu.memory_space<vmem>>, vector<16x1xf32>
        tpu.vector_store %arg34[%c0_134, %c0_135], %198 {strides = array<i32>} : memref<16x1xf32, #tpu.memory_space<vmem>>, vector<16x1xf32>,
        %c0_136 = arith.constant 0 : index
        %c0_137 = arith.constant 0 : index
        %200 = vector.load %arg35[%c0_136, %c0_137] : memref<1x32xf32, #tpu.memory_space<vmem>>, vector<1x32xf32>
        tpu.vector_store %arg35[%c0_136, %c0_137], %191 {strides = array<i32>} : memref<1x32xf32, #tpu.memory_space<vmem>>, vector<1x32xf32>,
        %c0_138 = arith.constant 0 : index
        %c0_139 = arith.constant 0 : index
        %201 = vector.load %arg37[%c0_138, %c0_139] : memref<1x1xf32, #tpu.memory_space<vmem>>, vector<1x1xf32>
        %cst_140 = arith.constant 1.000000e+00 : f32
        %202 = vector.broadcast %cst_140 : f32 to vector<1x1xf32>
        %203 = arith.subf %202, %192 : vector<1x1xf32>
        %204 = arith.addf %201, %203 : vector<1x1xf32>
        %c0_141 = arith.constant 0 : index
        %c0_142 = arith.constant 0 : index
        %205 = vector.load %arg37[%c0_141, %c0_142] : memref<1x1xf32, #tpu.memory_space<vmem>>, vector<1x1xf32>
        tpu.vector_store %arg37[%c0_141, %c0_142], %204 {strides = array<i32>} : memref<1x1xf32, #tpu.memory_space<vmem>>, vector<1x1xf32>,
        %c0_143 = arith.constant 0 : index
        %c0_144 = arith.constant 0 : index
        %206 = vector.load %arg36[%c0_143, %c0_144] : memref<1x1xf32, #tpu.memory_space<vmem>>, vector<1x1xf32>
        tpu.vector_store %arg36[%c0_143, %c0_144], %192 {strides = array<i32>} : memref<1x1xf32, #tpu.memory_space<vmem>>, vector<1x1xf32>,
      } else {
      }
    }
    %c200_i32_39 = arith.constant 200 : i32
    %c0_40 = arith.constant 0 : index
    %c0_41 = arith.constant 0 : index
    %39 = vector.load %arg37[%c0_40, %c0_41] : memref<1x1xf32, #tpu.memory_space<vmem>>, vector<1x1xf32>
    %40 = arith.fptosi %39 : vector<1x1xf32> to vector<1x1xi32>
    %c0_42 = arith.constant 0 : index
    %c0_43 = arith.constant 0 : index
    %41 = vector.load %arg30[%c0_42, %c0_43] : memref<1x1xi32, #tpu.memory_space<vmem>>, vector<1x1xi32>
    tpu.vector_store %arg30[%c0_42, %c0_43], %40 {strides = array<i32>} : memref<1x1xi32, #tpu.memory_space<vmem>>, vector<1x1xi32>,
    %c0_44 = arith.constant 0 : index
    %c0_45 = arith.constant 0 : index
    %42 = vector.load %arg31[%c0_44, %c0_45] : memref<200x16xf32, #tpu.memory_space<vmem>>, vector<200x16xf32>
    %c0_46 = arith.constant 0 : index
    %c0_47 = arith.constant 0 : index
    %43 = vector.load %arg32[%c0_46, %c0_47] : memref<200x32xf32, #tpu.memory_space<vmem>>, vector<200x32xf32>
    %c0_48 = arith.constant 0 : index
    %c0_49 = arith.constant 0 : index
    %44 = vector.load %arg20[%c0_48, %c0_49] : memref<16x32xf32, #tpu.memory_space<vmem>>, vector<16x32xf32>
    %cst_50 = arith.constant dense<0.000000e+00> : vector<200x32xf32>
    %45 = tpu.matmul %42, %44, %cst_50 {dimension_numbers = #tpu.dot_dimension_numbers<[1], [0], [0], [1], [0, 0, 1, 1], [], []>} : vector<200x16xf32>, vector<16x32xf32>, vector<200x32xf32> -> vector<200x32xf32>
    %c0_51 = arith.constant 0 : index
    %c0_52 = arith.constant 0 : index
    %46 = vector.load %arg21[%c0_51, %c0_52] : memref<32x32xf32, #tpu.memory_space<vmem>>, vector<32x32xf32>
    %cst_53 = arith.constant dense<0.000000e+00> : vector<200x32xf32>
    %47 = tpu.matmul %45, %46, %cst_53 {dimension_numbers = #tpu.dot_dimension_numbers<[1], [0], [0], [1], [0, 0, 1, 1], [], []>} : vector<200x32xf32>, vector<32x32xf32>, vector<200x32xf32> -> vector<200x32xf32>
    %c0_54 = arith.constant 0 : index
    %c0_55 = arith.constant 0 : index
    %48 = vector.load %arg22[%c0_54, %c0_55] : memref<1x32xf32, #tpu.memory_space<vmem>>, vector<1x32xf32>
    %49 = vector.broadcast %48 : vector<1x32xf32> to vector<200x32xf32>
    %50 = arith.addf %47, %49 : vector<200x32xf32>
    %51 = math.tanh %50 : vector<200x32xf32>
    %c0_56 = arith.constant 0 : index
    %c0_57 = arith.constant 0 : index
    %52 = vector.load %arg23[%c0_56, %c0_57] : memref<32x32xf32, #tpu.memory_space<vmem>>, vector<32x32xf32>
    %cst_58 = arith.constant dense<0.000000e+00> : vector<200x32xf32>
    %53 = tpu.matmul %43, %52, %cst_58 {dimension_numbers = #tpu.dot_dimension_numbers<[1], [0], [0], [1], [0, 0, 1, 1], [], []>} : vector<200x32xf32>, vector<32x32xf32>, vector<200x32xf32> -> vector<200x32xf32>
    %54 = math.tanh %53 : vector<200x32xf32>
    %c0_59 = arith.constant 0 : index
    %c0_60 = arith.constant 0 : index
    %55 = vector.load %arg24[%c0_59, %c0_60] : memref<32x32xf32, #tpu.memory_space<vmem>>, vector<32x32xf32>
    %cst_61 = arith.constant dense<0.000000e+00> : vector<200x32xf32>
    %56 = tpu.matmul %51, %55, %cst_61 {dimension_numbers = #tpu.dot_dimension_numbers<[1], [0], [0], [1], [0, 0, 1, 1], [], []>} : vector<200x32xf32>, vector<32x32xf32>, vector<200x32xf32> -> vector<200x32xf32>
    %57 = math.tanh %56 : vector<200x32xf32>
    %c0_62 = arith.constant 0 : index
    %c0_63 = arith.constant 0 : index
    %58 = vector.load %arg25[%c0_62, %c0_63] : memref<32x1xf32, #tpu.memory_space<vmem>>, vector<32x1xf32>
    %cst_64 = arith.constant dense<0.000000e+00> : vector<200x1xf32>
    %59 = tpu.matmul %54, %58, %cst_64 {dimension_numbers = #tpu.dot_dimension_numbers<[1], [0], [0], [1], [0, 0, 1, 1], [], []>} : vector<200x32xf32>, vector<32x1xf32>, vector<200x1xf32> -> vector<200x1xf32>
    %c0_65 = arith.constant 0 : index
    %c0_66 = arith.constant 0 : index
    %60 = vector.load %arg26[%c0_65, %c0_66] : memref<32x1xf32, #tpu.memory_space<vmem>>, vector<32x1xf32>
    %cst_67 = arith.constant dense<0.000000e+00> : vector<200x1xf32>
    %61 = tpu.matmul %57, %60, %cst_67 {dimension_numbers = #tpu.dot_dimension_numbers<[1], [0], [0], [1], [0, 0, 1, 1], [], []>} : vector<200x32xf32>, vector<32x1xf32>, vector<200x1xf32> -> vector<200x1xf32>
    %62 = arith.addf %59, %61 : vector<200x1xf32>
    %63 = arith.negf %62 : vector<200x1xf32>
    %64 = math.exp %63 : vector<200x1xf32>
    %cst_68 = arith.constant 1.000000e+00 : f32
    %65 = vector.broadcast %cst_68 : f32 to vector<200x1xf32>
    %66 = arith.addf %65, %64 : vector<200x1xf32>
    %67 = arith.divf %65, %66 : vector<200x1xf32>
    %68 = vector.broadcast %67 : vector<200x1xf32> to vector<200x32xf32>
    %69 = arith.mulf %68, %54 : vector<200x32xf32>
    %cst_69 = arith.constant 1.000000e+00 : f32
    %70 = vector.broadcast %cst_69 : f32 to vector<200x1xf32>
    %71 = arith.subf %70, %67 : vector<200x1xf32>
    %72 = vector.broadcast %71 : vector<200x1xf32> to vector<200x32xf32>
    %73 = arith.mulf %72, %57 : vector<200x32xf32>
    %74 = arith.addf %69, %73 : vector<200x32xf32>
    %c0_70 = arith.constant 0 : index
    %c0_71 = arith.constant 0 : index
    %75 = vector.load %arg27[%c0_70, %c0_71] : memref<32x16xf32, #tpu.memory_space<vmem>>, vector<32x16xf32>
    %cst_72 = arith.constant dense<0.000000e+00> : vector<200x16xf32>
    %76 = tpu.matmul %74, %75, %cst_72 {dimension_numbers = #tpu.dot_dimension_numbers<[1], [0], [0], [1], [0, 0, 1, 1], [], []>} : vector<200x32xf32>, vector<32x16xf32>, vector<200x16xf32> -> vector<200x16xf32>
    %c0_73 = arith.constant 0 : index
    %c0_74 = arith.constant 0 : index
    %77 = vector.load %arg28[%c0_73, %c0_74] : memref<1x16xf32, #tpu.memory_space<vmem>>, vector<1x16xf32>
    %78 = vector.broadcast %77 : vector<1x16xf32> to vector<200x16xf32>
    %79 = arith.addf %76, %78 : vector<200x16xf32>
    %80 = tpu.iota {dimensions = array<i32: 1>} : vector<200x16xi32>
    %81 = arith.sitofp %80 : vector<200x16xi32> to vector<200x16xf32>
    %cst_75 = arith.constant dense<0xFF800000> : vector<200xf32>
    %82 = vector.multi_reduction <maximumf>, %79, %cst_75 [1] : vector<200x16xf32> to vector<200xf32>
    %83 = vector.shape_cast %82 : vector<200xf32> to vector<200x1xf32>
    %84 = vector.broadcast %83 : vector<200x1xf32> to vector<200x16xf32>
    %85 = arith.cmpf oeq, %79, %84 : vector<200x16xf32>
    %cst_76 = arith.constant 1.600000e+01 : f32
    %86 = vector.broadcast %cst_76 : f32 to vector<200x16xf32>
    %87 = arith.select %85, %81, %86 : vector<200x16xi1>, vector<200x16xf32>
    %cst_77 = arith.constant dense<0x7F800000> : vector<200xf32>
    %88 = vector.multi_reduction <minimumf>, %87, %cst_77 [1] : vector<200x16xf32> to vector<200xf32>
    %89 = vector.shape_cast %88 : vector<200xf32> to vector<200x1xf32>
    %90 = arith.fptosi %89 : vector<200x1xf32> to vector<200x1xi32>
    %c0_78 = arith.constant 0 : index
    %c0_79 = arith.constant 0 : index
    %91 = vector.load %arg29[%c0_78, %c0_79] : memref<200x1xi32, #tpu.memory_space<vmem>>, vector<200x1xi32>
    tpu.vector_store %arg29[%c0_78, %c0_79], %90 {strides = array<i32>} : memref<200x1xi32, #tpu.memory_space<vmem>>, vector<200x1xi32>,
    return
  }
}

</mosaic_0001>

<bundles_post_ra>
// kernel: tpu_custom_call.1
= control target key start
LH: loop header
LB: loop body
LE: loop exit
PB: predicated region body
PF: predicated region fallthrough
CT: control target
= control target key end

     0   :  { %s4499_s6 = smov 1   ;;  %s4500_s10 = smov 2   ;;  %s5844_s0 = inlined_call_operand.smem [shape: u32[31], index: -1, kind: input, shape index: {}] }
   0x1   :  { %s4561_s5 = sld [smem:[%s5844_s0]]   ;;  %s4501_s14 = smov 3  }
   0x2   :  { %s4566_s9 = sld [smem:[%s5844_s0 + %s4499_s6]]   ;;  %s4502_s18 = smov 4  }
   0x3   :  { %s4571_s13 = sld [smem:[%s5844_s0 + %s4500_s10]]   ;;  %s4503_s22 = smov 5  }
   0x4   :  { %s4576_s17 = sld [smem:[%s5844_s0 + %s4501_s14]]   ;;  %s4504_s26 = smov 6  }
   0x5   :  { %s4581_s21 = sld [smem:[%s5844_s0 + %s4502_s18]]   ;;  %s4505_s30 = smov 7  }
   0x6   :  { %s4586_s25 = sld [smem:[%s5844_s0 + %s4503_s22]]   ;;  %s4506_s4 = smov 8  }
   0x7   :  { %s4591_s29 = sld [smem:[%s5844_s0 + %s4504_s26]]   ;;  %s4507_s10 = smov 9  }
   0x8   :  { %s4596_s3 = sld [smem:[%s5844_s0 + %s4505_s30]]   ;;  %s4508_s15 = smov 10  }
   0x9   :  { %5867 = sst [smem:[#allocation40_spill]] %s4571_s13  ;;  %s4509_s20 = smov 11  }
   0xa   :  { %s4601_s8 = sld [smem:[%s5844_s0 + %s4506_s4]]   ;;  %s4510_s26 = smov 12  }
   0xb   :  { %s4606_s14 = sld [smem:[%s5844_s0 + %s4507_s10]]   ;;  %s4511_s1 = smov 13  }
   0xc   :  { %s4611_s19 = sld [smem:[%s5844_s0 + %s4508_s15]]   ;;  %s4512_s7 = smov 14  }
   0xd   :  { %5868 = sst [smem:[#allocation41_spill]] %s4591_s29  ;;  %s4513_s15 = smov 15  }
   0xe   :  { %s4616_s24 = sld [smem:[%s5844_s0 + %s4509_s20]]   ;;  %s4514_s22 = smov 16  }
   0xf   :  { %s4621_s30 = sld [smem:[%s5844_s0 + %s4510_s26]]   ;;  %s4515_s28 = smov 17  }
  0x10   :  { %s4626_s6 = sld [smem:[%s5844_s0 + %s4511_s1]]   ;;  %s4516_s10 = smov 18  }
  0x11   :  { %5869 = sst [smem:[#allocation42_spill]] %s4606_s14  ;;  %s4517_s16 = smov 19  }
  0x12   :  { %5870 = sst [smem:[#allocation43_spill]] %s4611_s19  ;;  %s4522_s23 = smov 24  }
  0x13   :  { %s4631_s12 = sld [smem:[%s5844_s0 + %s4512_s7]]  }
  0x14   :  { %5871 = sst [smem:[#allocation44_spill]] %s4616_s24 }
  0x15   :  { %s3404_s20 = sld [smem:[%s5844_s0 + %s4513_s15]]  }
  0x16   :  { %s4639_s27 = sld [smem:[%s5844_s0 + %s4514_s22]]   ;;  %s4518_s22 = smov 20  }
  0x17   :  { %s4644_s4 = sld [smem:[%s5844_s0 + %s4515_s28]]   ;;  %s4519_s28 = smov 21  }
  0x18   :  { %s4654_s24 = sld [smem:[%s5844_s0 + %s4517_s16]]   ;;  %s4521_s16 = smov 23  }
  0x19   :  { %5872 = sst [smem:[#allocation45_spill]] %s4631_s12 }
  0x1a   :  { %s4649_s12 = sld [smem:[%s5844_s0 + %s4516_s10]]   ;;  %s4520_s10 = smov 22  }
  0x1b   :  { %s4664_s19 = sld [smem:[%s5844_s0 + %s4519_s28]]   ;;  %v67_v0 = vstv %s3404_s20  ;;  %s4523_s20 = smov 25  }
  0x1c   :  { %5873 = sst [smem:[#allocation46_spill]] %s4639_s27  ;;  %68 = vst [vmem:[#allocation9] sm:$0x1] %v67_v0 }
  0x1d   :  { %s4659_s27 = sld [smem:[%s5844_s0 + %s4518_s22]]  }
  0x1e   :  { %s4669_s15 = sld [smem:[%s5844_s0 + %s4520_s10]]   ;;  %s4524_s10 = smov 26  }
  0x1f   :  { %s4674_s22 = sld [smem:[%s5844_s0 + %s4521_s16]]  }
  0x20   :  { %5874 = sst [smem:[#allocation47_spill]] %s4649_s12  ;;  %s4525_s12 = smov 27  }
  0x21   :  { %5876 = sst [smem:[#allocation49_spill]] %s4664_s19  ;;  %s4528_s19 = smov 30  }
  0x22   :  { %s4679_s28 = sld [smem:[%s5844_s0 + %s4522_s23]]  }
  0x23   :  { %5875 = sst [smem:[#allocation48_spill]] %s4659_s27  ;;  %s4526_s27 = smov 28  }
  0x24   :  { %s4684_s7 = sld [smem:[%s5844_s0 + %s4523_s20]]   ;;  %s4527_s20 = smov 29  }
  0x25   :  { %s4689_s14 = sld [smem:[%s5844_s0 + %s4524_s10]]  }
  0x26   :  { %s4694_s13 = sld [smem:[%s5844_s0 + %s4525_s12]]  }
  0x27   :  { %s4699_s29 = sld [smem:[%s5844_s0 + %s4526_s27]]  }
  0x2a   :  { %5877 = sst [smem:[#allocation50_spill]] %s4684_s7 }
  0x2b   :  { %5878 = sst [smem:[#allocation51_spill]] %s4689_s14 }
  0x2c   :  { %s4704_s7 = sld [smem:[%s5844_s0 + %s4527_s20]]  }
  0x2d   :  { %s4709_s14 = sld [smem:[%s5844_s0 + %s4528_s19]]  }
  0x2e   :  { %69 = vsyncpa [#allocation11], 0 }
  0x2f   :  { %70 = vsyncpa [#allocation14], 0 }
  0x30   :  { %71 = vsyncpa [#allocation17], 0 }
  0x31   :  { %72 = vsyncpa [#allocation20], 0 }
  0x32   :  { %73 = vsyncpa [#allocation23], 0 }
  0x33   :  { %74 = vsyncpa [#allocation26], 0 }
  0x34   :  { %75 = vsyncpa [#allocation29], 0 }
  0x35   :  { %76 = vsyncpa [#allocation12], 0  ;;  %s94_s12 = sshll.u32 %s4566_s9, 4  ;;  %s4529_s16 = smov [#allocation13]   ;;  %s95_s12 = int_to_ptr.hbm [resolvable:$true] %s94_s12 }
  0x36   :  { %s96_s18 = sshll.u32 %s4529_s16, 4  ;;  %s122_s27 = sshll.u32 %s4586_s25, 4  ;;  %s97_s18 = int_to_ptr.vmem [resolvable:$true] %s96_s18  ;;  %s123_s27 = int_to_ptr.hbm [resolvable:$true] %s122_s27 }
  0x37   :  { %s4139_s0 = sshra.s32 %s95_s12, 4  ;;  %s4143_s26 = scalar_lea.hbm %s4566_s9, 16  ;;  %s4140_s0 = int_to_ptr.hbm [resolvable:$true] %s4139_s0 }
  0x38   :  { %s4141_s23 = scalar_lea.hbm %s4140_s0, 16  ;;  %p4144_p1 = scmp.lt.s32.totalorder %s4140_s0, %s4566_s9 }
  0x39   :  { %p4142_p0 = scmp.ne.s32.totalorder %s4140_s0, %s4141_s23  ;;  %p4145_p2 = scmp.lt.s32.totalorder %s4143_s26, %s4141_s23 }
  0x3b   :  { %p4146_p3 = por %p4145_p2, %p4144_p1 }
  0x3d   :  { %p4147_p4 = pnand %p4146_p3, %p4142_p0 }
  0x3f   :  { %4150 = shalt.err (!%p4147_p4)
}
  0x40   :  { %s4530_s20 = smov 128   ;;  %s4531_s1 = smov 8  }
  0x41   :  { %102 = dma.hbm_to_vmem [thread:$0]  %s95_s12, 256, %s97_s18, [#allocation14], %s4530_s20, %s4530_s20, %s4531_s1  }
  0x42   :  { %s4532_s2 = smov [#allocation16]   ;;  %s148_s10 = sshll.u32 %s4601_s8, 4  ;;  %s4719_s10 = int_to_ptr.hbm [resolvable:$true] %s148_s10 }
  0x43   :  { %s124_s19 = sshll.u32 %s4532_s2, 4  ;;  %s4163_s9 = sshra.s32 %s123_s27, 4  ;;  %s125_s19 = int_to_ptr.vmem [resolvable:$true] %s124_s19  ;;  %s4164_s9 = int_to_ptr.hbm [resolvable:$true] %s4163_s9 }
  0x44   :  { %s4165_s11 = scalar_lea.hbm %s4164_s9, 16  ;;  %s4167_s16 = scalar_lea.hbm %s4586_s25, 16 }
  0x45   :  { %p4166_p5 = scmp.ne.s32.totalorder %s4164_s9, %s4165_s11  ;;  %p4168_p6 = scmp.lt.s32.totalorder %s4164_s9, %s4586_s25 }
  0x46   :  { %p4169_p7 = scmp.lt.s32.totalorder %s4167_s16, %s4165_s11 }
  0x48   :  { %p4170_p8 = por %p4169_p7, %p4168_p6 }
  0x4a   :  { %p4171_p9 = pnand %p4170_p8, %p4166_p5 }
  0x4c   :  { %4174 = shalt.err (!%p4171_p9)
}
  0x4d   :  { %130 = dma.hbm_to_vmem [thread:$0]  %s123_s27, 256, %s125_s19, [#allocation17], %s4530_s20, %s4530_s20, %s4531_s1  }
  0x4e   :  { %s179_s12 = sshll.u32 %s4626_s6, 4  ;;  %s4533_s18 = smov [#allocation19]   ;;  %s180_s12 = int_to_ptr.hbm [resolvable:$true] %s179_s12 }
  0x4f   :  { %s150_s0 = sshll.u32 %s4533_s18, 4  ;;  %s4187_s23 = sshra.s32 %s4719_s10, 4  ;;  %s151_s0 = int_to_ptr.vmem [resolvable:$true] %s150_s0  ;;  %s4188_s23 = int_to_ptr.hbm [resolvable:$true] %s4187_s23 }
  0x50   :  { %s4189_s25 = scalar_lea.hbm %s4188_s23, 16  ;;  %s4191_s26 = scalar_lea.hbm %s4601_s8, 16 }
  0x51   :  { %p4190_p10 = scmp.ne.s32.totalorder %s4188_s23, %s4189_s25  ;;  %p4192_p11 = scmp.lt.s32.totalorder %s4188_s23, %s4601_s8 }
  0x52   :  { %p4193_p12 = scmp.lt.s32.totalorder %s4191_s26, %s4189_s25 }
  0x54   :  { %p4194_p13 = por %p4193_p12, %p4192_p11 }
  0x56   :  { %p4195_p0 = pnand %p4194_p13, %p4190_p10 }
  0x58   :  { %4198 = shalt.err (!%p4195_p0)
}
  0x59   :  { %156 = dma.hbm_to_vmem [thread:$0]  %s4719_s10, 256, %s151_s0, [#allocation20], %s4530_s20, %s4530_s20, %s4531_s1  }
  0x5a   :  { %s4534_s27 = smov [#allocation22]   ;;  %s209_s19 = sshll.u32 %s4654_s24, 4  ;;  %s210_s19 = int_to_ptr.hbm [resolvable:$true] %s209_s19 }
  0x5b   :  { %s181_s2 = sshll.u32 %s4534_s27, 4  ;;  %s4211_s9 = sshra.s32 %s180_s12, 4  ;;  %s182_s2 = int_to_ptr.vmem [resolvable:$true] %s181_s2  ;;  %s4212_s9 = int_to_ptr.hbm [resolvable:$true] %s4211_s9 }
  0x5c   :  { %s4213_s8 = scalar_lea.hbm %s4212_s9, 1  ;;  %s4215_s11 = scalar_lea.hbm %s4626_s6, 1 }
  0x5d   :  { %p4214_p1 = scmp.ne.s32.totalorder %s4212_s9, %s4213_s8  ;;  %p4216_p2 = scmp.lt.s32.totalorder %s4212_s9, %s4626_s6 }
  0x5e   :  { %p4217_p3 = scmp.lt.s32.totalorder %s4215_s11, %s4213_s8 }
  0x60   :  { %p4218_p4 = por %p4217_p3, %p4216_p2 }
  0x62   :  { %p4219_p5 = pnand %p4218_p4, %p4214_p1 }
  0x64   :  { %4222 = shalt.err (!%p4219_p5)
}
  0x65   :  { %184 = dma.hbm_to_vmem [thread:$0]  %s180_s12, 16, %s182_s2, [#allocation23]  }
  0x66   :  { %s234_s10 = sshll.u32 %s4674_s22, 4  ;;  %s4535_s16 = smov [#allocation25]   ;;  %s4738_s10 = int_to_ptr.hbm [resolvable:$true] %s234_s10 }
  0x67   :  { %s211_s18 = sshll.u32 %s4535_s16, 4  ;;  %s4235_s0 = sshra.s32 %s210_s19, 4  ;;  %s212_s18 = int_to_ptr.vmem [resolvable:$true] %s211_s18  ;;  %s4236_s0 = int_to_ptr.hbm [resolvable:$true] %s4235_s0 }
  0x68   :  { %s4237_s23 = scalar_lea.hbm %s4236_s0, 1  ;;  %s4239_s25 = scalar_lea.hbm %s4654_s24, 1 }
  0x69   :  { %p4238_p6 = scmp.ne.s32.totalorder %s4236_s0, %s4237_s23  ;;  %p4240_p7 = scmp.lt.s32.totalorder %s4236_s0, %s4654_s24 }
  0x6a   :  { %p4241_p8 = scmp.lt.s32.totalorder %s4239_s25, %s4237_s23 }
  0x6c   :  { %p4242_p9 = por %p4241_p8, %p4240_p7 }
  0x6e   :  { %p4243_p10 = pnand %p4242_p9, %p4238_p6 }
  0x70   :  { %4246 = shalt.err (!%p4243_p10)
}
  0x71   :  { %214 = dma.hbm_to_vmem [thread:$0]  %s210_s19, 16, %s212_s18, [#allocation26]  }
  0x72   :  { %s4536_s6 = smov [#allocation28]   ;;  %s81_s26 = sshll.u32 %s4561_s5, 4  ;;  %s4743_s26 = int_to_ptr.hbm [resolvable:$true] %s81_s26 }
  0x73   :  { %s236_s12 = sshll.u32 %s4536_s6, 4  ;;  %s4259_s27 = sshra.s32 %s4738_s10, 4  ;;  %s237_s12 = int_to_ptr.vmem [resolvable:$true] %s236_s12  ;;  %s4260_s27 = int_to_ptr.hbm [resolvable:$true] %s4259_s27 }
  0x74   :  { %s4261_s2 = scalar_lea.hbm %s4260_s27, 32  ;;  %s4263_s24 = scalar_lea.hbm %s4674_s22, 32 }
  0x75   :  { %p4262_p11 = scmp.ne.s32.totalorder %s4260_s27, %s4261_s2  ;;  %p4264_p12 = scmp.lt.s32.totalorder %s4260_s27, %s4674_s22 }
  0x76   :  { %p4265_p13 = scmp.lt.s32.totalorder %s4263_s24, %s4261_s2 }
  0x78   :  { %p4266_p0 = por %p4265_p13, %p4264_p12 }
  0x7a   :  { %p4267_p1 = pnand %p4266_p0, %p4262_p11 }
  0x7c   :  { %4270 = shalt.err (!%p4267_p1)
}
  0x7d   :  { %242 = dma.hbm_to_vmem [thread:$0]  %s4738_s10, 512, %s237_s12, [#allocation29], %s4530_s20, %s4530_s20, %s4531_s1  }
  0x7e   :  { %s112_s19 = sshll.u32 %s4581_s21, 4  ;;  %s4537_s9 = smov [#allocation10]   ;;  %s113_s19 = int_to_ptr.hbm [resolvable:$true] %s112_s19 }
  0x7f   :  { %s83_s8 = sshll.u32 %s4537_s9, 4  ;;  %s4283_s11 = sshra.s32 %s4743_s26, 4  ;;  %s84_s8 = int_to_ptr.vmem [resolvable:$true] %s83_s8  ;;  %s4284_s11 = int_to_ptr.hbm [resolvable:$true] %s4283_s11 }
  0x80   :  { %s4285_s22 = scalar_lea.hbm %s4284_s11, 16  ;;  %s4287_s16 = scalar_lea.hbm %s4561_s5, 16 }
  0x81   :  { %p4286_p2 = scmp.ne.s32.totalorder %s4284_s11, %s4285_s22  ;;  %p4288_p3 = scmp.lt.s32.totalorder %s4284_s11, %s4561_s5 }
  0x82   :  { %p4289_p4 = scmp.lt.s32.totalorder %s4287_s16, %s4285_s22 }
  0x84   :  { %p4290_p5 = por %p4289_p4, %p4288_p3 }
  0x86   :  { %p4291_p6 = pnand %p4290_p5, %p4286_p2 }
  0x88   :  { %4294 = shalt.err (!%p4291_p6)
}
  0x89   :  { %89 = dma.hbm_to_vmem [thread:$0]  %s4743_s26, 256, %s84_s8, [#allocation11], %s4530_s20, %s4530_s20, %s4531_s1  }
  0x8a   :  { %s4538_s10 = smov [#allocation15]   ;;  %s138_s0 = sshll.u32 %s4596_s3, 4  ;;  %s139_s0 = int_to_ptr.hbm [resolvable:$true] %s138_s0 }
  0x8b   :  { %s114_s18 = sshll.u32 %s4538_s10, 4  ;;  %s4307_s23 = sshra.s32 %s113_s19, 4  ;;  %s115_s18 = int_to_ptr.vmem [resolvable:$true] %s114_s18  ;;  %s4308_s23 = int_to_ptr.hbm [resolvable:$true] %s4307_s23 }
  0x8c   :  { %s4309_s5 = scalar_lea.hbm %s4308_s23, 1  ;;  %s4311_s25 = scalar_lea.hbm %s4581_s21, 1 }
  0x8d   :  { %p4310_p7 = scmp.ne.s32.totalorder %s4308_s23, %s4309_s5  ;;  %p4312_p8 = scmp.lt.s32.totalorder %s4308_s23, %s4581_s21 }
  0x8e   :  { %p4313_p9 = scmp.lt.s32.totalorder %s4311_s25, %s4309_s5 }
  0x90   :  { %p4314_p10 = por %p4313_p9, %p4312_p8 }
  0x92   :  { %p4315_p11 = pnand %p4314_p10, %p4310_p7 }
  0x94   :  { %4318 = shalt.err (!%p4315_p11)
}
  0x95   :  { %117 = dma.hbm_to_vmem [thread:$0]  %s113_s19, 16, %s115_s18, [#allocation14]  }
  0x96   :  { %s168_s6 = sshll.u32 %s4621_s30, 4  ;;  %s4539_s12 = smov [#allocation18]   ;;  %s169_s6 = int_to_ptr.hbm [resolvable:$true] %s168_s6 }
  0x97   :  { %s140_s26 = sshll.u32 %s4539_s12, 4  ;;  %s4331_s27 = sshra.s32 %s139_s0, 4  ;;  %s141_s26 = int_to_ptr.vmem [resolvable:$true] %s140_s26  ;;  %s4332_s27 = int_to_ptr.hbm [resolvable:$true] %s4331_s27 }
  0x98   :  { %s4333_s2 = scalar_lea.hbm %s4332_s27, 1  ;;  %s4335_s24 = scalar_lea.hbm %s4596_s3, 1 }
  0x99   :  { %p4334_p12 = scmp.ne.s32.totalorder %s4332_s27, %s4333_s2  ;;  %p4336_p13 = scmp.lt.s32.totalorder %s4332_s27, %s4596_s3 }
  0x9a   :  { %p4337_p0 = scmp.lt.s32.totalorder %s4335_s24, %s4333_s2 }
  0x9c   :  { %p4338_p1 = por %p4337_p0, %p4336_p13 }
  0x9e   :  { %p4339_p2 = pnand %p4338_p1, %p4334_p12 }
  0xa0   :  { %4342 = shalt.err (!%p4339_p2)
}
  0xa1   :  { %143 = dma.hbm_to_vmem [thread:$0]  %s139_s0, 16, %s141_s26, [#allocation17]  }
  0xa2   :  { %s4540_s21 = smov [#allocation21]   ;;  %s196_s9 = sshll.u32 %s4644_s4, 4  ;;  %s197_s9 = int_to_ptr.hbm [resolvable:$true] %s196_s9 }
  0xa3   :  { %s170_s19 = sshll.u32 %s4540_s21, 4  ;;  %s4355_s8 = sshra.s32 %s169_s6, 4  ;;  %s171_s19 = int_to_ptr.vmem [resolvable:$true] %s170_s19  ;;  %s4356_s8 = int_to_ptr.hbm [resolvable:$true] %s4355_s8 }
  0xa4   :  { %s4357_s11 = scalar_lea.hbm %s4356_s8, 1  ;;  %s4359_s22 = scalar_lea.hbm %s4621_s30, 1 }
  0xa5   :  { %p4358_p3 = scmp.ne.s32.totalorder %s4356_s8, %s4357_s11  ;;  %p4360_p4 = scmp.lt.s32.totalorder %s4356_s8, %s4621_s30 }
  0xa6   :  { %p4361_p5 = scmp.lt.s32.totalorder %s4359_s22, %s4357_s11 }
  0xa8   :  { %p4362_p6 = por %p4361_p5, %p4360_p4 }
  0xaa   :  { %p4363_p7 = pnand %p4362_p6, %p4358_p3 }
  0xac   :  { %4366 = shalt.err (!%p4363_p7)
}
  0xad   :  { %173 = dma.hbm_to_vmem [thread:$0]  %s169_s6, 16, %s171_s19, [#allocation20]  }
  0xae   :  { %s224_s3 = sshll.u32 %s4669_s15, 4  ;;  %s4541_s16 = smov [#allocation24]   ;;  %s225_s3 = int_to_ptr.hbm [resolvable:$true] %s224_s3 }
  0xaf   :  { %s198_s10 = sshll.u32 %s4541_s16, 4  ;;  %s4379_s18 = sshra.s32 %s197_s9, 4  ;;  %s199_s10 = int_to_ptr.vmem [resolvable:$true] %s198_s10  ;;  %s4380_s18 = int_to_ptr.hbm [resolvable:$true] %s4379_s18 }
  0xb0   :  { %s4381_s0 = scalar_lea.hbm %s4380_s18, 1  ;;  %s4383_s23 = scalar_lea.hbm %s4644_s4, 1 }
  0xb1   :  { %p4382_p8 = scmp.ne.s32.totalorder %s4380_s18, %s4381_s0  ;;  %p4384_p9 = scmp.lt.s32.totalorder %s4380_s18, %s4644_s4 }
  0xb2   :  { %p4385_p10 = scmp.lt.s32.totalorder %s4383_s23, %s4381_s0 }
  0xb4   :  { %p4386_p11 = por %p4385_p10, %p4384_p9 }
  0xb6   :  { %p4387_p12 = pnand %p4386_p11, %p4382_p8 }
  0xb8   :  { %4390 = shalt.err (!%p4387_p12)
}
  0xb9   :  { %201 = dma.hbm_to_vmem [thread:$0]  %s197_s9, 16, %s199_s10, [#allocation23]  }
  0xba   :  { %s4542_s30 = smov [#allocation27]   ;;  %s247_s25 = sshll.u32 %s4679_s28, 4  ;;  %s248_s25 = int_to_ptr.hbm [resolvable:$true] %s247_s25 }
  0xbb   :  { %s226_s5 = sshll.u32 %s4542_s30, 4  ;;  %s4403_s6 = sshra.s32 %s225_s3, 4  ;;  %s227_s5 = int_to_ptr.vmem [resolvable:$true] %s226_s5  ;;  %s4404_s6 = int_to_ptr.hbm [resolvable:$true] %s4403_s6 }
  0xbc   :  { %s4405_s12 = scalar_lea.hbm %s4404_s6, 1  ;;  %s4407_s26 = scalar_lea.hbm %s4669_s15, 1 }
  0xbd   :  { %p4406_p13 = scmp.ne.s32.totalorder %s4404_s6, %s4405_s12  ;;  %p4408_p0 = scmp.lt.s32.totalorder %s4404_s6, %s4669_s15 }
  0xbe   :  { %p4409_p1 = scmp.lt.s32.totalorder %s4407_s26, %s4405_s12 }
  0xc0   :  { %p4410_p2 = por %p4409_p1, %p4408_p0 }
  0xc2   :  { %p4411_p3 = pnand %p4410_p2, %p4406_p13 }
  0xc4   :  { %4414 = shalt.err (!%p4411_p3)
}
  0xc5   :  { %229 = dma.hbm_to_vmem [thread:$0]  %s225_s3, 16, %s227_s5, [#allocation26]  }
  0xc6   :  { %s4543_s4 = smov [#allocation30]   ;;  %s4427_s2 = sshra.s32 %s248_s25, 4  ;;  %s4428_s2 = int_to_ptr.hbm [resolvable:$true] %s4427_s2 }
  0xc7   :  { %s249_s27 = sshll.u32 %s4543_s4, 4  ;;  %s4429_s24 = scalar_lea.hbm %s4428_s2, 32  ;;  %s250_s27 = int_to_ptr.vmem [resolvable:$true] %s249_s27 }
  0xc8   :  { %p4430_p4 = scmp.ne.s32.totalorder %s4428_s2, %s4429_s24  ;;  %s4431_s21 = scalar_lea.hbm %s4679_s28, 32 }
  0xc9   :  { %p4432_p5 = scmp.lt.s32.totalorder %s4428_s2, %s4679_s28  ;;  %p4433_p6 = scmp.lt.s32.totalorder %s4431_s21, %s4429_s24 }
  0xcb   :  { %p4434_p7 = por %p4433_p6, %p4432_p5 }
  0xcd   :  { %p4435_p8 = pnand %p4434_p7, %p4430_p4 }
  0xcf   :  { %4438 = shalt.err (!%p4435_p8)
}
  0xd0   :  { %255 = dma.hbm_to_vmem [thread:$0]  %s248_s25, 512, %s250_s27, [#allocation29], %s4530_s20, %s4530_s20, %s4531_s1  }
  0xd1   :  { %4479 = dma.done.wait [#allocation11], 256  }
  0xd2   :  { %4480 = vsyncadd [#allocation11], 4294967040 }
  0xd3   :  { %4481 = dma.done.wait [#allocation14], 272  }
  0xd4   :  { %4482 = vsyncadd [#allocation14], 4294967024 }
  0xd5   :  { %4483 = dma.done.wait [#allocation17], 272  }
  0xd6   :  { %4484 = vsyncadd [#allocation17], 4294967024 }
  0xd7   :  { %4485 = dma.done.wait [#allocation20], 272  }
  0xd8   :  { %4486 = vsyncadd [#allocation20], 4294967024 }
  0xd9   :  { %4487 = dma.done.wait [#allocation23], 32  }
  0xda   :  { %4488 = vsyncadd [#allocation23], 4294967264 }
  0xdb   :  { %4489 = dma.done.wait [#allocation26], 32  }
  0xdc   :  { %4490 = vsyncadd [#allocation26], 4294967264 }
  0xdd   :  { %4491 = dma.done.wait [#allocation29], 1024  }
  0xde   :  { %4492 = vsyncadd [#allocation29], 4294966272  ;;  %vm448_vm0 = vcmask 7168   ;;  %vm451_vm1 = vcmask 0   ;;  %v4544_v1 = vmov 0.0   ;;  %vm324_vm2 = vcmask 130048  }
  0xdf   :  { %449 = vst.msk [vmem:[#allocation5] sm:$0xff] %vm448_vm0, %v4544_v1  ;;  %v319_v2 = vld [vmem:[#allocation13 + $0x8] sm:$0xff]  ;;  %v318_v3 = vld [vmem:[#allocation13] sm:$0xff]  ;;  %v316_v4 = vld [vmem:[#allocation10] sm:$0xff]  ;;  %vm364_vm3 = vcmask 261120   ;;  %s5879_s15 = sld [smem:[#allocation41_spill]]  ;;  %v504_v43 = vlaneseq }
  0xe0   :  { %450 = vst.msk [vmem:[#allocation5 + $0x8] sm:$0xff] %vm448_vm0, %v4544_v1  ;;  %345 = vmatpush.msra.mxu0 %v319_v2  ;;  %v317_v5 = vld [vmem:[#allocation10 + $0x8] sm:$0xff]  ;;  %v359_v6 = vld [vmem:[%s4576_s17 + $0x18] sm:$0xff]  ;;  %v356_v9 = vld [vmem:[%s4576_s17] sm:$0xff]  ;;  %v4545_v17 = vmov 16.0   ;;  %vm444_vm5 = vcmask 253952  }
  0xe1   :  { %452 = vst.msk [vmem:[#allocation7] sm:$0x1] %vm451_vm1, %v4544_v1  ;;  %383 = vmatpush.msra.mxu1 %v359_v6  ;;  %3636 = vmatpush.msra.mxu3 %v359_v6  ;;  %v358_v7 = vld [vmem:[%s4576_s17 + $0x10] sm:$0xff]  ;;  %v357_v8 = vld [vmem:[%s4576_s17 + $0x8] sm:$0xff]  ;;  %s5880_s17 = sld [smem:[#allocation40_spill]]  ;;  %v505_v44 = vand.u32 127, %v504_v43 }
  0xe2   :  { %453 = vst.msk [vmem:[#allocation8] sm:$0x1] %vm451_vm1, %v4544_v1  ;;  %346 = vmatpush.msra.mxu0 %v318_v3  ;;  %v3849_v38 = vld [vmem:[#allocation15] ss:$0 sm:$0xff]  ;;  %v394_v40 = vld [vmem:[#allocation16] sm:$0xff]  ;;  %v395_v48 = vld [vmem:[#allocation16 + $0x8] sm:$0xff] }
  0xe3   :  { %454 = vst.msk [vmem:[#allocation2] sm:$0xff] %vm324_vm2, %v4544_v1  ;;  %3420 = vmatmul.msk.f32.vlgmr.msra.gmra.mxu0 %vm324_vm2, %v316_v4  ;;  %384 = vmatpush.msra.mxu1 %v358_v7  ;;  %v446_v45 = vld [vmem:[#allocation19 + $0x1] sm:$0x1]  ;;  %v4915_v46 = vcvt.s32.f32 %v505_v44  ;;  %v419_v51 = vld [vmem:[#allocation18] sm:$0x1]  ;;  %s4920_s28 = smov 0  }
  0xe4   :  { %455 = vst.msk [vmem:[#allocation2 + $0x8] sm:$0xff] %vm324_vm2, %v4544_v1  ;;  %3637 = vmatpush.msra.mxu3 %v358_v7 }
  0xe5   :  { %456 = vst.msk [vmem:[#allocation2 + $0x10] sm:$0xff] %vm324_vm2, %v4544_v1  ;;  %385 = vmatpush.msra.mxu1 %v357_v8  ;;  %v418_v10 = vld [vmem:[%s5879_s15 + $0x18] sm:$0xff]  ;;  %v417_v11 = vld [vmem:[%s5879_s15 + $0x10] sm:$0xff]  ;;  %v416_v12 = vld [vmem:[%s5879_s15 + $0x8] sm:$0xff] }
  0xe6   :  { %457 = vst.msk [vmem:[#allocation2 + $0x18] sm:$0xff] %vm324_vm2, %v4544_v1  ;;  %3638 = vmatpush.msra.mxu3 %v357_v8  ;;  %435 = vmatpush.msra.mxu2 %v418_v10  ;;  %v415_v13 = vld [vmem:[%s5879_s15] sm:$0xff] }
  0xe7   :  { %458 = vst.msk [vmem:[#allocation2 + $0x20] sm:$0xff] %vm324_vm2, %v4544_v1  ;;  %386 = vmatpush.msra.mxu1 %v356_v9  ;;  %v3848_v14 = vld [vmem:[%s5880_s17] ss:$0 sm:$0xff] }
  0xe8   :  { %459 = vst.msk [vmem:[#allocation2 + $0x28] sm:$0xff] %vm324_vm2, %v4544_v1  ;;  %3639 = vmatpush.msra.mxu3 %v356_v9  ;;  %436 = vmatpush.msra.mxu2 %v417_v11 }
  0xe9   :  { %460 = vst.msk [vmem:[#allocation2 + $0x30] sm:$0xff] %vm324_vm2, %v4544_v1 }
  0xea   :  { %461 = vst.msk [vmem:[#allocation2 + $0x38] sm:$0xff] %vm324_vm2, %v4544_v1  ;;  %437 = vmatpush.msra.mxu2 %v416_v12 }
  0xeb   :  { %462 = vst.msk [vmem:[#allocation2 + $0x40] sm:$0xff] %vm324_vm2, %v4544_v1  ;;  %3421 = vmatmul.msk.f32.gmra.mxu0 %vm324_vm2, %v317_v5 }
  0xec   :  { %463 = vst.msk [vmem:[#allocation2 + $0x48] sm:$0xff] %vm324_vm2, %v4544_v1  ;;  %438 = vmatpush.msra.mxu2 %v415_v13 }
  0xed   :  { %464 = vst.msk [vmem:[#allocation2 + $0x50] sm:$0xff] %vm324_vm2, %v4544_v1 }
  0xee   :  { %465 = vst.msk [vmem:[#allocation2 + $0x58] sm:$0xff] %vm324_vm2, %v4544_v1 }
  0xef   :  { %466 = vst.msk [vmem:[#allocation2 + $0x60] sm:$0xff] %vm324_vm2, %v4544_v1 }
  0xf0   :  { %467 = vst.msk [vmem:[#allocation2 + $0x68] sm:$0xff] %vm324_vm2, %v4544_v1 }
  0xf1   :  { %468 = vst.msk [vmem:[#allocation2 + $0x70] sm:$0xff] %vm324_vm2, %v4544_v1 }
  0xf2   :  { %469 = vst.msk [vmem:[#allocation2 + $0x78] sm:$0xff] %vm324_vm2, %v4544_v1 }
  0xf3   :  { %470 = vst.msk [vmem:[#allocation2 + $0x80] sm:$0xff] %vm324_vm2, %v4544_v1 }
  0xf4   :  { %471 = vst.msk [vmem:[#allocation2 + $0x88] sm:$0xff] %vm324_vm2, %v4544_v1 }
  0xf5   :  { %472 = vst.msk [vmem:[#allocation2 + $0x90] sm:$0xff] %vm324_vm2, %v4544_v1 }
  0xf6   :  { %473 = vst.msk [vmem:[#allocation2 + $0x98] sm:$0xff] %vm324_vm2, %v4544_v1 }
  0xf7   :  { %474 = vst.msk [vmem:[#allocation2 + $0xa0] sm:$0xff] %vm324_vm2, %v4544_v1 }
  0xf8   :  { %475 = vst.msk [vmem:[#allocation2 + $0xa8] sm:$0xff] %vm324_vm2, %v4544_v1 }
  0xf9   :  { %476 = vst.msk [vmem:[#allocation2 + $0xb0] sm:$0xff] %vm324_vm2, %v4544_v1 }
  0xfa   :  { %477 = vst.msk [vmem:[#allocation2 + $0xb8] sm:$0xff] %vm324_vm2, %v4544_v1 }
  0xfb   :  { %478 = vst.msk [vmem:[#allocation2 + $0xc0] sm:$0xff] %vm324_vm2, %v4544_v1 }
  0xfc   :  { %479 = vst.msk [vmem:[#allocation3] sm:$0xff] %vm364_vm3, %v4544_v1 }
  0xfd   :  { %480 = vst.msk [vmem:[#allocation3 + $0x8] sm:$0xff] %vm364_vm3, %v4544_v1 }
  0xfe   :  { %481 = vst.msk [vmem:[#allocation3 + $0x10] sm:$0xff] %vm364_vm3, %v4544_v1 }
  0xff   :  { %482 = vst.msk [vmem:[#allocation3 + $0x18] sm:$0xff] %vm364_vm3, %v4544_v1 }
 0x100   :  { %483 = vst.msk [vmem:[#allocation3 + $0x20] sm:$0xff] %vm364_vm3, %v4544_v1 }
 0x101   :  { %484 = vst.msk [vmem:[#allocation3 + $0x28] sm:$0xff] %vm364_vm3, %v4544_v1 }
 0x102   :  { %485 = vst.msk [vmem:[#allocation3 + $0x30] sm:$0xff] %vm364_vm3, %v4544_v1 }
 0x103   :  { %486 = vst.msk [vmem:[#allocation3 + $0x38] sm:$0xff] %vm364_vm3, %v4544_v1 }
 0x104   :  { %487 = vst.msk [vmem:[#allocation3 + $0x40] sm:$0xff] %vm364_vm3, %v4544_v1 }
 0x105   :  { %488 = vst.msk [vmem:[#allocation3 + $0x48] sm:$0xff] %vm364_vm3, %v4544_v1 }
 0x106   :  { %489 = vst.msk [vmem:[#allocation3 + $0x50] sm:$0xff] %vm364_vm3, %v4544_v1 }
 0x107   :  { %490 = vst.msk [vmem:[#allocation3 + $0x58] sm:$0xff] %vm364_vm3, %v4544_v1 }
 0x108   :  { %491 = vst.msk [vmem:[#allocation3 + $0x60] sm:$0xff] %vm364_vm3, %v4544_v1 }
 0x109   :  { %492 = vst.msk [vmem:[#allocation3 + $0x68] sm:$0xff] %vm364_vm3, %v4544_v1 }
 0x10a   :  { %493 = vst.msk [vmem:[#allocation3 + $0x70] sm:$0xff] %vm364_vm3, %v4544_v1 }
 0x10b   :  { %494 = vst.msk [vmem:[#allocation3 + $0x78] sm:$0xff] %vm364_vm3, %v4544_v1 }
 0x10c   :  { %495 = vst.msk [vmem:[#allocation3 + $0x80] sm:$0xff] %vm364_vm3, %v4544_v1 }
 0x10d   :  { %496 = vst.msk [vmem:[#allocation3 + $0x88] sm:$0xff] %vm364_vm3, %v4544_v1 }
 0x10e   :  { %497 = vst.msk [vmem:[#allocation3 + $0x90] sm:$0xff] %vm364_vm3, %v4544_v1 }
 0x10f   :  { %498 = vst.msk [vmem:[#allocation3 + $0x98] sm:$0xff] %vm364_vm3, %v4544_v1 }
 0x110   :  { %499 = vst.msk [vmem:[#allocation3 + $0xa0] sm:$0xff] %vm364_vm3, %v4544_v1 }
 0x111   :  { %500 = vst.msk [vmem:[#allocation3 + $0xa8] sm:$0xff] %vm364_vm3, %v4544_v1 }
 0x112   :  { %501 = vst.msk [vmem:[#allocation3 + $0xb0] sm:$0xff] %vm364_vm3, %v4544_v1 }
 0x113   :  { %502 = vst.msk [vmem:[#allocation3 + $0xb8] sm:$0xff] %vm364_vm3, %v4544_v1 }
 0x114   :  { %503 = vst.msk [vmem:[#allocation3 + $0xc0] sm:$0xff] %vm364_vm3, %v4544_v1 }
 0x115   :  { %447 = vst.msk [vmem:[#allocation6] sm:$0x1] %vm444_vm5, %v446_v45 }
 0x116   :  { %5881 = vst [vmem:[#allocation52_spill] sm:$0xff] %v4915_v46 }
 0x160   :  { %v348_v15 = vpop.f32.mrf.mxu0 }
 0x161   :  { %v349_v16 = vadd.f32 %v3848_v14, %v348_v15 }
 0x163   :  { %3850 = vtanh.f32 %v349_v16 }
 0x164   :  { %3852 = vrcp.f32 %v4545_v17 }
 0x168   :  { %v351_v18 = vpop.f32.mrf.mxu0 }
 0x169   :  { %v4899_v19 = vpop.eup %3850  ;;  %v352_v20 = vadd.f32 %v3848_v14, %v351_v18 }
 0x16a   :  { %3422 = vmatmul.msk.f32.vlgmr.msra.gmra.mxu1 %vm364_vm3, %v4899_v19  ;;  %v3853_v21 = vpop.eup %3852  ;;  %v398_v24 = vsel %vm364_vm3, %v4899_v19, 0.0 }
 0x16b   :  { %3854 = vtanh.f32 %v352_v20  ;;  %v408_v22 = vmul.f32 16.0, %v3853_v21  ;;  %vm412_vm4 = vweird.f32 %v3853_v21 }
 0x16d   :  { %v409_v26 = vsub.f32 1.0, %v408_v22 }
 0x16f   :  { %v410_v29 = vmul.f32 %v3853_v21, %v409_v26 }
 0x171   :  { %v4903_v23 = vpop.eup %3854  ;;  %v411_v32 = vadd.f32 %v3853_v21, %v410_v29 }
 0x172   :  { %v399_v25 = vsel %vm364_vm3, %v4903_v23, 0.0  ;;  %3423 = vmatmul.msk.f32.vlgmr.msra.gmra.mxu3 %vm364_vm3, %v4903_v23 }
 0x173   :  { %v400_v27 = vadd.f32 %v399_v25, %v398_v24  ;;  %v413_v35 = vsel %vm412_vm4, %v3853_v21, %v411_v32 }
 0x175   :  { %v401_v28 = vrot.slane %v400_v27, 4 }
 0x177   :  { %v402_v30 = vadd.f32 %v401_v28, %v400_v27 }
 0x179   :  { %v403_v31 = vrot.slane %v402_v30, 2 }
 0x17b   :  { %v404_v33 = vadd.f32 %v403_v31, %v402_v30 }
 0x17d   :  { %v405_v34 = vrot.slane %v404_v33, 1 }
 0x17f   :  { %v406_v36 = vadd.f32 %v405_v34, %v404_v33 }
 0x181   :  { %v414_v37 = vmul.f32 %v413_v35, %v406_v36 }
 0x183   :  { %3424 = vmatmul.msk.f32.vlgmr.msra.gmra.mxu2 %vm364_vm3, %v414_v37 }
 0x1e7   :  { %v388_v39 = vpop.f32.mrf.mxu1 }
 0x1e8   :  { %v389_v41 = vadd.f32 %v3849_v38, %v388_v39 }
 0x1ea   :  { %v4912_v42 = vadd.f32 %v394_v40, %v389_v41 }
 0x1f5   :  { %v391_v47 = vpop.f32.mrf.mxu3 }
 0x1f6   :  { %v392_v49 = vadd.f32 %v3849_v38, %v391_v47 }
 0x1f8   :  { %v4917_v50 = vadd.f32 %v395_v48, %v392_v49 }
 0x206   :  { %v440_v52 = vpop.f32.mrf.mxu2 }
 0x207   :  { %v441_v53 = vadd.f32 %v440_v52, %v419_v51 }
 0x209   :  { %3856 = vtanh.f32 %v441_v53 }
 0x20f   :  { %v3857_v54 = vpop.eup %3856 }
 0x210   :  { %445 = vst.msk [vmem:[#allocation4] sm:$0x1] %vm444_vm5, %v3857_v54 }
 0x211 LB: > { %v513_v55 = vld [vmem:[#allocation7] sm:$0x1]  ;;  %s4497_s28 = sphi %s4920_s28, %s512_s28  }
 0x212   : > { %3650 = vpush %v513_v55 }
 0x243   : > { %s3651_s20 = spop %3650 }
 0x244   : > { %p515_p9 = scmp.eq.f32.partialorder %s3651_s20, 0.0 }
 0x245   : > { %v3861_v56 = vld [vmem:[#allocation4] ss:$0 sm:$0xff] (%p515_p9)  ;;  %s5882_s1 = sld [smem:[#allocation42_spill]] (%p515_p9)  ;;  %s4546_s19 = smov (%p515_p9), 32   ;;  %v4942_v9 = vld [vmem:[#allocation6] sm:$0x1] (%p515_p9) }
 0x246   : > { %518 = sbr.rel (!%p515_p9) target bundleno = 2829 (0xb0d), region = 180  ;;  %525 = vrot.lane.b32.xlu0 (%p515_p9), %v3861_v56, %s4546_s19  ;;  %s5883_s9 = sld [smem:[#allocation43_spill]] (%p515_p9)  ;;  %vm551_vm6 = vcmask (%p515_p9), 523264  }
 0x247   : > { %s4547_s8 = smov (%p515_p9), 96   ;;  %s5884_s11 = sld [smem:[#allocation44_spill]] (%p515_p9) }
 0x248   : > { %s4548_s22 = smov (%p515_p9), 64   ;;  %s5885_s3 = sld [smem:[#allocation45_spill]] (%p515_p9) }
 0x249   : > { %s5886_s18 = sld [smem:[#allocation46_spill]] (%p515_p9)  ;;  %s937_s23 = scalar_lea.vmem (%p515_p9), [#allocation3], %s4497_s28 }
 0x24a   : > { %s5887_s0 = sld [smem:[#allocation47_spill]] (%p515_p9)  ;;  %s935_s30 = scalar_lea.vmem (%p515_p9), [#allocation2], %s4497_s28 }
 0x24b   : > { %v543_v57 = vld [vmem:[%s5882_s1 + $0x70] sm:$0xff]  ;;  %v544_v58 = vld [vmem:[%s5882_s1 + $0x78] sm:$0xff]  ;;  %v541_v59 = vld [vmem:[%s5882_s1 + $0x60] sm:$0xff] }
 0x24c   : > { %563 = vmatpush.msra.mxu0 %v543_v57  ;;  %v542_v60 = vld [vmem:[%s5882_s1 + $0x68] sm:$0xff]  ;;  %583 = vmatpush.msra.mxu1 %v544_v58  ;;  %v539_v61 = vld [vmem:[%s5882_s1 + $0x50] sm:$0xff]  ;;  %v540_v62 = vld [vmem:[%s5882_s1 + $0x58] sm:$0xff] }
 0x24d   : > { %v537_v63 = vld [vmem:[%s5882_s1 + $0x40] sm:$0xff]  ;;  %v538_v0 = vld [vmem:[%s5882_s1 + $0x48] sm:$0xff]  ;;  %v535_v1 = vld [vmem:[%s5882_s1 + $0x30] sm:$0xff] }
 0x24e   : > { %564 = vmatpush.msra.mxu0 %v541_v59  ;;  %584 = vmatpush.msra.mxu1 %v542_v60  ;;  %v536_v2 = vld [vmem:[%s5882_s1 + $0x38] sm:$0xff]  ;;  %v533_v3 = vld [vmem:[%s5882_s1 + $0x20] sm:$0xff]  ;;  %v534_v4 = vld [vmem:[%s5882_s1 + $0x28] sm:$0xff] }
 0x24f   : > { %v531_v5 = vld [vmem:[%s5882_s1 + $0x10] sm:$0xff]  ;;  %v532_v6 = vld [vmem:[%s5882_s1 + $0x18] sm:$0xff]  ;;  %v529_v7 = vld [vmem:[%s5882_s1] sm:$0xff] }
 0x250   : > { %565 = vmatpush.msra.mxu0 %v539_v61  ;;  %585 = vmatpush.msra.mxu1 %v540_v62  ;;  %v530_v8 = vld [vmem:[%s5882_s1 + $0x8] sm:$0xff]  ;;  %v545_v12 = vld [vmem:[%s5883_s9] sm:$0x3]  ;;  %v664_v48 = vld [vmem:[%s5884_s11 + $0x18] sm:$0xff] }
 0x251   : > { %v547_v13 = vperm.slane %v545_v12, 0  ;;  %v548_v14 = vperm.slane %v545_v12, 1  ;;  %v663_v49 = vld [vmem:[%s5884_s11 + $0x10] sm:$0xff]  ;;  %683 = vmatpush.msra.mxu3 %v664_v48  ;;  %v662_v52 = vld [vmem:[%s5884_s11 + $0x8] sm:$0xff]  ;;  %v661_v54 = vld [vmem:[%s5884_s11] sm:$0xff] }
 0x252   : > { %566 = vmatpush.msra.mxu0 %v537_v63  ;;  %586 = vmatpush.msra.mxu1 %v538_v0  ;;  %v714_v12 = vld [vmem:[%s5885_s3] sm:$0xff] }
 0x253   : > { %684 = vmatpush.msra.mxu3 %v663_v49 }
 0x254   : > { %567 = vmatpush.msra.mxu0 %v535_v1  ;;  %587 = vmatpush.msra.mxu1 %v536_v2 }
 0x255   : > { %685 = vmatpush.msra.mxu3 %v662_v52 }
 0x256   : > { %568 = vmatpush.msra.mxu0 %v533_v3  ;;  %588 = vmatpush.msra.mxu1 %v534_v4  ;;  %v4963_v4 = vld [vmem:[#allocation5] sm:$0xff] }
 0x257   : > { %686 = vmatpush.msra.mxu3 %v661_v54 }
 0x258   : > { %569 = vmatpush.msra.mxu0 %v531_v5  ;;  %589 = vmatpush.msra.mxu1 %v532_v6  ;;  %v4965_v5 = vld [vmem:[#allocation5 + $0x8] sm:$0xff]  ;;  %v4549_v6 = vmov 0  }
 0x259   : > { %3858 = vset.pattern.permute.xlu1 %v4549_v6  ;;  %3859 = vset.pattern.permute.xlu2 %v4549_v6 }
 0x25a   : > { %570 = vmatpush.msra.mxu0 %v529_v7  ;;  %590 = vmatpush.msra.mxu1 %v530_v8  ;;  %v717_v8 = vld [vmem:[%s5885_s3 + $0x18] sm:$0xff] }
 0x25b   : > { %3860 = vset.pattern.permute.xlu0 %v4549_v6  ;;  %740 = vmatpush.msrb.mxu3 %v717_v8 }
 0x2b8   : > { %v4944_v10 = vpop.permute.xlu0 %525 }
 0x2b9   : > { %v528_v11 = vsel %vm364_vm3, %v4942_v9, %v4944_v10 }
 0x2ba   : > { %3425 = vmatmul.msk.f32.vlgmr.msra.gmra.mxu0 %vm551_vm6, %v528_v11  ;;  %3426 = vmatmul.msk.f32.vlgmr.msra.gmra.mxu1 %vm551_vm6, %v528_v11  ;;  %v715_v11 = vld [vmem:[%s5885_s3 + $0x8] sm:$0xff] }
 0x337   : > { %v572_v15 = vpop.f32.mrf.mxu0  ;;  %v592_v16 = vpop.f32.mrf.mxu1 }
 0x338   : > { %v573_v17 = vadd.f32 %v572_v15, %v547_v13  ;;  %v593_v18 = vadd.f32 %v592_v16, %v548_v14  ;;  %v3862_v13 = vld [vmem:[#allocation22] ss:$0 sm:$0xff]  ;;  %v665_v14 = vld [vmem:[#allocation21] sm:$0x1] }
 0x33a   : > { %620 = vrot.lane.b32.xlu2 %v593_v18, %s4546_s19  ;;  %643 = vrot.lane.b32.xlu1 %v593_v18, %s4547_s8 }
 0x33b   : > { %596 = vrot.lane.b32.xlu0 %v573_v17, %s4546_s19 }
 0x394   : > { %v621_v41 = vpop.permute.xlu2 %620 }
 0x395   : > { %v623_v43 = vadd.f32 %v621_v41, %v573_v17 }
 0x397   : > { %v3428_v44 = vmul.f32 -1.442695, %v623_v43 }
 0x3ac   : > { %v644_v35 = vpop.permute.xlu1 %643 }
 0x3ad   : > { %v597_v20 = vpop.permute.xlu0 %596 }
 0x3ae   : > { %v599_v21 = vadd.f32 %v597_v20, %v573_v17 }
 0x3b0   : > { %v3427_v22 = vmul.f32 -1.442695, %v599_v21 }
 0x3b2   : > { %3864 = vpow2.f32 %v3427_v22 }
 0x3b8   : > { %v3865_v24 = vpop.eup %3864 }
 0x3b9   : > { %v603_v25 = vadd.f32 1.0, %v3865_v24 }
 0x3bb   : > { %3866 = vrcp.f32 %v603_v25  ;;  %v615_v29 = vand.u32 2147483648, %v603_v25  ;;  %v613_v31 = vand.u32 2147483647, %v603_v25  ;;  %vm609_vm8 = vweird.f32 %v603_v25 }
 0x3bd   : > { %v616_v33 = vor.u32 1.1754944e-38, %v615_v29  ;;  %vm614_vm10 = vcmp.eq.f32.partialorder %v613_v31, 8.507059e+37  ;;  %v3863_v31 = vld [vmem:[#allocation9] ss:$0 sm:$0xff] }
 0x3c1   : > { %v3867_v26 = vpop.eup %3866 }
 0x3c2   : > { %v605_v27 = vmul.f32 %v3867_v26, %v603_v25  ;;  %vm610_vm7 = vweird.f32 %v3867_v26 }
 0x3c3   : > { %vm611_vm9 = vmor %vm609_vm8, %vm610_vm7 }
 0x3c4   : > { %v606_v28 = vsub.f32 1.0, %v605_v27 }
 0x3c6   : > { %v607_v30 = vmul.f32 %v3867_v26, %v606_v28 }
 0x3c8   : > { %v608_v32 = vadd.f32 %v3867_v26, %v607_v30 }
 0x3ca   : > { %v612_v34 = vsel %vm611_vm9, %v3867_v26, %v608_v32  ;;  %vm846_vm9 = vcmask 785408  }
 0x3cb   : > { %v617_v36 = vsel %vm614_vm10, %v616_v33, %v612_v34  ;;  %vm898_vm10 = vcmask 122880  }
 0x3cc   : > { %v646_v37 = vmul.f32 %v644_v35, %v617_v36 }
 0x3ce   : > { %648 = vrot.lane.b32.xlu1 %v646_v37, %s4548_s22 }
 0x3d6   : > { %694 = vperm.xlu1 %3858, %v4963_v4  }
 0x440   : > { %v649_v38 = vpop.permute.xlu1 %648 }
 0x441   : > { %v651_v39 = vadd.f32 %v649_v38, %v573_v17 }
 0x443   : > { %3868 = vtanh.f32 %v651_v39 }
 0x444   : > { %3870 = vpow2.f32 %v3428_v44 }
 0x448   : > { %v695_v15 = vpop.permute.xlu1 %694 }
 0x449   : > { %v3869_v40 = vpop.eup %3868  ;;  %v705_v18 = vmul.f32 %v3862_v13, %v695_v15 }
 0x44a   : > { %655 = vrot.lane.b32.xlu2 %v3869_v40, %s4547_s8  ;;  %v3871_v45 = vpop.eup %3870 }
 0x44b   : > { %v627_v47 = vadd.f32 1.0, %v3871_v45 }
 0x44d   : > { %3872 = vrcp.f32 %v627_v47  ;;  %v639_v58 = vand.u32 2147483648, %v627_v47  ;;  %vm633_vm12 = vweird.f32 %v627_v47  ;;  %v637_v59 = vand.u32 2147483647, %v627_v47 }
 0x44f   : > { %v640_v61 = vor.u32 1.1754944e-38, %v639_v58  ;;  %vm638_vm14 = vcmp.eq.f32.partialorder %v637_v59, 8.507059e+37 }
 0x452   : > { %699 = vperm.xlu2 %3859, %v4965_v5  }
 0x453   : > { %v3873_v51 = vpop.eup %3872 }
 0x454   : > { %v629_v53 = vmul.f32 %v3873_v51, %v627_v47  ;;  %vm634_vm11 = vweird.f32 %v3873_v51 }
 0x455   : > { %vm635_vm13 = vmor %vm633_vm12, %vm634_vm11 }
 0x456   : > { %v630_v55 = vsub.f32 1.0, %v629_v53 }
 0x458   : > { %v631_v56 = vmul.f32 %v3873_v51, %v630_v55 }
 0x45a   : > { %v632_v57 = vadd.f32 %v3873_v51, %v631_v56 }
 0x45c   : > { %v636_v60 = vsel %vm635_vm13, %v3873_v51, %v632_v57 }
 0x45d   : > { %v641_v62 = vsel %vm638_vm14, %v640_v61, %v636_v60 }
 0x45e   : > { %v653_v63 = vsub.f32 1.0, %v641_v62  ;;  %v659_v2 = vmul.f32 %v641_v62, %v4944_v10  ;;  %v716_v10 = vld [vmem:[%s5885_s3 + $0x10] sm:$0xff] }
 0x45f   : > { %741 = vmatpush.msrb.mxu3 %v716_v10 }
 0x461   : > { %742 = vmatpush.msrb.mxu3 %v715_v11 }
 0x463   : > { %743 = vmatpush.msrb.mxu3 %v714_v12 }
 0x4a4   : > { %v656_v0 = vpop.permute.xlu2 %655 }
 0x4a5   : > { %v658_v1 = vmul.f32 %v656_v0, %v653_v63 }
 0x4a7   : > { %v660_v3 = vadd.f32 %v659_v2, %v658_v1 }
 0x4a9   : > { %667 = vrot.lane.b32.xlu0 %v660_v3, %s4547_s8 }
 0x4ac   : > { %v700_v21 = vpop.permute.xlu2 %699 }
 0x4ad   : > { %v706_v24 = vmul.f32 %v3862_v13, %v700_v21 }
 0x51b   : > { %v4969_v7 = vpop.permute.xlu0 %667 }
 0x51c   : > { %939 = vst.msk [vmem:[#allocation4] sm:$0x1] %vm444_vm5, %v4969_v7  ;;  %3429 = vmatmul.msk.f32.vlgmr.msra.gmra.mxu3 %vm364_vm3, %v4969_v7 }
 0x59f   : > { %v688_v16 = vpop.f32.mrf.mxu3 }
 0x5a0   : > { %v689_v17 = vadd.f32 %v688_v16, %v665_v14 }
 0x5a2   : > { %v707_v20 = vperm.slane %v689_v17, 0 }
 0x5a4   : > { %v708_v22 = vadd.f32 %v707_v20, %v705_v18  ;;  %v709_v26 = vadd.f32 %v707_v20, %v706_v24  ;;  %v844_v24 = vld [vmem:[%s5886_s18 + $0x58] sm:$0xff] }
 0x5a5   : > { %854 = vmatpush.msra.mxu2 %v844_v24 }
 0x5a6   : > { %v710_v25 = vadd.f32 %v708_v22, %v4912_v42  ;;  %v711_v27 = vadd.f32 %v709_v26, %v4917_v50  ;;  %v823_v22 = vperm.slane %v4942_v9, 0  ;;  %v842_v26 = vld [vmem:[%s5886_s18 + $0x48] sm:$0xff]  ;;  %v837_v9 = vld [vmem:[%s5886_s18 + $0x20] sm:$0xff] }
 0x5a8   : > { %3874 = vtanh.f32 %v710_v25  ;;  %v843_v25 = vld [vmem:[%s5886_s18 + $0x50] sm:$0xff] }
 0x5a9   : > { %3876 = vtanh.f32 %v711_v27  ;;  %855 = vmatpush.msra.mxu2 %v843_v25  ;;  %v840_v27 = vld [vmem:[%s5886_s18 + $0x38] sm:$0xff] }
 0x5ab   : > { %856 = vmatpush.msra.mxu2 %v842_v26 }
 0x5ae   : > { %v3875_v28 = vpop.eup %3874 }
 0x5af   : > { %3430 = vmatmul.msk.f32.vlgmr.msrb.gmra.mxu3 %vm364_vm3, %v3875_v28  ;;  %v3877_v29 = vpop.eup %3876  ;;  %v839_v28 = vld [vmem:[%s5886_s18 + $0x30] sm:$0xff] }
 0x5b7   : > { %3431 = vmatmul.msk.f32.gmra.mxu3 %vm364_vm3, %v3877_v29  ;;  %v838_v29 = vld [vmem:[%s5886_s18 + $0x28] sm:$0xff] }
 0x632   : > { %v745_v30 = vpop.f32.mrf.mxu3 }
 0x633   : > { %v746_v32 = vadd.f32 %v3863_v31, %v745_v30 }
 0x635   : > { %v751_v35 = vsel %vm448_vm0, %v746_v32, -inf }
 0x63a   : > { %v748_v33 = vpop.f32.mrf.mxu3 }
 0x63b   : > { %v749_v34 = vadd.f32 %v3863_v31, %v748_v33 }
 0x63d   : > { %v752_v36 = vsel %vm448_vm0, %v749_v34, -inf }
 0x63e   : > { %v753_v37 = vmax.f32 %v751_v35, %v752_v36 }
 0x640   : > { %754 = vmax.xlane.f32.xlu0 %v753_v37 }
 0x6b3   : > { %v755_v38 = vpop.xlane.xlu0 %754 }
 0x6b4   : > { %v756_v39 = vrot.slane %v755_v38, 4 }
 0x6b6   : > { %v757_v40 = vmax.f32 %v755_v38, %v756_v39  ;;  %v834_v38 = vld [vmem:[%s5886_s18 + $0x8] sm:$0xff] }
 0x6b8   : > { %v758_v41 = vrot.slane %v757_v40, 2 }
 0x6ba   : > { %v759_v43 = vmax.f32 %v757_v40, %v758_v41 }
 0x6bc   : > { %v760_v44 = vrot.slane %v759_v43, 1 }
 0x6be   : > { %v761_v45 = vmax.f32 %v759_v43, %v760_v44 }
 0x6c0   : > { %3652 = vpush %v761_v45 }
 0x6f1   : > { %s3653_s16 = spop %3652 }
 0x6f2   : > { %v763_v47 = vstv %s3653_s16 }
 0x6f3   : > { %v764_v48 = vsub.f32 %v746_v32, %v763_v47  ;;  %v765_v49 = vsub.f32 %v749_v34, %v763_v47  ;;  %v836_v32 = vld [vmem:[%s5886_s18 + $0x18] sm:$0xff]  ;;  %v835_v34 = vld [vmem:[%s5886_s18 + $0x10] sm:$0xff]  ;;  %v833_v47 = vld [vmem:[%s5886_s18] sm:$0xff] }
 0x6f5   : > { %v766_v51 = vmul.f32 1.442695, %v764_v48  ;;  %v768_v52 = vmul.f32 1.442695, %v765_v49  ;;  %v873_v48 = vld [vmem:[%s5887_s0 + $0x18] sm:$0xff]  ;;  %v872_v49 = vld [vmem:[%s5887_s0 + $0x10] sm:$0xff] }
 0x6f6   : > { %890 = vmatpush.msrb.mxu0 %v873_v48 }
 0x6f7   : > { %3878 = vpow2.f32 %v766_v51  ;;  %v871_v51 = vld [vmem:[%s5887_s0 + $0x8] sm:$0xff] }
 0x6f8   : > { %3880 = vpow2.f32 %v768_v52  ;;  %891 = vmatpush.msrb.mxu0 %v872_v49 }
 0x6fa   : > { %892 = vmatpush.msrb.mxu0 %v871_v51 }
 0x6fd   : > { %v3879_v53 = vpop.eup %3878 }
 0x6fe   : > { %v3881_v54 = vpop.eup %3880  ;;  %v770_v55 = vsel %vm448_vm0, %v3879_v53, 0.0 }
 0x6ff   : > { %v771_v56 = vsel %vm448_vm0, %v3881_v54, 0.0 }
 0x700   : > { %v772_v57 = vadd.f32 %v771_v56, %v770_v55  ;;  %v870_v56 = vld [vmem:[%s5887_s0] sm:$0xff] }
 0x701   : > { %893 = vmatpush.msrb.mxu0 %v870_v56 }
 0x702   : > { %773 = vadd.xlane.f32.xlu1 %v772_v57  ;;  %v845_v57 = vld [vmem:[#allocation24] sm:$0x1] }
 0x775   : > { %v774_v58 = vpop.xlane.xlu1 %773 }
 0x776   : > { %v775_v59 = vrot.slane %v774_v58, 4 }
 0x778   : > { %v776_v60 = vadd.f32 %v775_v59, %v774_v58 }
 0x77a   : > { %v777_v61 = vrot.slane %v776_v60, 2 }
 0x77c   : > { %v778_v62 = vadd.f32 %v777_v61, %v776_v60  ;;  %v874_v60 = vld [vmem:[#allocation25] sm:$0x1] }
 0x77e   : > { %v779_v63 = vrot.slane %v778_v62, 1 }
 0x780   : > { %v780_v0 = vadd.f32 %v779_v63, %v778_v62  ;;  %v911_v63 = vld [vmem:[#allocation19 + $0x8] sm:$0xff] }
 0x781   : > { %929 = vmatpush.msrb.mxu1 %v911_v63 }
 0x782   : > { %3654 = vpush %v780_v0  ;;  %v910_v0 = vld [vmem:[#allocation19] sm:$0xff] }
 0x783   : > { %930 = vmatpush.msrb.mxu1 %v910_v0 }
 0x7b3   : > { %s3655_s10 = spop %3654 }
 0x7b4   : > { %v782_v1 = vstv %s3655_s10 }
 0x7b5   : > { %v783_v2 = vadd.f32 1e-10, %v782_v1 }
 0x7b7   : > { %3882 = vrcp.f32 %v783_v2  ;;  %v795_v10 = vand.u32 2147483648, %v783_v2  ;;  %v793_v12 = vand.u32 2147483647, %v783_v2  ;;  %vm789_vm4 = vweird.f32 %v783_v2 }
 0x7b9   : > { %v796_v14 = vor.u32 1.1754944e-38, %v795_v10  ;;  %vm794_vm8 = vcmp.eq.f32.partialorder %v793_v12, 8.507059e+37  ;;  %v4550_v10 = vmov 0.0  }
 0x7bd   : > { %v3883_v3 = vpop.eup %3882 }
 0x7be   : > { %v785_v6 = vmul.f32 %v3883_v3, %v783_v2  ;;  %vm790_vm15 = vweird.f32 %v3883_v3 }
 0x7bf   : > { %vm791_vm7 = vmor %vm789_vm4, %vm790_vm15 }
 0x7c0   : > { %v786_v8 = vsub.f32 1.0, %v785_v6 }
 0x7c2   : > { %v787_v11 = vmul.f32 %v3883_v3, %v786_v8  ;;  %v945_v8 = vld [vmem:[#allocation8] sm:$0x1] }
 0x7c4   : > { %v788_v13 = vadd.f32 %v3883_v3, %v787_v11 }
 0x7c6   : > { %v792_v15 = vsel %vm791_vm7, %v3883_v3, %v788_v13 }
 0x7c7   : > { %v797_v16 = vsel %vm794_vm8, %v796_v14, %v792_v15 }
 0x7c8   : > { %v798_v17 = vmul.f32 %v3879_v53, %v797_v16  ;;  %v799_v18 = vmul.f32 %v3881_v54, %v797_v16 }
 0x7ca   : > { %802 = vperm.xlu2 %3859, %v798_v17   ;;  %v940_v20 = vadd.f32 %v798_v17, %v4963_v4  ;;  %v941_v21 = vadd.f32 %v799_v18, %v4965_v5  ;;  %v841_v4 = vld [vmem:[%s5886_s18 + $0x40] sm:$0xff] }
 0x7cb   : > { %857 = vmatpush.msra.mxu2 %v841_v4 }
 0x7cc   : > { %942 = vst.msk [vmem:[#allocation5] sm:$0xff] %vm448_vm0, %v940_v20 }
 0x7cd   : > { %943 = vst.msk [vmem:[#allocation5 + $0x8] sm:$0xff] %vm448_vm0, %v941_v21  ;;  %858 = vmatpush.msra.mxu2 %v840_v27 }
 0x7cf   : > { %859 = vmatpush.msra.mxu2 %v839_v28 }
 0x7d1   : > { %860 = vmatpush.msra.mxu2 %v838_v29 }
 0x7d2   : > { %807 = vperm.xlu2 %3859, %v799_v18  }
 0x7d3   : > { %861 = vmatpush.msra.mxu2 %v837_v9 }
 0x7d5   : > { %862 = vmatpush.msra.mxu2 %v836_v32 }
 0x7d7   : > { %863 = vmatpush.msra.mxu2 %v835_v34 }
 0x7d9   : > { %864 = vmatpush.msra.mxu2 %v834_v38 }
 0x7da   : > { %824 = vrot.lane.b32.xlu2 %v823_v22, %s4546_s19 }
 0x7db   : > { %865 = vmatpush.msra.mxu2 %v833_v47 }
 0x824   : > { %v803_v5 = vpop.permute.xlu2 %802 }
 0x825   : > { %v810_v30 = vmul.f32 %v4899_v19, %v803_v5 }
 0x827   : > { %v812_v35 = vsel %vm364_vm3, %v810_v30, 0.0 }
 0x82c   : > { %v808_v31 = vpop.permute.xlu2 %807 }
 0x82d   : > { %v811_v33 = vmul.f32 %v4903_v23, %v808_v31 }
 0x82f   : > { %v813_v36 = vsel %vm364_vm3, %v811_v33, 0.0 }
 0x830   : > { %v814_v37 = vadd.f32 %v813_v36, %v812_v35 }
 0x832   : > { %v815_v39 = vrot.slane %v814_v37, 4 }
 0x834   : > { %v816_v40 = vadd.f32 %v815_v39, %v814_v37  ;;  %v825_v52 = vpop.permute.xlu2 %824 }
 0x835   : > { %v831_v53 = vsel %vm364_vm3, %v4969_v7, %v825_v52 }
 0x836   : > { %v817_v41 = vrot.slane %v816_v40, 2 }
 0x838   : > { %v818_v43 = vadd.f32 %v817_v41, %v816_v40 }
 0x83a   : > { %v819_v44 = vrot.slane %v818_v43, 1 }
 0x83c   : > { %v820_v45 = vadd.f32 %v819_v44, %v818_v43 }
 0x83e   : > { %828 = vrot.lane.b32.xlu2 %v820_v45, %s4548_s22 }
 0x898   : > { %v829_v54 = vpop.permute.xlu2 %828 }
 0x899   : > { %v832_v55 = vsel %vm551_vm6, %v831_v53, %v829_v54 }
 0x89a   : > { %3432 = vmatmul.msk.f32.vlgmr.msra.gmra.mxu2 %vm846_vm9, %v832_v55 }
 0x91d   : > { %v867_v58 = vpop.f32.mrf.mxu2 }
 0x91e   : > { %v868_v59 = vadd.f32 %v867_v58, %v845_v57 }
 0x920   : > { %938 = vst.msk [vmem:[%s937_s23] sm:$0x1] %vm444_vm5, %v868_v59  ;;  %3433 = vmatmul.msk.f32.vlgmr.msrb.gmra.mxu0 %vm364_vm3, %v868_v59 }
 0x99d   : > { %v895_v61 = vpop.f32.mrf.mxu0 }
 0x99e   : > { %v896_v62 = vadd.f32 %v895_v61, %v874_v60 }
 0x9a0   : > { %v899_v7 = vsel %vm898_vm10, %v896_v62, -inf }
 0x9a1   : > { %900 = vmax.xlane.f32.xlu2 %v899_v7 }
 0xa14   : > { %v901_v1 = vpop.xlane.xlu2 %900 }
 0xa15   : > { %vm902_vm6 = vcmp.eq.f32.partialorder %v896_v62, %v901_v1 }
 0xa16   : > { %v903_v2 = vsel %vm902_vm6, %v4915_v46, 16.0 }
 0xa17   : > { %v904_v3 = vsel %vm898_vm10, %v903_v2, inf }
 0xa18   : > { %905 = vmin.xlane.f32.xlu0 %v904_v3 }
 0xa8b   : > { %v906_v6 = vpop.xlane.xlu0 %905 }
 0xa8c   : > { %vm907_vm11 = vcmp.eq.f32.partialorder %v4915_v46, %v906_v6 }
 0xa8d   : > { %v3434_v11 = vsel %vm907_vm11, 1.0, %v4550_v10 }
 0xa8e   : > { %936 = vst.msk [vmem:[%s935_s30] sm:$0x1] %vm898_vm10, %v3434_v11  ;;  %v946_v12 = vsub.f32 1.0, %v3434_v11  ;;  %3435 = vmatmul.msk.f32.vlgmr.msrb.gmra.mxu1 %vm324_vm2, %v3434_v11 }
 0xa8f   : > { %949 = vst.msk [vmem:[#allocation7] sm:$0x1] %vm451_vm1, %v3434_v11 }
 0xa90   : > { %v947_v13 = vadd.f32 %v946_v12, %v945_v8 }
 0xa92   : > { %948 = vst.msk [vmem:[#allocation8] sm:$0x1] %vm451_vm1, %v947_v13 }
 0xb0b   : > { %v932_v14 = vpop.f32.mrf.mxu1 }
 0xb0c   : > { %944 = vst.msk [vmem:[#allocation6] sm:$0x1] %vm444_vm5, %v932_v14 }
 0xb0d PF: > { %s512_s28 = sadd.s32 1, %s4497_s28  }
 0xb0e   : > { %p509_p10 = scmp.ge.s32.totalorder %s512_s28, 200  }
 0xb0f   :  { %s5888_s5 = sld [smem:[#allocation48_spill]] (%p509_p10)  ;;  %v953_v17 = vld [vmem:[#allocation2] sm:$0xff] (%p509_p10)  ;;  %v972_v18 = vld [vmem:[#allocation2 + $0x98] sm:$0xff] (%p509_p10)  ;;  %v954_v20 = vld [vmem:[#allocation2 + $0x8] sm:$0xff] (%p509_p10)  ;;  %s3365_s26 = sshll.u32 (%p509_p10), %s4709_s14, 4  ;;  %s3366_s26 = int_to_ptr.hbm [resolvable:$true] %s3365_s26 }
 0xb10   :  { %511 = sbr.rel (!%p509_p10) target bundleno = 529 (0x211), region = 239  ;;  %v973_v21 = vld [vmem:[#allocation2 + $0xa0] sm:$0xff] (%p509_p10)  ;;  %v955_v19 = vld [vmem:[#allocation2 + $0x10] sm:$0xff] (%p509_p10)  ;;  %v974_v23 = vld [vmem:[#allocation2 + $0xa8] sm:$0xff] (%p509_p10)  ;;  %s5889_s25 = sld [smem:[#allocation49_spill]] (%p509_p10) }
 0xb11   :  { %v956_v42 = vld [vmem:[#allocation2 + $0x18] sm:$0xff] (%p509_p10)  ;;  %v975_v50 = vld [vmem:[#allocation2 + $0xb0] sm:$0xff] (%p509_p10)  ;;  %v957_v22 = vld [vmem:[#allocation2 + $0x20] sm:$0xff] (%p509_p10)  ;;  %s5890_s6 = sld [smem:[#allocation51_spill]] (%p509_p10)  ;;  %s4463_s4 = sshra.s32 (%p509_p10), %s3366_s26, 4  ;;  %s4464_s4 = int_to_ptr.hbm [resolvable:$true] %s4463_s4 }
 0xb12   :  { %v976_v24 = vld [vmem:[#allocation2 + $0xb8] sm:$0xff] (%p509_p10)  ;;  %v958_v25 = vld [vmem:[#allocation2 + $0x28] sm:$0xff] (%p509_p10)  ;;  %v977_v26 = vld [vmem:[#allocation2 + $0xc0] sm:$0xff] (%p509_p10)  ;;  %s5891_s12 = sld [smem:[#allocation50_spill]] (%p509_p10)  ;;  %s4465_s27 = scalar_lea.hbm (%p509_p10), %s4464_s4, 1 }
 0xb13   :  { %v959_v4 = vld [vmem:[#allocation2 + $0x30] sm:$0xff] (%p509_p10)  ;;  %v960_v5 = vld [vmem:[#allocation2 + $0x38] sm:$0xff] (%p509_p10)  ;;  %v961_v27 = vld [vmem:[#allocation2 + $0x40] sm:$0xff] (%p509_p10)  ;;  %p4466_p11 = scmp.ne.s32.totalorder (%p509_p10), %s4464_s4, %s4465_s27  ;;  %s4467_s2 = scalar_lea.hbm (%p509_p10), %s4709_s14, 1 }
 0xb14   :  { %v962_v28 = vld [vmem:[#allocation2 + $0x48] sm:$0xff] (%p509_p10)  ;;  %v963_v29 = vld [vmem:[#allocation2 + $0x50] sm:$0xff] (%p509_p10)  ;;  %v964_v30 = vld [vmem:[#allocation2 + $0x58] sm:$0xff] (%p509_p10)  ;;  %p4468_p12 = scmp.lt.s32.totalorder (%p509_p10), %s4464_s4, %s4709_s14  ;;  %p4469_p13 = scmp.lt.s32.totalorder (%p509_p10), %s4467_s2, %s4465_s27 }
 0xb15   :  { %v1004_v15 = vld [vmem:[%s5888_s5 + $0x8] sm:$0xff]  ;;  %v1003_v16 = vld [vmem:[%s5888_s5] sm:$0xff]  ;;  %v1372_v39 = vld [vmem:[#allocation28] sm:$0xff] }
 0xb16   :  { %1094 = vmatpush.msra.mxu0 %v1004_v15  ;;  %3640 = vmatpush.msra.mxu3 %v1004_v15  ;;  %v1175_v9 = vld [vmem:[%s5889_s25 + $0x18] sm:$0xff]  ;;  %v1174_v31 = vld [vmem:[%s5889_s25 + $0x10] sm:$0xff]  ;;  %v1173_v32 = vld [vmem:[%s5889_s25 + $0x8] sm:$0xff]  ;;  %p4470_p0 = por %p4469_p13, %p4468_p12 }
 0xb17   :  { %1267 = vmatpush.msra.mxu1 %v1175_v9  ;;  %v1172_v33 = vld [vmem:[%s5889_s25] sm:$0xff]  ;;  %v1375_v35 = vld [vmem:[#allocation28 + $0x18] sm:$0xff]  ;;  %v968_v44 = vld [vmem:[#allocation2 + $0x78] sm:$0xff] }
 0xb18   :  { %1095 = vmatpush.msra.mxu0 %v1003_v16  ;;  %3641 = vmatpush.msra.mxu3 %v1003_v16  ;;  %v965_v34 = vld [vmem:[#allocation2 + $0x60] sm:$0xff]  ;;  %v966_v36 = vld [vmem:[#allocation2 + $0x68] sm:$0xff]  ;;  %v967_v41 = vld [vmem:[#allocation2 + $0x70] sm:$0xff]  ;;  %p4471_p1 = pnand %p4470_p0, %p4466_p11 }
 0xb19   :  { %3436 = vmatmul.msk.f32.vlgmr.msra.gmra.mxu0 %vm324_vm2, %v953_v17  ;;  %3455 = vmatmul.msk.f32.vlgmr.msra.gmra.mxu3 %vm324_vm2, %v972_v18  ;;  %v1374_v37 = vld [vmem:[#allocation28 + $0x10] sm:$0xff]  ;;  %v1373_v38 = vld [vmem:[#allocation28 + $0x8] sm:$0xff]  ;;  %v979_v43 = vld [vmem:[#allocation3 + $0x8] sm:$0xff] }
 0xb1a   :  { %3642 = vmatpush.msrb.mxu3 %v1175_v9  ;;  %1268 = vmatpush.msra.mxu1 %v1174_v31  ;;  %v978_v40 = vld [vmem:[#allocation3] sm:$0xff]  ;;  %v980_v45 = vld [vmem:[#allocation3 + $0x10] sm:$0xff]  ;;  %v969_v48 = vld [vmem:[#allocation2 + $0x80] sm:$0xff] }
 0xb1b   :  { %1463 = vmatpush.msra.mxu2 %v1375_v35  ;;  %v981_v49 = vld [vmem:[#allocation3 + $0x18] sm:$0xff]  ;;  %v970_v53 = vld [vmem:[#allocation2 + $0x88] sm:$0xff]  ;;  %v971_v57 = vld [vmem:[#allocation2 + $0x90] sm:$0xff] }
 0xb1c   :  { %3643 = vmatpush.msrb.mxu3 %v1174_v31  ;;  %1269 = vmatpush.msra.mxu1 %v1173_v32  ;;  %v982_v54 = vld [vmem:[#allocation3 + $0x20] sm:$0xff]  ;;  %v983_v58 = vld [vmem:[#allocation3 + $0x28] sm:$0xff]  ;;  %v984_v61 = vld [vmem:[#allocation3 + $0x30] sm:$0xff] }
 0xb1d   :  { %1464 = vmatpush.msra.mxu2 %v1374_v37  ;;  %v985_v63 = vld [vmem:[#allocation3 + $0x38] sm:$0xff]  ;;  %v986_v2 = vld [vmem:[#allocation3 + $0x40] sm:$0xff]  ;;  %v987_v8 = vld [vmem:[#allocation3 + $0x48] sm:$0xff] }
 0xb1e   :  { %3644 = vmatpush.msrb.mxu3 %v1173_v32  ;;  %1270 = vmatpush.msra.mxu1 %v1172_v33  ;;  %v997_v10 = vld [vmem:[#allocation3 + $0x98] sm:$0xff]  ;;  %v1571_v12 = vld [vmem:[#allocation30 + $0x18] sm:$0xff]  ;;  %v988_v13 = vld [vmem:[#allocation3 + $0x50] sm:$0xff] }
 0xb1f   :  { %1465 = vmatpush.msra.mxu2 %v1373_v38  ;;  %v998_v14 = vld [vmem:[#allocation3 + $0xa0] sm:$0xff]  ;;  %v989_v17 = vld [vmem:[#allocation3 + $0x58] sm:$0xff]  ;;  %v999_v18 = vld [vmem:[#allocation3 + $0xa8] sm:$0xff] }
 0xb20   :  { %3645 = vmatpush.msrb.mxu3 %v1172_v33  ;;  %v1570_v16 = vld [vmem:[#allocation30 + $0x10] sm:$0xff]  ;;  %v1766_v33 = vld [vmem:[%s5891_s12 + $0x10] sm:$0xff] }
 0xb21   :  { %3437 = vmatmul.msk.f32.gmra.mxu0 %vm324_vm2, %v954_v20  ;;  %3456 = vmatmul.msk.f32.gmra.mxu3 %vm324_vm2, %v973_v21  ;;  %v990_v21 = vld [vmem:[#allocation3 + $0x60] sm:$0xff] }
 0xb22   :  { %3646 = vmatpush.msra.mxu3 %v1375_v35  ;;  %1466 = vmatpush.msra.mxu2 %v1372_v39  ;;  %v1765_v35 = vld [vmem:[%s5891_s12 + $0x8] sm:$0xff] }
 0xb23   :  { %3486 = vmatmul.msk.f32.vlgmr.msra.gmra.mxu2 %vm364_vm3, %v978_v40  ;;  %v996_v40 = vld [vmem:[#allocation3 + $0x90] sm:$0xff] }
 0xb24   :  { %3647 = vmatpush.msra.mxu3 %v1374_v37 }
 0xb26   :  { %3648 = vmatpush.msra.mxu3 %v1373_v38 }
 0xb28   :  { %3649 = vmatpush.msra.mxu3 %v1372_v39  ;;  %v5115_v39 = vld [vmem:[#allocation27] ss:$0 sm:$0xff] }
 0xb29   :  { %3438 = vmatmul.msk.f32.gmra.mxu0 %vm324_vm2, %v955_v19  ;;  %3457 = vmatmul.msk.f32.gmra.mxu3 %vm324_vm2, %v974_v23  ;;  %v1000_v19 = vld [vmem:[#allocation3 + $0xb0] sm:$0xff] }
 0xb2b   :  { %3487 = vmatmul.msk.f32.gmra.mxu2 %vm364_vm3, %v979_v43 }
 0xb31   :  { %3439 = vmatmul.msk.f32.gmra.mxu0 %vm324_vm2, %v956_v42  ;;  %3458 = vmatmul.msk.f32.gmra.mxu3 %vm324_vm2, %v975_v50  ;;  %v1569_v42 = vld [vmem:[#allocation30 + $0x8] sm:$0xff]  ;;  %v991_v50 = vld [vmem:[#allocation3 + $0x68] sm:$0xff] }
 0xb33   :  { %3488 = vmatmul.msk.f32.gmra.mxu2 %vm364_vm3, %v980_v45 }
 0xb39   :  { %3440 = vmatmul.msk.f32.gmra.mxu0 %vm324_vm2, %v957_v22  ;;  %3459 = vmatmul.msk.f32.gmra.mxu3 %vm324_vm2, %v976_v24  ;;  %v1001_v22 = vld [vmem:[#allocation3 + $0xb8] sm:$0xff] }
 0xb3b   :  { %3489 = vmatmul.msk.f32.gmra.mxu2 %vm364_vm3, %v981_v49 }
 0xb41   :  { %3441 = vmatmul.msk.f32.gmra.mxu0 %vm324_vm2, %v958_v25  ;;  %3460 = vmatmul.msk.f32.gmra.mxu3 %vm324_vm2, %v977_v26  ;;  %v1771_v25 = vld [vmem:[%s5890_s6 + $0x18] sm:$0xff] }
 0xb42   :  { %v1767_v26 = vld [vmem:[%s5891_s12 + $0x18] sm:$0xff]  ;;  %1859 = vmatpush.msrb.mxu0 %v1771_v25 }
 0xb43   :  { %3490 = vmatmul.msk.f32.gmra.mxu2 %vm364_vm3, %v982_v54  ;;  %2026 = vmatpush.msrb.mxu1 %v1767_v26 }
 0xb45   :  { %2027 = vmatpush.msrb.mxu1 %v1766_v33  ;;  %v1768_v33 = vld [vmem:[%s5890_s6] sm:$0xff] }
 0xb47   :  { %2028 = vmatpush.msrb.mxu1 %v1765_v35 }
 0xb49   :  { %3442 = vmatmul.msk.f32.gmra.mxu0 %vm324_vm2, %v959_v4  ;;  %v1568_v4 = vld [vmem:[#allocation30] sm:$0xff] }
 0xb4b   :  { %3491 = vmatmul.msk.f32.gmra.mxu2 %vm364_vm3, %v983_v58 }
 0xb51   :  { %3443 = vmatmul.msk.f32.gmra.mxu0 %vm324_vm2, %v960_v5  ;;  %v992_v5 = vld [vmem:[#allocation3 + $0x70] sm:$0xff] }
 0xb53   :  { %3492 = vmatmul.msk.f32.gmra.mxu2 %vm364_vm3, %v984_v61 }
 0xb59   :  { %3444 = vmatmul.msk.f32.gmra.mxu0 %vm324_vm2, %v961_v27  ;;  %v1002_v27 = vld [vmem:[#allocation3 + $0xc0] sm:$0xff] }
 0xb5b   :  { %3493 = vmatmul.msk.f32.gmra.mxu2 %vm364_vm3, %v985_v63 }
 0xb61   :  { %3445 = vmatmul.msk.f32.gmra.mxu0 %vm324_vm2, %v962_v28 }
 0xb63   :  { %3494 = vmatmul.msk.f32.gmra.mxu2 %vm364_vm3, %v986_v2 }
 0xb69   :  { %3446 = vmatmul.msk.f32.gmra.mxu0 %vm324_vm2, %v963_v29  ;;  %v993_v29 = vld [vmem:[#allocation3 + $0x78] sm:$0xff] }
 0xb6b   :  { %3495 = vmatmul.msk.f32.gmra.mxu2 %vm364_vm3, %v987_v8 }
 0xb71   :  { %3447 = vmatmul.msk.f32.gmra.mxu0 %vm324_vm2, %v964_v30  ;;  %v994_v30 = vld [vmem:[#allocation3 + $0x80] sm:$0xff] }
 0xb73   :  { %3496 = vmatmul.msk.f32.gmra.mxu2 %vm364_vm3, %v988_v13 }
 0xb79   :  { %3448 = vmatmul.msk.f32.gmra.mxu0 %vm324_vm2, %v965_v34  ;;  %v995_v34 = vld [vmem:[#allocation3 + $0x88] sm:$0xff] }
 0xb7b   :  { %3497 = vmatmul.msk.f32.gmra.mxu2 %vm364_vm3, %v989_v17 }
 0xb81   :  { %3449 = vmatmul.msk.f32.gmra.mxu0 %vm324_vm2, %v966_v36  ;;  %v1764_v36 = vld [vmem:[%s5891_s12] sm:$0xff] }
 0xb82   :  { %2029 = vmatpush.msrb.mxu1 %v1764_v36 }
 0xb83   :  { %3498 = vmatmul.msk.f32.gmra.mxu2 %vm364_vm3, %v990_v21 }
 0xb89   :  { %3450 = vmatmul.msk.f32.gmra.mxu0 %vm324_vm2, %v967_v41 }
 0xb8b   :  { %3499 = vmatmul.msk.f32.gmra.mxu2 %vm364_vm3, %v991_v50 }
 0xb91   :  { %3451 = vmatmul.msk.f32.gmra.mxu0 %vm324_vm2, %v968_v44 }
 0xb93   :  { %3500 = vmatmul.msk.f32.gmra.mxu2 %vm364_vm3, %v992_v5 }
 0xb96   :  { %v1097_v47 = vpop.f32.mrf.mxu0 }
 0xb97   :  { %3461 = vmatmul.msk.f32.vlgmr.msra.gmra.mxu1 %vm364_vm3, %v1097_v47  ;;  %v1770_v47 = vld [vmem:[%s5890_s6 + $0x10] sm:$0xff] }
 0xb98   :  { %1860 = vmatpush.msrb.mxu0 %v1770_v47 }
 0xb99   :  { %3452 = vmatmul.msk.f32.gmra.mxu0 %vm324_vm2, %v969_v48 }
 0xb9b   :  { %3501 = vmatmul.msk.f32.gmra.mxu2 %vm364_vm3, %v993_v29 }
 0xb9c   :  { %v1154_v51 = vpop.f32.mrf.mxu3 }
 0xb9d   :  { %3480 = vmatmul.msk.f32.vlgmr.msrb.gmra.mxu3 %vm364_vm3, %v1154_v51 }
 0xb9e   :  { %v1100_v52 = vpop.f32.mrf.mxu0  ;;  %1659 = vmatpush.msrb.mxu3 %v1571_v12 }
 0xb9f   :  { %3462 = vmatmul.msk.f32.gmra.mxu1 %vm364_vm3, %v1100_v52 }
 0xba0   :  { %1660 = vmatpush.msrb.mxu3 %v1570_v16 }
 0xba1   :  { %3453 = vmatmul.msk.f32.gmra.mxu0 %vm324_vm2, %v970_v53 }
 0xba2   :  { %1661 = vmatpush.msrb.mxu3 %v1569_v42 }
 0xba3   :  { %3502 = vmatmul.msk.f32.gmra.mxu2 %vm364_vm3, %v994_v30 }
 0xba4   :  { %v1157_v55 = vpop.f32.mrf.mxu3  ;;  %1662 = vmatpush.msrb.mxu3 %v1568_v4 }
 0xba5   :  { %3481 = vmatmul.msk.f32.gmra.mxu3 %vm364_vm3, %v1157_v55 }
 0xba6   :  { %v1103_v56 = vpop.f32.mrf.mxu0  ;;  %v1468_v32 = vpop.f32.mrf.mxu2 }
 0xba7   :  { %3463 = vmatmul.msk.f32.gmra.mxu1 %vm364_vm3, %v1103_v56 }
 0xba9   :  { %3454 = vmatmul.msk.f32.gmra.mxu0 %vm324_vm2, %v971_v57 }
 0xbab   :  { %3503 = vmatmul.msk.f32.gmra.mxu2 %vm364_vm3, %v995_v34 }
 0xbac   :  { %v1160_v59 = vpop.f32.mrf.mxu3 }
 0xbad   :  { %3482 = vmatmul.msk.f32.gmra.mxu3 %vm364_vm3, %v1160_v59 }
 0xbae   :  { %v1106_v60 = vpop.f32.mrf.mxu0  ;;  %v1471_v38 = vpop.f32.mrf.mxu2 }
 0xbaf   :  { %3464 = vmatmul.msk.f32.gmra.mxu1 %vm364_vm3, %v1106_v60 }
 0xbb3   :  { %3504 = vmatmul.msk.f32.gmra.mxu2 %vm364_vm3, %v996_v40 }
 0xbb4   :  { %v1163_v62 = vpop.f32.mrf.mxu3 }
 0xbb5   :  { %3483 = vmatmul.msk.f32.gmra.mxu3 %vm364_vm3, %v1163_v62 }
 0xbb6   :  { %v1109_v7 = vpop.f32.mrf.mxu0  ;;  %v1474_v45 = vpop.f32.mrf.mxu2 }
 0xbb7   :  { %3465 = vmatmul.msk.f32.gmra.mxu1 %vm364_vm3, %v1109_v7 }
 0xbbc   :  { %v1166_v0 = vpop.f32.mrf.mxu3 }
 0xbbd   :  { %3484 = vmatmul.msk.f32.gmra.mxu3 %vm364_vm3, %v1166_v0 }
 0xbbe   :  { %v1112_v1 = vpop.f32.mrf.mxu0  ;;  %v1477_v53 = vpop.f32.mrf.mxu2 }
 0xbbf   :  { %3466 = vmatmul.msk.f32.gmra.mxu1 %vm364_vm3, %v1112_v1 }
 0xbc4   :  { %v1169_v3 = vpop.f32.mrf.mxu3 }
 0xbc5   :  { %3485 = vmatmul.msk.f32.gmra.mxu3 %vm364_vm3, %v1169_v3 }
 0xbc6   :  { %v1115_v6 = vpop.f32.mrf.mxu0  ;;  %v1480_v58 = vpop.f32.mrf.mxu2 }
 0xbc7   :  { %3467 = vmatmul.msk.f32.gmra.mxu1 %vm364_vm3, %v1115_v6 }
 0xbcd   :  { %3505 = vmatmul.msk.f32.vlgmr.msra.gmra.mxu3 %vm364_vm3, %v997_v10 }
 0xbce   :  { %v1118_v11 = vpop.f32.mrf.mxu0  ;;  %v1483_v63 = vpop.f32.mrf.mxu2 }
 0xbcf   :  { %3468 = vmatmul.msk.f32.gmra.mxu1 %vm364_vm3, %v1118_v11 }
 0xbd5   :  { %3506 = vmatmul.msk.f32.gmra.mxu3 %vm364_vm3, %v998_v14 }
 0xbd6   :  { %v1121_v15 = vpop.f32.mrf.mxu0  ;;  %v1486_v8 = vpop.f32.mrf.mxu2 }
 0xbd7   :  { %3469 = vmatmul.msk.f32.gmra.mxu1 %vm364_vm3, %v1121_v15  ;;  %v1769_v15 = vld [vmem:[%s5890_s6 + $0x8] sm:$0xff] }
 0xbd8   :  { %1861 = vmatpush.msrb.mxu0 %v1769_v15 }
 0xbda   :  { %1862 = vmatpush.msrb.mxu0 %v1768_v33 }
 0xbdd   :  { %3507 = vmatmul.msk.f32.gmra.mxu3 %vm364_vm3, %v999_v18 }
 0xbde   :  { %v1124_v20 = vpop.f32.mrf.mxu0  ;;  %v1489_v21 = vpop.f32.mrf.mxu2 }
 0xbdf   :  { %3470 = vmatmul.msk.f32.gmra.mxu1 %vm364_vm3, %v1124_v20 }
 0xbe5   :  { %3508 = vmatmul.msk.f32.gmra.mxu3 %vm364_vm3, %v1000_v19 }
 0xbe6   :  { %v1127_v23 = vpop.f32.mrf.mxu0 }
 0xbe7   :  { %3471 = vmatmul.msk.f32.gmra.mxu1 %vm364_vm3, %v1127_v23 }
 0xbed   :  { %3509 = vmatmul.msk.f32.gmra.mxu3 %vm364_vm3, %v1001_v22 }
 0xbee   :  { %v1130_v24 = vpop.f32.mrf.mxu0 }
 0xbef   :  { %3472 = vmatmul.msk.f32.gmra.mxu1 %vm364_vm3, %v1130_v24  ;;  %v1492_v24 = vpop.f32.mrf.mxu2 }
 0xbf5   :  { %3510 = vmatmul.msk.f32.gmra.mxu3 %vm364_vm3, %v1002_v27 }
 0xbf6   :  { %v1133_v28 = vpop.f32.mrf.mxu0 }
 0xbf7   :  { %3473 = vmatmul.msk.f32.gmra.mxu1 %vm364_vm3, %v1133_v28  ;;  %v1495_v28 = vpop.f32.mrf.mxu2 }
 0xbfe   :  { %v1136_v9 = vpop.f32.mrf.mxu0 }
 0xbff   :  { %3474 = vmatmul.msk.f32.gmra.mxu1 %vm364_vm3, %v1136_v9  ;;  %v1498_v34 = vpop.f32.mrf.mxu2 }
 0xc06   :  { %v1139_v31 = vpop.f32.mrf.mxu0 }
 0xc07   :  { %3475 = vmatmul.msk.f32.gmra.mxu1 %vm364_vm3, %v1139_v31  ;;  %v1501_v47 = vpop.f32.mrf.mxu2 }
 0xc0e   :  { %v1142_v37 = vpop.f32.mrf.mxu0 }
 0xc0f   :  { %3476 = vmatmul.msk.f32.gmra.mxu1 %vm364_vm3, %v1142_v37 }
 0xc14   :  { %v1272_v41 = vpop.f32.mrf.mxu1 }
 0xc15   :  { %v1273_v43 = vadd.f32 %v5115_v39, %v1272_v41 }
 0xc16   :  { %v1145_v44 = vpop.f32.mrf.mxu0 }
 0xc17   :  { %3889 = vtanh.f32 %v1273_v43  ;;  %3477 = vmatmul.msk.f32.gmra.mxu1 %vm364_vm3, %v1145_v44 }
 0xc1c   :  { %v1275_v48 = vpop.f32.mrf.mxu1 }
 0xc1d   :  { %v3890_v49 = vpop.eup %3889  ;;  %v1276_v51 = vadd.f32 %v5115_v39, %v1275_v48 }
 0xc1e   :  { %v1148_v52 = vpop.f32.mrf.mxu0  ;;  %3511 = vmatmul.msk.f32.vlgmr.msrb.gmra.mxu3 %vm364_vm3, %v3890_v49 }
 0xc1f   :  { %3891 = vtanh.f32 %v1276_v51  ;;  %3478 = vmatmul.msk.f32.gmra.mxu1 %vm364_vm3, %v1148_v52 }
 0xc20   :  { %3893 = vtanh.f32 %v1468_v32  ;;  %v5127_v59 = vpop.f32.mrf.mxu3 }
 0xc24   :  { %v1278_v54 = vpop.f32.mrf.mxu1 }
 0xc25   :  { %v3892_v55 = vpop.eup %3891  ;;  %v1279_v56 = vadd.f32 %v5115_v39, %v1278_v54  ;;  %v1504_v54 = vpop.f32.mrf.mxu2 }
 0xc26   :  { %v1151_v57 = vpop.f32.mrf.mxu0  ;;  %3512 = vmatmul.msk.f32.gmra.mxu3 %vm364_vm3, %v3892_v55  ;;  %v5129_v60 = vpop.eup %3893 }
 0xc27   :  { %3895 = vtanh.f32 %v1279_v56  ;;  %3479 = vmatmul.msk.f32.gmra.mxu1 %vm364_vm3, %v1151_v57 }
 0xc28   :  { %3897 = vtanh.f32 %v1471_v38  ;;  %v5135_v0 = vpop.f32.mrf.mxu3 }
 0xc2c   :  { %v1281_v61 = vpop.f32.mrf.mxu1 }
 0xc2d   :  { %v3896_v62 = vpop.eup %3895  ;;  %v1282_v7 = vadd.f32 %v5115_v39, %v1281_v61 }
 0xc2e   :  { %3513 = vmatmul.msk.f32.gmra.mxu3 %vm364_vm3, %v3896_v62  ;;  %v5137_v1 = vpop.eup %3897  ;;  %v1507_v62 = vpop.f32.mrf.mxu2 }
 0xc2f   :  { %3899 = vtanh.f32 %v1282_v7  ;;  %3561 = vmatmul.msk.f32.vlgmr.msrb.gmra.mxu1 %vm364_vm3, %v5129_v60 }
 0xc30   :  { %3901 = vtanh.f32 %v1474_v45  ;;  %v5146_v14 = vpop.f32.mrf.mxu3 }
 0xc34   :  { %v1284_v2 = vpop.f32.mrf.mxu1 }
 0xc35   :  { %v3900_v3 = vpop.eup %3899  ;;  %v1285_v6 = vadd.f32 %v5115_v39, %v1284_v2 }
 0xc36   :  { %3514 = vmatmul.msk.f32.gmra.mxu3 %vm364_vm3, %v3900_v3  ;;  %v5143_v10 = vpop.eup %3901 }
 0xc37   :  { %3903 = vtanh.f32 %v1285_v6  ;;  %3562 = vmatmul.msk.f32.gmra.mxu1 %vm364_vm3, %v5137_v1 }
 0xc38   :  { %3905 = vtanh.f32 %v1477_v53  ;;  %v5158_v19 = vpop.f32.mrf.mxu3 }
 0xc3c   :  { %v1287_v11 = vpop.f32.mrf.mxu1 }
 0xc3d   :  { %v3904_v12 = vpop.eup %3903  ;;  %v1288_v13 = vadd.f32 %v5115_v39, %v1287_v11 }
 0xc3e   :  { %3515 = vmatmul.msk.f32.gmra.mxu3 %vm364_vm3, %v3904_v12  ;;  %v5152_v16 = vpop.eup %3905 }
 0xc3f   :  { %3907 = vtanh.f32 %v1288_v13  ;;  %3563 = vmatmul.msk.f32.gmra.mxu1 %vm364_vm3, %v5143_v10 }
 0xc40   :  { %3909 = vtanh.f32 %v1480_v58  ;;  %v5166_v25 = vpop.f32.mrf.mxu3 }
 0xc44   :  { %v1290_v17 = vpop.f32.mrf.mxu1 }
 0xc45   :  { %v3908_v18 = vpop.eup %3907  ;;  %v1291_v20 = vadd.f32 %v5115_v39, %v1290_v17 }
 0xc46   :  { %3516 = vmatmul.msk.f32.gmra.mxu3 %vm364_vm3, %v3908_v18  ;;  %v5160_v23 = vpop.eup %3909 }
 0xc47   :  { %3911 = vtanh.f32 %v1291_v20  ;;  %3564 = vmatmul.msk.f32.gmra.mxu1 %vm364_vm3, %v5152_v16 }
 0xc48   :  { %3913 = vtanh.f32 %v1483_v63  ;;  %v5174_v29 = vpop.f32.mrf.mxu3 }
 0xc4c   :  { %v1293_v42 = vpop.f32.mrf.mxu1 }
 0xc4d   :  { %v3912_v50 = vpop.eup %3911  ;;  %v1294_v22 = vadd.f32 %v5115_v39, %v1293_v42 }
 0xc4e   :  { %3517 = vmatmul.msk.f32.gmra.mxu3 %vm364_vm3, %v3912_v50  ;;  %v5168_v26 = vpop.eup %3913 }
 0xc4f   :  { %3915 = vtanh.f32 %v1294_v22  ;;  %3565 = vmatmul.msk.f32.gmra.mxu1 %vm364_vm3, %v5160_v23 }
 0xc50   :  { %3917 = vtanh.f32 %v1486_v8  ;;  %v5186_v40 = vpop.f32.mrf.mxu3  ;;  %v1510_v8 = vpop.f32.mrf.mxu2 }
 0xc54   :  { %v1296_v4 = vpop.f32.mrf.mxu1 }
 0xc55   :  { %v3916_v5 = vpop.eup %3915  ;;  %v1297_v27 = vadd.f32 %v5115_v39, %v1296_v4 }
 0xc56   :  { %3518 = vmatmul.msk.f32.gmra.mxu3 %vm364_vm3, %v3916_v5  ;;  %v5176_v9 = vpop.eup %3917 }
 0xc57   :  { %3919 = vtanh.f32 %v1297_v27  ;;  %3566 = vmatmul.msk.f32.gmra.mxu1 %vm364_vm3, %v5168_v26 }
 0xc58   :  { %3921 = vtanh.f32 %v1489_v21  ;;  %v5197_v48 = vpop.f32.mrf.mxu3  ;;  %v1513_v50 = vpop.f32.mrf.mxu2 }
 0xc5c   :  { %v1299_v30 = vpop.f32.mrf.mxu1 }
 0xc5d   :  { %v3920_v31 = vpop.eup %3919  ;;  %v1300_v32 = vadd.f32 %v5115_v39, %v1299_v30 }
 0xc5e   :  { %3519 = vmatmul.msk.f32.gmra.mxu3 %vm364_vm3, %v3920_v31  ;;  %v5183_v35 = vpop.eup %3921 }
 0xc5f   :  { %3923 = vtanh.f32 %v1300_v32  ;;  %3567 = vmatmul.msk.f32.gmra.mxu1 %vm364_vm3, %v5176_v9 }
 0xc60   :  { %3925 = vtanh.f32 %v1492_v24  ;;  %v5205_v55 = vpop.f32.mrf.mxu3 }
 0xc64   :  { %v1302_v36 = vpop.f32.mrf.mxu1 }
 0xc65   :  { %v3924_v37 = vpop.eup %3923  ;;  %v1303_v38 = vadd.f32 %v5115_v39, %v1302_v36 }
 0xc66   :  { %3520 = vmatmul.msk.f32.gmra.mxu3 %vm364_vm3, %v3924_v37  ;;  %v5191_v41 = vpop.eup %3925 }
 0xc67   :  { %3927 = vtanh.f32 %v1303_v38  ;;  %3568 = vmatmul.msk.f32.gmra.mxu1 %vm364_vm3, %v5183_v35 }
 0xc68   :  { %3929 = vtanh.f32 %v1495_v28  ;;  %v5213_v7 = vpop.f32.mrf.mxu3  ;;  %v1516_v28 = vpop.f32.mrf.mxu2 }
 0xc6c   :  { %v1305_v43 = vpop.f32.mrf.mxu1 }
 0xc6d   :  { %v3928_v44 = vpop.eup %3927  ;;  %v1306_v45 = vadd.f32 %v5115_v39, %v1305_v43  ;;  %v1330_v43 = vadd.f32 %v5115_v39, %v5127_v59  ;;  %v1333_v59 = vadd.f32 %v5115_v39, %v5135_v0  ;;  %v1336_v0 = vadd.f32 %v5115_v39, %v5146_v14 }
 0xc6e   :  { %3521 = vmatmul.msk.f32.gmra.mxu3 %vm364_vm3, %v3928_v44  ;;  %v5199_v49 = vpop.eup %3929  ;;  %v1339_v14 = vadd.f32 %v5115_v39, %v5158_v19  ;;  %v1342_v19 = vadd.f32 %v5115_v39, %v5166_v25  ;;  %v1345_v25 = vadd.f32 %v5115_v39, %v5174_v29 }
 0xc6f   :  { %3931 = vtanh.f32 %v1306_v45  ;;  %3569 = vmatmul.msk.f32.gmra.mxu1 %vm364_vm3, %v5191_v41 }
 0xc70   :  { %3933 = vtanh.f32 %v1498_v34  ;;  %v5224_v17 = vpop.f32.mrf.mxu3  ;;  %v1519_v38 = vpop.f32.mrf.mxu2 }
 0xc74   :  { %v1308_v51 = vpop.f32.mrf.mxu1 }
 0xc75   :  { %v3932_v52 = vpop.eup %3931  ;;  %v1309_v53 = vadd.f32 %v5115_v39, %v1308_v51 }
 0xc76   :  { %3522 = vmatmul.msk.f32.gmra.mxu3 %vm364_vm3, %v3932_v52  ;;  %v5207_v56 = vpop.eup %3933 }
 0xc77   :  { %3935 = vtanh.f32 %v1309_v53  ;;  %3570 = vmatmul.msk.f32.gmra.mxu1 %vm364_vm3, %v5199_v49 }
 0xc78   :  { %3937 = vtanh.f32 %v1501_v47  ;;  %v5235_v22 = vpop.f32.mrf.mxu3  ;;  %v1522_v52 = vpop.f32.mrf.mxu2 }
 0xc7c   :  { %v1311_v57 = vpop.f32.mrf.mxu1 }
 0xc7d   :  { %v3936_v58 = vpop.eup %3935  ;;  %v1312_v61 = vadd.f32 %v5115_v39, %v1311_v57 }
 0xc7e   :  { %3523 = vmatmul.msk.f32.gmra.mxu3 %vm364_vm3, %v3936_v58  ;;  %v5215_v63 = vpop.eup %3937 }
 0xc7f   :  { %3939 = vtanh.f32 %v1312_v61  ;;  %3571 = vmatmul.msk.f32.gmra.mxu1 %vm364_vm3, %v5207_v56 }
 0xc80   :  { %3941 = vtanh.f32 %v1504_v54 }
 0xc84   :  { %v1314_v2 = vpop.f32.mrf.mxu1 }
 0xc85   :  { %v3940_v3 = vpop.eup %3939  ;;  %v1315_v6 = vadd.f32 %v5115_v39, %v1314_v2 }
 0xc86   :  { %3524 = vmatmul.msk.f32.gmra.mxu3 %vm364_vm3, %v3940_v3  ;;  %v5221_v11 = vpop.eup %3941 }
 0xc87   :  { %3943 = vtanh.f32 %v1315_v6  ;;  %3572 = vmatmul.msk.f32.gmra.mxu1 %vm364_vm3, %v5215_v63 }
 0xc88   :  { %3945 = vtanh.f32 %v1507_v62 }
 0xc8c   :  { %v1317_v12 = vpop.f32.mrf.mxu1 }
 0xc8d   :  { %v3944_v13 = vpop.eup %3943  ;;  %v1318_v15 = vadd.f32 %v5115_v39, %v1317_v12 }
 0xc8e   :  { %3525 = vmatmul.msk.f32.gmra.mxu3 %vm364_vm3, %v3944_v13  ;;  %v5229_v18 = vpop.eup %3945 }
 0xc8f   :  { %3947 = vtanh.f32 %v1318_v15  ;;  %3573 = vmatmul.msk.f32.gmra.mxu1 %vm364_vm3, %v5221_v11 }
 0xc90   :  { %3949 = vtanh.f32 %v1510_v8 }
 0xc94   :  { %v1320_v20 = vpop.f32.mrf.mxu1 }
 0xc95   :  { %v3948_v21 = vpop.eup %3947  ;;  %v1321_v42 = vadd.f32 %v5115_v39, %v1320_v20 }
 0xc96   :  { %3526 = vmatmul.msk.f32.gmra.mxu3 %vm364_vm3, %v3948_v21  ;;  %v5237_v24 = vpop.eup %3949 }
 0xc97   :  { %3951 = vtanh.f32 %v1321_v42  ;;  %3574 = vmatmul.msk.f32.gmra.mxu1 %vm364_vm3, %v5229_v18 }
 0xc98   :  { %3953 = vtanh.f32 %v1513_v50 }
 0xc9c   :  { %v1323_v4 = vpop.f32.mrf.mxu1 }
 0xc9d   :  { %v3952_v5 = vpop.eup %3951  ;;  %v1324_v27 = vadd.f32 %v5115_v39, %v1323_v4 }
 0xc9e   :  { %3527 = vmatmul.msk.f32.gmra.mxu3 %vm364_vm3, %v3952_v5  ;;  %v5243_v31 = vpop.eup %3953 }
 0xc9f   :  { %3955 = vtanh.f32 %v1324_v27  ;;  %3575 = vmatmul.msk.f32.gmra.mxu1 %vm364_vm3, %v5237_v24 }
 0xca1   :  { %v1664_v30 = vpop.f32.mrf.mxu3 }
 0xca2   :  { %3957 = vtanh.f32 %v1664_v30 }
 0xca3   :  { %3959 = vtanh.f32 %v1516_v28 }
 0xca4   :  { %v1326_v32 = vpop.f32.mrf.mxu1 }
 0xca5   :  { %v3956_v33 = vpop.eup %3955  ;;  %v1327_v34 = vadd.f32 %v5115_v39, %v1326_v32 }
 0xca6   :  { %3528 = vmatmul.msk.f32.gmra.mxu3 %vm364_vm3, %v3956_v33 }
 0xca7   :  { %3961 = vtanh.f32 %v1327_v34  ;;  %3576 = vmatmul.msk.f32.gmra.mxu1 %vm364_vm3, %v5243_v31 }
 0xca8   :  { %v5249_v36 = vpop.eup %3957 }
 0xca9   :  { %v1667_v37 = vpop.f32.mrf.mxu3  ;;  %3536 = vmatmul.msk.f32.vlgmr.msrb.gmra.mxu0 %vm364_vm3, %v5249_v36  ;;  %v5255_v44 = vpop.eup %3959 }
 0xcaa   :  { %3963 = vtanh.f32 %v1667_v37 }
 0xcab   :  { %3965 = vtanh.f32 %v1519_v38 }
 0xcac   :  { %3967 = vtanh.f32 %v1330_v43  ;;  %v2031_v30 = vpop.f32.mrf.mxu1 }
 0xcad   :  { %v3962_v45 = vpop.eup %3961 }
 0xcae   :  { %3529 = vmatmul.msk.f32.gmra.mxu3 %vm364_vm3, %v3962_v45 }
 0xcaf   :  { %3577 = vmatmul.msk.f32.gmra.mxu1 %vm364_vm3, %v5255_v44 }
 0xcb0   :  { %v5260_v47 = vpop.eup %3963 }
 0xcb1   :  { %v1670_v51 = vpop.f32.mrf.mxu3  ;;  %3537 = vmatmul.msk.f32.gmra.mxu0 %vm364_vm3, %v5260_v47  ;;  %v5266_v53 = vpop.eup %3965 }
 0xcb2   :  { %3969 = vtanh.f32 %v1670_v51  ;;  %v3968_v54 = vpop.eup %3967 }
 0xcb3   :  { %3971 = vtanh.f32 %v1522_v52 }
 0xcb4   :  { %3973 = vtanh.f32 %v1333_v59  ;;  %v2034_v37 = vpop.f32.mrf.mxu1 }
 0xcb6   :  { %3530 = vmatmul.msk.f32.gmra.mxu3 %vm364_vm3, %v3968_v54 }
 0xcb7   :  { %3578 = vmatmul.msk.f32.gmra.mxu1 %vm364_vm3, %v5266_v53 }
 0xcb8   :  { %v5271_v57 = vpop.eup %3969 }
 0xcb9   :  { %v1673_v58 = vpop.f32.mrf.mxu3  ;;  %3538 = vmatmul.msk.f32.gmra.mxu0 %vm364_vm3, %v5271_v57  ;;  %v5277_v61 = vpop.eup %3971 }
 0xcba   :  { %3975 = vtanh.f32 %v1673_v58  ;;  %v3974_v62 = vpop.eup %3973 }
 0xcbb   :  { %3977 = vtanh.f32 %v1336_v0  ;;  %v2934_v0 = vld [vmem:[%s4694_s13 + $0x18] sm:$0xff] }
 0xcbc   :  { %3979 = vtanh.f32 %v5186_v40  ;;  %v2037_v51 = vpop.f32.mrf.mxu1  ;;  %3026 = vmatpush.msrb.mxu2 %v2934_v0 }
 0xcbe   :  { %3531 = vmatmul.msk.f32.gmra.mxu3 %vm364_vm3, %v3974_v62 }
 0xcbf   :  { %3579 = vmatmul.msk.f32.gmra.mxu1 %vm364_vm3, %v5277_v61 }
 0xcc0   :  { %v5282_v2 = vpop.eup %3975 }
 0xcc1   :  { %v1676_v3 = vpop.f32.mrf.mxu3  ;;  %3539 = vmatmul.msk.f32.gmra.mxu0 %vm364_vm3, %v5282_v2  ;;  %v3978_v6 = vpop.eup %3977 }
 0xcc2   :  { %3981 = vtanh.f32 %v1676_v3  ;;  %v5289_v8 = vpop.eup %3979 }
 0xcc3   :  { %5892 = vst [vmem:[#allocation53_spill] sm:$0xff] %v5289_v8  ;;  %3983 = vtanh.f32 %v1339_v14 }
 0xcc4   :  { %3985 = vtanh.f32 %v5197_v48  ;;  %v2040_v58 = vpop.f32.mrf.mxu1 }
 0xcc6   :  { %3532 = vmatmul.msk.f32.gmra.mxu3 %vm364_vm3, %v3978_v6 }
 0xcc7   :  { %3580 = vmatmul.msk.f32.gmra.mxu1 %vm364_vm3, %v5289_v8 }
 0xcc8   :  { %v5294_v12 = vpop.eup %3981 }
 0xcc9   :  { %v1679_v40 = vpop.f32.mrf.mxu3  ;;  %3540 = vmatmul.msk.f32.gmra.mxu0 %vm364_vm3, %v5294_v12  ;;  %v3984_v13 = vpop.eup %3983 }
 0xcca   :  { %3987 = vtanh.f32 %v1679_v40  ;;  %v5301_v15 = vpop.eup %3985 }
 0xccb   :  { %5893 = vst [vmem:[#allocation54_spill] sm:$0xff] %v5301_v15  ;;  %3989 = vtanh.f32 %v1342_v19  ;;  %v4551_v19 = vmov 0  }
 0xccc   :  { %3991 = vtanh.f32 %v5205_v55  ;;  %v5371_v14 = vpop.f32.mrf.mxu1  ;;  %3884 = vset.pattern.permute.xlu0 %v4551_v19  ;;  %3885 = vset.pattern.permute.xlu1 %v4551_v19 }
 0xccd   :  { %3886 = vset.pattern.permute.xlu2 %v4551_v19 }
 0xcce   :  { %3533 = vmatmul.msk.f32.gmra.mxu3 %vm364_vm3, %v3984_v13 }
 0xccf   :  { %3581 = vmatmul.msk.f32.gmra.mxu1 %vm364_vm3, %v5301_v15 }
 0xcd0   :  { %v5306_v20 = vpop.eup %3987 }
 0xcd1   :  { %v1682_v48 = vpop.f32.mrf.mxu3  ;;  %3541 = vmatmul.msk.f32.gmra.mxu0 %vm364_vm3, %v5306_v20  ;;  %v3990_v21 = vpop.eup %3989 }
 0xcd2   :  { %3993 = vtanh.f32 %v1682_v48  ;;  %v5313_v42 = vpop.eup %3991 }
 0xcd3   :  { %5894 = vst [vmem:[#allocation55_spill] sm:$0xff] %v5313_v42  ;;  %3995 = vtanh.f32 %v1345_v25 }
 0xcd4   :  { %3997 = vtanh.f32 %v5213_v7  ;;  %v5377_v48 = vpop.f32.mrf.mxu1 }
 0xcd6   :  { %3534 = vmatmul.msk.f32.gmra.mxu3 %vm364_vm3, %v3990_v21 }
 0xcd7   :  { %3582 = vmatmul.msk.f32.gmra.mxu1 %vm364_vm3, %v5313_v42 }
 0xcd8   :  { %v5318_v50 = vpop.eup %3993 }
 0xcd9   :  { %v1685_v55 = vpop.f32.mrf.mxu3  ;;  %3542 = vmatmul.msk.f32.gmra.mxu0 %vm364_vm3, %v5318_v50  ;;  %v3996_v4 = vpop.eup %3995 }
 0xcda   :  { %3999 = vtanh.f32 %v1685_v55  ;;  %v5323_v39 = vpop.eup %3997 }
 0xcdb   :  { %5895 = vst [vmem:[#allocation56_spill] sm:$0xff] %v5323_v39  ;;  %4001 = vtanh.f32 %v5224_v17 }
 0xcde   :  { %3535 = vmatmul.msk.f32.gmra.mxu3 %vm364_vm3, %v3996_v4 }
 0xcdf   :  { %3583 = vmatmul.msk.f32.gmra.mxu1 %vm364_vm3, %v5323_v39 }
 0xce0   :  { %v5328_v29 = vpop.eup %3999 }
 0xce1   :  { %v1688_v5 = vpop.f32.mrf.mxu3  ;;  %3543 = vmatmul.msk.f32.gmra.mxu0 %vm364_vm3, %v5328_v29  ;;  %v5333_v7 = vpop.eup %4001 }
 0xce2   :  { %4003 = vtanh.f32 %v1688_v5  ;;  %5896 = vst [vmem:[#allocation57_spill] sm:$0xff] %v5333_v7 }
 0xce3   :  { %4005 = vtanh.f32 %v5235_v22 }
 0xce7   :  { %3584 = vmatmul.msk.f32.gmra.mxu1 %vm364_vm3, %v5333_v7 }
 0xce8   :  { %v5337_v27 = vpop.eup %4003 }
 0xce9   :  { %v1691_v28 = vpop.f32.mrf.mxu3  ;;  %3544 = vmatmul.msk.f32.gmra.mxu0 %vm364_vm3, %v5337_v27  ;;  %v5342_v17 = vpop.eup %4005 }
 0xcea   :  { %4007 = vtanh.f32 %v1691_v28  ;;  %5897 = vst [vmem:[#allocation58_spill] sm:$0xff] %v5342_v17 }
 0xcef   :  { %3585 = vmatmul.msk.f32.gmra.mxu1 %vm364_vm3, %v5342_v17 }
 0xcf0   :  { %v5346_v32 = vpop.eup %4007 }
 0xcf1   :  { %v1694_v33 = vpop.f32.mrf.mxu3  ;;  %3545 = vmatmul.msk.f32.gmra.mxu0 %vm364_vm3, %v5346_v32 }
 0xcf2   :  { %4009 = vtanh.f32 %v1694_v33 }
 0xcf8   :  { %v5350_v34 = vpop.eup %4009 }
 0xcf9   :  { %v1697_v22 = vpop.f32.mrf.mxu3  ;;  %3546 = vmatmul.msk.f32.gmra.mxu0 %vm364_vm3, %v5350_v34 }
 0xcfa   :  { %4011 = vtanh.f32 %v1697_v22 }
 0xd00   :  { %v5354_v38 = vpop.eup %4011 }
 0xd01   :  { %v1700_v43 = vpop.f32.mrf.mxu3  ;;  %3547 = vmatmul.msk.f32.gmra.mxu0 %vm364_vm3, %v5354_v38 }
 0xd02   :  { %4013 = vtanh.f32 %v1700_v43  ;;  %v5385_v43 = vpop.f32.mrf.mxu1 }
 0xd08   :  { %v5358_v45 = vpop.eup %4013 }
 0xd09   :  { %v1703_v59 = vpop.f32.mrf.mxu3  ;;  %3548 = vmatmul.msk.f32.gmra.mxu0 %vm364_vm3, %v5358_v45 }
 0xd0a   :  { %4015 = vtanh.f32 %v1703_v59 }
 0xd10   :  { %v5362_v52 = vpop.eup %4015 }
 0xd11   :  { %v1706_v54 = vpop.f32.mrf.mxu3  ;;  %3549 = vmatmul.msk.f32.gmra.mxu0 %vm364_vm3, %v5362_v52 }
 0xd12   :  { %4017 = vtanh.f32 %v1706_v54 }
 0xd18   :  { %v5367_v62 = vpop.eup %4017 }
 0xd19   :  { %v1709_v3 = vpop.f32.mrf.mxu3  ;;  %3550 = vmatmul.msk.f32.gmra.mxu0 %vm364_vm3, %v5367_v62 }
 0xd1a   :  { %4019 = vtanh.f32 %v1709_v3 }
 0xd20   :  { %v5373_v6 = vpop.eup %4019 }
 0xd21   :  { %v1712_v40 = vpop.f32.mrf.mxu3  ;;  %3551 = vmatmul.msk.f32.gmra.mxu0 %vm364_vm3, %v5373_v6 }
 0xd22   :  { %4021 = vtanh.f32 %v1712_v40 }
 0xd26   :  { %v1864_v13 = vpop.f32.mrf.mxu0 }
 0xd27   :  { %v2032_v25 = vadd.f32 %v2031_v30, %v1864_v13 }
 0xd28   :  { %v5379_v21 = vpop.eup %4021 }
 0xd29   :  { %v3586_v55 = vmul.f32 -1.442695, %v2032_v25  ;;  %v1715_v4 = vpop.f32.mrf.mxu3  ;;  %3552 = vmatmul.msk.f32.gmra.mxu0 %vm364_vm3, %v5379_v21 }
 0xd2a   :  { %4023 = vtanh.f32 %v1715_v4  ;;  %v5393_v4 = vpop.f32.mrf.mxu1 }
 0xd2b   :  { %4025 = vpow2.f32 %v3586_v55 }
 0xd2e   :  { %v1867_v5 = vpop.f32.mrf.mxu0 }
 0xd2f   :  { %v2035_v28 = vadd.f32 %v2034_v37, %v1867_v5 }
 0xd30   :  { %v5383_v33 = vpop.eup %4023 }
 0xd31   :  { %v4026_v22 = vpop.eup %4025  ;;  %v3587_v59 = vmul.f32 -1.442695, %v2035_v28  ;;  %v1718_v54 = vpop.f32.mrf.mxu3  ;;  %3553 = vmatmul.msk.f32.gmra.mxu0 %vm364_vm3, %v5383_v33  ;;  %v2933_v28 = vld [vmem:[%s4694_s13 + $0x10] sm:$0xff] }
 0xd32   :  { %v2181_v30 = vadd.f32 1.0, %v4026_v22  ;;  %4027 = vtanh.f32 %v1718_v54  ;;  %3027 = vmatpush.msrb.mxu2 %v2933_v28 }
 0xd33   :  { %4029 = vpow2.f32 %v3587_v59 }
 0xd34   :  { %4031 = vrcp.f32 %v2181_v30  ;;  %v2217_v59 = vand.u32 2147483648, %v2181_v30  ;;  %vm2211_vm12 = vweird.f32 %v2181_v30 }
 0xd36   :  { %v1870_v0 = vpop.f32.mrf.mxu0 }
 0xd37   :  { %v2038_v3 = vadd.f32 %v2037_v51, %v1870_v0 }
 0xd38   :  { %v5389_v40 = vpop.eup %4027 }
 0xd39   :  { %v4030_v37 = vpop.eup %4029  ;;  %v3588_v19 = vmul.f32 -1.442695, %v2038_v3  ;;  %v1721_v13 = vpop.f32.mrf.mxu3  ;;  %3554 = vmatmul.msk.f32.gmra.mxu0 %vm364_vm3, %v5389_v40  ;;  %v2215_v3 = vand.u32 2147483647, %v2181_v30 }
 0xd3a   :  { %v4032_v25 = vpop.eup %4031  ;;  %v2182_v55 = vadd.f32 1.0, %v4030_v37  ;;  %4033 = vtanh.f32 %v1721_v13 }
 0xd3b   :  { %4035 = vpow2.f32 %v3588_v19  ;;  %v2207_v5 = vmul.f32 %v4032_v25, %v2181_v30  ;;  %vm2212_vm5 = vweird.f32 %v4032_v25  ;;  %vm2216_vm14 = vcmp.eq.f32.partialorder %v2215_v3, 8.507059e+37 }
 0xd3c   :  { %4037 = vrcp.f32 %v2182_v55  ;;  %vm2213_vm13 = vmor %vm2211_vm12, %vm2212_vm5  ;;  %v2230_v15 = vand.u32 2147483647, %v2182_v55  ;;  %v2232_v8 = vand.u32 2147483648, %v2182_v55  ;;  %vm2226_vm4 = vweird.f32 %v2182_v55 }
 0xd3d   :  { %v2208_v22 = vsub.f32 1.0, %v2207_v5  ;;  %v2218_v5 = vor.u32 1.1754944e-38, %v2217_v59 }
 0xd3e   :  { %v1873_v51 = vpop.f32.mrf.mxu0  ;;  %vm2231_vm8 = vcmp.eq.f32.partialorder %v2230_v15, 8.507059e+37 }
 0xd3f   :  { %v2041_v54 = vadd.f32 %v2040_v58, %v1873_v51  ;;  %v2209_v0 = vmul.f32 %v4032_v25, %v2208_v22  ;;  %v5400_v51 = vpop.f32.mrf.mxu1 }
 0xd40   :  { %v5396_v46 = vpop.eup %4033 }
 0xd41   :  { %5898 = vst [vmem:[#allocation59_spill] sm:$0xff] %v5396_v46  ;;  %v4036_v17 = vpop.eup %4035  ;;  %v3589_v7 = vmul.f32 -1.442695, %v2041_v54  ;;  %v1724_v37 = vpop.f32.mrf.mxu3  ;;  %3555 = vmatmul.msk.f32.gmra.mxu0 %vm364_vm3, %v5396_v46  ;;  %v2210_v19 = vadd.f32 %v4032_v25, %v2209_v0 }
 0xd42   :  { %v4038_v13 = vpop.eup %4037  ;;  %v2183_v39 = vadd.f32 1.0, %v4036_v17  ;;  %4039 = vtanh.f32 %v1724_v37 }
 0xd43   :  { %4041 = vpow2.f32 %v3589_v7  ;;  %v2214_v58 = vsel %vm2213_vm13, %v4032_v25, %v2210_v19  ;;  %v2222_v28 = vmul.f32 %v4038_v13, %v2182_v55  ;;  %vm2227_vm15 = vweird.f32 %v4038_v13 }
 0xd44   :  { %4043 = vrcp.f32 %v2183_v39  ;;  %v2219_v22 = vsel %vm2216_vm14, %v2218_v5, %v2214_v58  ;;  %vm2228_vm7 = vmor %vm2226_vm4, %vm2227_vm15  ;;  %v2233_v5 = vor.u32 1.1754944e-38, %v2232_v8  ;;  %v2245_v46 = vand.u32 2147483647, %v2183_v39 }
 0xd45   :  { %2583 = vperm.xlu0 %3884, %v2219_v22   ;;  %v2223_v54 = vsub.f32 1.0, %v2222_v28  ;;  %v2731_v58 = vsub.f32 1.0, %v2219_v22  ;;  %vm2241_vm9 = vweird.f32 %v2183_v39 }
 0xd46   :  { %v1876_v42 = vpop.f32.mrf.mxu0  ;;  %vm2246_vm11 = vcmp.eq.f32.partialorder %v2245_v46, 8.507059e+37 }
 0xd47   :  { %v2044_v30 = vadd.f32 %v5371_v14, %v1876_v42  ;;  %v2224_v0 = vmul.f32 %v4038_v13, %v2223_v54 }
 0xd48   :  { %v5403_v17 = vpop.eup %4039 }
 0xd49   :  { %5899 = vst [vmem:[#allocation60_spill] sm:$0xff] %v5403_v17  ;;  %v4042_v59 = vpop.eup %4041  ;;  %v3590_v7 = vmul.f32 -1.442695, %v2044_v30  ;;  %v1727_v25 = vpop.f32.mrf.mxu3  ;;  %3556 = vmatmul.msk.f32.gmra.mxu0 %vm364_vm3, %v5403_v17  ;;  %v2225_v3 = vadd.f32 %v4038_v13, %v2224_v0  ;;  %v2247_v17 = vand.u32 2147483648, %v2183_v39 }
 0xd4a   :  { %v4044_v37 = vpop.eup %4043  ;;  %v2184_v19 = vadd.f32 1.0, %v4042_v59  ;;  %4045 = vtanh.f32 %v1727_v25  ;;  %v5407_v0 = vpop.f32.mrf.mxu1 }
 0xd4b   :  { %4047 = vpow2.f32 %v3590_v7  ;;  %v2229_v42 = vsel %vm2228_vm7, %v4038_v13, %v2225_v3  ;;  %v2237_v14 = vmul.f32 %v4044_v37, %v2183_v39  ;;  %vm2242_vm10 = vweird.f32 %v4044_v37 }
 0xd4c   :  { %4049 = vrcp.f32 %v2184_v19  ;;  %v2234_v28 = vsel %vm2231_vm8, %v2233_v5, %v2229_v42  ;;  %vm2243_vm6 = vmor %vm2241_vm9, %vm2242_vm10  ;;  %v2248_v5 = vor.u32 1.1754944e-38, %v2247_v17  ;;  %vm2256_vm5 = vweird.f32 %v2184_v19 }
 0xd4d   :  { %2588 = vperm.xlu1 %3885, %v2234_v28   ;;  %2758 = vperm.xlu0 %3884, %v2731_v58   ;;  %v2238_v54 = vsub.f32 1.0, %v2237_v14 }
 0xd4e   :  { %v1879_v30 = vpop.f32.mrf.mxu0 }
 0xd4f   :  { %v2047_v55 = vadd.f32 %v5377_v48, %v1879_v30  ;;  %v2239_v59 = vmul.f32 %v4044_v37, %v2238_v54  ;;  %v2732_v48 = vsub.f32 1.0, %v2234_v28  ;;  %v2260_v30 = vand.u32 2147483647, %v2184_v19 }
 0xd50   :  { %v5410_v8 = vpop.eup %4045 }
 0xd51   :  { %v4048_v15 = vpop.eup %4047  ;;  %v3591_v13 = vmul.f32 -1.442695, %v2047_v55  ;;  %v1730_v22 = vpop.f32.mrf.mxu3  ;;  %3557 = vmatmul.msk.f32.gmra.mxu0 %vm364_vm3, %v5410_v8  ;;  %v2240_v7 = vadd.f32 %v4044_v37, %v2239_v59  ;;  %v2262_v55 = vand.u32 2147483648, %v2184_v19  ;;  %vm2261_vm14 = vcmp.eq.f32.partialorder %v2260_v30, 8.507059e+37 }
 0xd52   :  { %v4050_v25 = vpop.eup %4049  ;;  %v5414_v3 = vadd.f32 1.0, %v4048_v15  ;;  %4051 = vtanh.f32 %v1730_v22  ;;  %v5420_v28 = vpop.f32.mrf.mxu1 }
 0xd53   :  { %4053 = vpow2.f32 %v3591_v13  ;;  %v2244_v39 = vsel %vm2243_vm6, %v4044_v37, %v2240_v7  ;;  %v2252_v58 = vmul.f32 %v4050_v25, %v2184_v19  ;;  %vm2257_vm12 = vweird.f32 %v4050_v25 }
 0xd54   :  { %4055 = vrcp.f32 %v5414_v3  ;;  %v2249_v42 = vsel %vm2246_vm11, %v2248_v5, %v2244_v39  ;;  %vm2258_vm13 = vmor %vm2256_vm5, %vm2257_vm12  ;;  %vm2271_vm15 = vweird.f32 %v5414_v3 }
 0xd55   :  { %2593 = vperm.xlu2 %3886, %v2249_v42   ;;  %2763 = vperm.xlu1 %3885, %v2732_v48   ;;  %v2253_v14 = vsub.f32 1.0, %v2252_v58  ;;  %v2733_v19 = vsub.f32 1.0, %v2249_v42 }
 0xd56   :  { %v1882_v54 = vpop.f32.mrf.mxu0 }
 0xd57   :  { %v2050_v59 = vadd.f32 %v5385_v43, %v1882_v54  ;;  %v2254_v15 = vmul.f32 %v4050_v25, %v2253_v14  ;;  %v2263_v43 = vor.u32 1.1754944e-38, %v2262_v55 }
 0xd58   :  { %v5418_v46 = vpop.eup %4051 }
 0xd59   :  { %v4054_v17 = vpop.eup %4053  ;;  %v3592_v37 = vmul.f32 -1.442695, %v2050_v59  ;;  %v1733_v13 = vpop.f32.mrf.mxu3  ;;  %3558 = vmatmul.msk.f32.gmra.mxu0 %vm364_vm3, %v5418_v46  ;;  %v2255_v22 = vadd.f32 %v4050_v25, %v2254_v15  ;;  %v2277_v15 = vand.u32 2147483648, %v5414_v3 }
 0xd5a   :  { %v4056_v7 = vpop.eup %4055  ;;  %v5424_v5 = vadd.f32 1.0, %v4054_v17  ;;  %4057 = vtanh.f32 %v1733_v13 }
 0xd5b   :  { %4059 = vpow2.f32 %v3592_v37  ;;  %v2259_v48 = vsel %vm2258_vm13, %v4050_v25, %v2255_v22  ;;  %v2267_v39 = vmul.f32 %v4056_v7, %v5414_v3  ;;  %vm2272_vm4 = vweird.f32 %v4056_v7 }
 0xd5c   :  { %4061 = vrcp.f32 %v5424_v5  ;;  %v2264_v58 = vsel %vm2261_vm14, %v2263_v43, %v2259_v48  ;;  %v2275_v25 = vand.u32 2147483647, %v5414_v3  ;;  %vm2273_vm7 = vmor %vm2271_vm15, %vm2272_vm4  ;;  %v5438_v48 = vpop.f32.mrf.mxu1  ;;  %vm2286_vm9 = vweird.f32 %v5424_v5 }
 0xd5d   :  { %2768 = vperm.xlu2 %3886, %v2733_v19   ;;  %v2734_v14 = vsub.f32 1.0, %v2264_v58  ;;  %2598 = vperm.xlu0 %3884, %v2264_v58   ;;  %v2268_v54 = vsub.f32 1.0, %v2267_v39  ;;  %v2292_v3 = vand.u32 2147483648, %v5424_v5 }
 0xd5e   :  { %v1885_v59 = vpop.f32.mrf.mxu0  ;;  %vm2276_vm8 = vcmp.eq.f32.partialorder %v2275_v25, 8.507059e+37 }
 0xd5f   :  { %v2053_v30 = vadd.f32 %v5393_v4, %v1885_v59  ;;  %2773 = vperm.xlu1 %3885, %v2734_v14   ;;  %v2269_v42 = vmul.f32 %v4056_v7, %v2268_v54  ;;  %v2278_v4 = vor.u32 1.1754944e-38, %v2277_v15  ;;  %v2932_v54 = vld [vmem:[%s4694_s13 + $0x8] sm:$0xff] }
 0xd60   :  { %v5432_v55 = vpop.eup %4057  ;;  %3028 = vmatpush.msrb.mxu2 %v2932_v54 }
 0xd61   :  { %5900 = vst [vmem:[#allocation61_spill] sm:$0xff] %v5432_v55  ;;  %v4060_v17 = vpop.eup %4059  ;;  %v3593_v37 = vmul.f32 -1.442695, %v2053_v30  ;;  %v1736_v13 = vpop.f32.mrf.mxu3  ;;  %3559 = vmatmul.msk.f32.gmra.mxu0 %vm364_vm3, %v5432_v55  ;;  %v2270_v22 = vadd.f32 %v4056_v7, %v2269_v42 }
 0xd62   :  { %v4062_v43 = vpop.eup %4061  ;;  %v2187_v19 = vadd.f32 1.0, %v4060_v17  ;;  %4063 = vtanh.f32 %v1736_v13 }
 0xd63   :  { %4065 = vpow2.f32 %v3593_v37  ;;  %v2274_v39 = vsel %vm2273_vm7, %v4056_v7, %v2270_v22  ;;  %v2282_v58 = vmul.f32 %v4062_v43, %v5424_v5  ;;  %vm2287_vm10 = vweird.f32 %v4062_v43 }
 0xd64   :  { %4067 = vrcp.f32 %v2187_v19  ;;  %v2279_v14 = vsel %vm2276_vm8, %v2278_v4, %v2274_v39  ;;  %v2290_v7 = vand.u32 2147483647, %v5424_v5  ;;  %vm2288_vm6 = vmor %vm2286_vm9, %vm2287_vm10  ;;  %vm2301_vm5 = vweird.f32 %v2187_v19 }
 0xd65   :  { %v2735_v59 = vsub.f32 1.0, %v2279_v14  ;;  %2603 = vperm.xlu2 %3886, %v2279_v14   ;;  %v2283_v30 = vsub.f32 1.0, %v2282_v58  ;;  %v2293_v58 = vor.u32 1.1754944e-38, %v2292_v3  ;;  %v2305_v3 = vand.u32 2147483647, %v2187_v19 }
 0xd66   :  { %v1888_v42 = vpop.f32.mrf.mxu0  ;;  %vm2291_vm11 = vcmp.eq.f32.partialorder %v2290_v7, 8.507059e+37 }
 0xd67   :  { %v2056_v15 = vadd.f32 %v5400_v51, %v1888_v42  ;;  %2778 = vperm.xlu0 %3884, %v2735_v59   ;;  %v2284_v17 = vmul.f32 %v4062_v43, %v2283_v30  ;;  %v5450_v59 = vpop.f32.mrf.mxu1  ;;  %vm2306_vm14 = vcmp.eq.f32.partialorder %v2305_v3, 8.507059e+37 }
 0xd68   :  { %v5446_v25 = vpop.eup %4063 }
 0xd69   :  { %5901 = vst [vmem:[#allocation62_spill] sm:$0xff] %v5446_v25  ;;  %v4066_v37 = vpop.eup %4065  ;;  %v3594_v13 = vmul.f32 -1.442695, %v2056_v15  ;;  %3560 = vmatmul.msk.f32.gmra.mxu0 %vm364_vm3, %v5446_v25  ;;  %v2285_v22 = vadd.f32 %v4062_v43, %v2284_v17  ;;  %v2307_v15 = vand.u32 2147483648, %v2187_v19 }
 0xd6a   :  { %v4068_v4 = vpop.eup %4067  ;;  %v2188_v39 = vadd.f32 1.0, %v4066_v37 }
 0xd6b   :  { %4069 = vpow2.f32 %v3594_v13  ;;  %v2289_v14 = vsel %vm2288_vm6, %v4062_v43, %v2285_v22  ;;  %v2297_v51 = vmul.f32 %v4068_v4, %v2187_v19  ;;  %vm2302_vm12 = vweird.f32 %v4068_v4 }
 0xd6c   :  { %4071 = vrcp.f32 %v2188_v39  ;;  %v2294_v54 = vsel %vm2291_vm11, %v2293_v58, %v2289_v14  ;;  %vm2303_vm13 = vmor %vm2301_vm5, %vm2302_vm12  ;;  %v2308_v58 = vor.u32 1.1754944e-38, %v2307_v15  ;;  %vm2316_vm15 = vweird.f32 %v2188_v39 }
 0xd6d   :  { %v2736_v5 = vsub.f32 1.0, %v2294_v54  ;;  %2608 = vperm.xlu1 %3885, %v2294_v54   ;;  %v2298_v30 = vsub.f32 1.0, %v2297_v51  ;;  %v2320_v15 = vand.u32 2147483647, %v2188_v39 }
 0xd6e   :  { %v1891_v42 = vpop.f32.mrf.mxu0 }
 0xd6f   :  { %v2059_v17 = vadd.f32 %v5407_v0, %v1891_v42  ;;  %2783 = vperm.xlu2 %3886, %v2736_v5   ;;  %v2299_v37 = vmul.f32 %v4068_v4, %v2298_v30  ;;  %v2322_v30 = vand.u32 2147483648, %v2188_v39  ;;  %v5453_v19 = vpop.f32.mrf.mxu1  ;;  %vm2321_vm8 = vcmp.eq.f32.partialorder %v2320_v15, 8.507059e+37 }
 0xd71   :  { %v4070_v13 = vpop.eup %4069  ;;  %v3595_v43 = vmul.f32 -1.442695, %v2059_v17  ;;  %v2300_v7 = vadd.f32 %v4068_v4, %v2299_v37 }
 0xd72   :  { %v4072_v22 = vpop.eup %4071  ;;  %v2189_v25 = vadd.f32 1.0, %v4070_v13 }
 0xd73   :  { %4073 = vpow2.f32 %v3595_v43  ;;  %v2304_v14 = vsel %vm2303_vm13, %v4068_v4, %v2300_v7  ;;  %v2312_v51 = vmul.f32 %v4072_v22, %v2188_v39  ;;  %vm2317_vm4 = vweird.f32 %v4072_v22 }
 0xd74   :  { %4075 = vrcp.f32 %v2189_v25  ;;  %v2309_v54 = vsel %vm2306_vm14, %v2308_v58, %v2304_v14  ;;  %vm2318_vm7 = vmor %vm2316_vm15, %vm2317_vm4  ;;  %v2323_v7 = vor.u32 1.1754944e-38, %v2322_v30  ;;  %vm2331_vm9 = vweird.f32 %v2189_v25 }
 0xd75   :  { %v2737_v55 = vsub.f32 1.0, %v2309_v54  ;;  %2613 = vperm.xlu0 %3884, %v2309_v54   ;;  %v2313_v0 = vsub.f32 1.0, %v2312_v51 }
 0xd76   :  { %v1894_v5 = vpop.f32.mrf.mxu0 }
 0xd77   :  { %v2062_v42 = vadd.f32 %v5420_v28, %v1894_v5  ;;  %2788 = vperm.xlu1 %3885, %v2737_v55   ;;  %v2314_v17 = vmul.f32 %v4072_v22, %v2313_v0  ;;  %v2337_v0 = vand.u32 2147483648, %v2189_v25  ;;  %v5457_v30 = vpop.f32.mrf.mxu1 }
 0xd79   :  { %v4074_v37 = vpop.eup %4073  ;;  %v3596_v4 = vmul.f32 -1.442695, %v2062_v42  ;;  %v2315_v3 = vadd.f32 %v4072_v22, %v2314_v17  ;;  %v2335_v42 = vand.u32 2147483647, %v2189_v25 }
 0xd7a   :  { %v4076_v13 = vpop.eup %4075  ;;  %v2190_v43 = vadd.f32 1.0, %v4074_v37 }
 0xd7b   :  { %4077 = vpow2.f32 %v3596_v4  ;;  %v2319_v58 = vsel %vm2318_vm7, %v4072_v22, %v2315_v3  ;;  %v2327_v14 = vmul.f32 %v4076_v13, %v2189_v25  ;;  %vm2332_vm10 = vweird.f32 %v4076_v13 }
 0xd7c   :  { %4079 = vrcp.f32 %v2190_v43  ;;  %v2324_v51 = vsel %vm2321_vm8, %v2323_v7, %v2319_v58  ;;  %vm2333_vm6 = vmor %vm2331_vm9, %vm2332_vm10  ;;  %v2338_v3 = vor.u32 1.1754944e-38, %v2337_v0  ;;  %vm2336_vm11 = vcmp.eq.f32.partialorder %v2335_v42, 8.507059e+37 }
 0xd7d   :  { %v2738_v54 = vsub.f32 1.0, %v2324_v51  ;;  %2618 = vperm.xlu2 %3886, %v2324_v51   ;;  %v2328_v28 = vsub.f32 1.0, %v2327_v14  ;;  %vm2346_vm5 = vweird.f32 %v2190_v43  ;;  %v2352_v25 = vand.u32 2147483648, %v2190_v43 }
 0xd7e   :  { %v1897_v55 = vpop.f32.mrf.mxu0 }
 0xd7f   :  { %v2065_v39 = vadd.f32 %v5438_v48, %v1897_v55  ;;  %2793 = vperm.xlu0 %3884, %v2738_v54   ;;  %v2329_v5 = vmul.f32 %v4076_v13, %v2328_v28 }
 0xd81   :  { %v4078_v17 = vpop.eup %4077  ;;  %v3597_v22 = vmul.f32 -1.442695, %v2065_v39  ;;  %v2330_v15 = vadd.f32 %v4076_v13, %v2329_v5  ;;  %v2350_v39 = vand.u32 2147483647, %v2190_v43 }
 0xd82   :  { %v4080_v37 = vpop.eup %4079  ;;  %v2191_v4 = vadd.f32 1.0, %v4078_v17 }
 0xd83   :  { %4081 = vpow2.f32 %v3597_v22  ;;  %v2334_v7 = vsel %vm2333_vm6, %v4076_v13, %v2330_v15  ;;  %v2342_v58 = vmul.f32 %v4080_v37, %v2190_v43  ;;  %vm2347_vm12 = vweird.f32 %v4080_v37  ;;  %v5460_v15 = vpop.f32.mrf.mxu1 }
 0xd84   :  { %4083 = vrcp.f32 %v2191_v4  ;;  %v2339_v14 = vsel %vm2336_vm11, %v2338_v3, %v2334_v7  ;;  %vm2348_vm13 = vmor %vm2346_vm5, %vm2347_vm12  ;;  %v2353_v22 = vor.u32 1.1754944e-38, %v2352_v25  ;;  %vm2351_vm14 = vcmp.eq.f32.partialorder %v2350_v39, 8.507059e+37 }
 0xd85   :  { %v2739_v48 = vsub.f32 1.0, %v2339_v14  ;;  %2623 = vperm.xlu1 %3885, %v2339_v14   ;;  %v2343_v51 = vsub.f32 1.0, %v2342_v58  ;;  %v2931_v58 = vld [vmem:[%s4694_s13] sm:$0xff]  ;;  %vm2361_vm15 = vweird.f32 %v2191_v4  ;;  %s4552_s13 = smov [#allocation31]  }
 0xd86   :  { %v1900_v54 = vpop.f32.mrf.mxu0  ;;  %3029 = vmatpush.msrb.mxu2 %v2931_v58 }
 0xd87   :  { %v2068_v28 = vadd.f32 %v5450_v59, %v1900_v54  ;;  %2798 = vperm.xlu2 %3886, %v2739_v48   ;;  %v2344_v55 = vmul.f32 %v4080_v37, %v2343_v51  ;;  %v2367_v51 = vand.u32 2147483648, %v2191_v4 }
 0xd89   :  { %v4082_v0 = vpop.eup %4081  ;;  %v3598_v5 = vmul.f32 -1.442695, %v2068_v28  ;;  %v2345_v13 = vadd.f32 %v4080_v37, %v2344_v55  ;;  %v2365_v28 = vand.u32 2147483647, %v2191_v4 }
 0xd8a   :  { %v4084_v42 = vpop.eup %4083  ;;  %v2192_v17 = vadd.f32 1.0, %v4082_v0 }
 0xd8b   :  { %4085 = vpow2.f32 %v3598_v5  ;;  %v2349_v3 = vsel %vm2348_vm13, %v4080_v37, %v2345_v13  ;;  %v2357_v7 = vmul.f32 %v4084_v42, %v2191_v4  ;;  %vm2362_vm4 = vweird.f32 %v4084_v42 }
 0xd8c   :  { %4087 = vrcp.f32 %v2192_v17  ;;  %v2354_v59 = vsel %vm2351_vm14, %v2353_v22, %v2349_v3  ;;  %vm2363_vm7 = vmor %vm2361_vm15, %vm2362_vm4  ;;  %v2368_v13 = vor.u32 1.1754944e-38, %v2367_v51  ;;  %vm2366_vm8 = vcmp.eq.f32.partialorder %v2365_v28, 8.507059e+37 }
 0xd8d   :  { %v2740_v14 = vsub.f32 1.0, %v2354_v59  ;;  %2628 = vperm.xlu0 %3884, %v2354_v59   ;;  %v2358_v48 = vsub.f32 1.0, %v2357_v7  ;;  %v2079_v59 = vpop.f32.mrf.mxu1  ;;  %vm2376_vm9 = vweird.f32 %v2192_v17  ;;  %v2382_v4 = vand.u32 2147483648, %v2192_v17 }
 0xd8e   :  { %v1903_v43 = vpop.f32.mrf.mxu0 }
 0xd8f   :  { %v2071_v54 = vadd.f32 %v5453_v19, %v1903_v43  ;;  %2803 = vperm.xlu1 %3885, %v2740_v14   ;;  %v2359_v25 = vmul.f32 %v4084_v42, %v2358_v48 }
 0xd91   :  { %v4086_v55 = vpop.eup %4085  ;;  %v3599_v37 = vmul.f32 -1.442695, %v2071_v54  ;;  %v2360_v39 = vadd.f32 %v4084_v42, %v2359_v25  ;;  %v2380_v54 = vand.u32 2147483647, %v2192_v17 }
 0xd92   :  { %v4088_v0 = vpop.eup %4087  ;;  %v2193_v5 = vadd.f32 1.0, %v4086_v55 }
 0xd93   :  { %4089 = vpow2.f32 %v3599_v37  ;;  %v2364_v22 = vsel %vm2363_vm7, %v4084_v42, %v2360_v39  ;;  %v2372_v3 = vmul.f32 %v4088_v0, %v2192_v17  ;;  %vm2377_vm10 = vweird.f32 %v4088_v0 }
 0xd94   :  { %4091 = vrcp.f32 %v2193_v5  ;;  %v2369_v7 = vsel %vm2366_vm8, %v2368_v13, %v2364_v22  ;;  %vm2378_vm6 = vmor %vm2376_vm9, %vm2377_vm10  ;;  %v2383_v37 = vor.u32 1.1754944e-38, %v2382_v4  ;;  %vm2381_vm11 = vcmp.eq.f32.partialorder %v2380_v54, 8.507059e+37 }
 0xd95   :  { %v2741_v58 = vsub.f32 1.0, %v2369_v7  ;;  %2633 = vperm.xlu2 %3886, %v2369_v7   ;;  %v2373_v19 = vsub.f32 1.0, %v2372_v3  ;;  %vm2391_vm5 = vweird.f32 %v2193_v5  ;;  %v2082_v17 = vpop.f32.mrf.mxu1 }
 0xd96   :  { %v1906_v14 = vpop.f32.mrf.mxu0 }
 0xd97   :  { %v2074_v48 = vadd.f32 %v5457_v30, %v1906_v14  ;;  %2808 = vperm.xlu0 %3884, %v2741_v58   ;;  %v2374_v43 = vmul.f32 %v4088_v0, %v2373_v19  ;;  %v2397_v58 = vand.u32 2147483648, %v2193_v5 }
 0xd99   :  { %v4090_v51 = vpop.eup %4089  ;;  %v3600_v25 = vmul.f32 -1.442695, %v2074_v48  ;;  %v2375_v42 = vadd.f32 %v4088_v0, %v2374_v43  ;;  %v2395_v48 = vand.u32 2147483647, %v2193_v5 }
 0xd9a   :  { %v4092_v28 = vpop.eup %4091  ;;  %v2194_v55 = vadd.f32 1.0, %v4090_v51 }
 0xd9b   :  { %4093 = vpow2.f32 %v3600_v25  ;;  %v2379_v39 = vsel %vm2378_vm6, %v4088_v0, %v2375_v42  ;;  %v2387_v13 = vmul.f32 %v4092_v28, %v2193_v5  ;;  %vm2392_vm12 = vweird.f32 %v4092_v28 }
 0xd9c   :  { %4095 = vrcp.f32 %v2194_v55  ;;  %v2384_v22 = vsel %vm2381_vm11, %v2383_v37, %v2379_v39  ;;  %vm2393_vm13 = vmor %vm2391_vm5, %vm2392_vm12  ;;  %v2398_v25 = vor.u32 1.1754944e-38, %v2397_v58  ;;  %vm2396_vm14 = vcmp.eq.f32.partialorder %v2395_v48, 8.507059e+37 }
 0xd9d   :  { %v2742_v3 = vsub.f32 1.0, %v2384_v22  ;;  %2638 = vperm.xlu1 %3885, %v2384_v22   ;;  %v2388_v30 = vsub.f32 1.0, %v2387_v13  ;;  %vm2406_vm15 = vweird.f32 %v2194_v55 }
 0xd9e   :  { %v1909_v7 = vpop.f32.mrf.mxu0 }
 0xd9f   :  { %v2077_v19 = vadd.f32 %v5460_v15, %v1909_v7  ;;  %2813 = vperm.xlu2 %3886, %v2742_v3   ;;  %v2389_v14 = vmul.f32 %v4092_v28, %v2388_v30  ;;  %v2412_v3 = vand.u32 2147483648, %v2194_v55  ;;  %v2410_v7 = vand.u32 2147483647, %v2194_v55 }
 0xda1   :  { %v4094_v4 = vpop.eup %4093  ;;  %v3601_v43 = vmul.f32 -1.442695, %v2077_v19  ;;  %v2390_v0 = vadd.f32 %v4092_v28, %v2389_v14  ;;  %v2085_v14 = vpop.f32.mrf.mxu1  ;;  %vm2411_vm8 = vcmp.eq.f32.partialorder %v2410_v7, 8.507059e+37 }
 0xda2   :  { %v4096_v54 = vpop.eup %4095  ;;  %v2195_v51 = vadd.f32 1.0, %v4094_v4 }
 0xda3   :  { %4097 = vpow2.f32 %v3601_v43  ;;  %v2394_v42 = vsel %vm2393_vm13, %v4092_v28, %v2390_v0  ;;  %v2402_v37 = vmul.f32 %v4096_v54, %v2194_v55  ;;  %vm2407_vm4 = vweird.f32 %v4096_v54 }
 0xda4   :  { %4099 = vrcp.f32 %v2195_v51  ;;  %v2399_v39 = vsel %vm2396_vm14, %v2398_v25, %v2394_v42  ;;  %vm2408_vm7 = vmor %vm2406_vm15, %vm2407_vm4  ;;  %v2413_v43 = vor.u32 1.1754944e-38, %v2412_v3  ;;  %vm2421_vm9 = vweird.f32 %v2195_v51 }
 0xda5   :  { %v2743_v13 = vsub.f32 1.0, %v2399_v39  ;;  %2643 = vperm.xlu0 %3884, %v2399_v39   ;;  %v2403_v15 = vsub.f32 1.0, %v2402_v37  ;;  %v2427_v55 = vand.u32 2147483648, %v2195_v51 }
 0xda6   :  { %v1912_v22 = vpop.f32.mrf.mxu0 }
 0xda7   :  { %v2080_v5 = vadd.f32 %v2079_v59, %v1912_v22  ;;  %2818 = vperm.xlu1 %3885, %v2743_v13   ;;  %v2404_v30 = vmul.f32 %v4096_v54, %v2403_v15  ;;  %v2425_v22 = vand.u32 2147483647, %v2195_v51  ;;  %v2428_v7 = vor.u32 1.1754944e-38, %v2427_v55 }
 0xda9   :  { %v4098_v19 = vpop.eup %4097  ;;  %v3602_v58 = vmul.f32 -1.442695, %v2080_v5  ;;  %v2405_v4 = vadd.f32 %v4096_v54, %v2404_v30  ;;  %vm2426_vm11 = vcmp.eq.f32.partialorder %v2425_v22, 8.507059e+37 }
 0xdaa   :  { %v4100_v28 = vpop.eup %4099  ;;  %v2196_v48 = vadd.f32 1.0, %v4098_v19 }
 0xdab   :  { %4101 = vpow2.f32 %v3602_v58  ;;  %v2409_v0 = vsel %vm2408_vm7, %v4096_v54, %v2405_v4  ;;  %v2417_v25 = vmul.f32 %v4100_v28, %v2195_v51  ;;  %vm2422_vm10 = vweird.f32 %v4100_v28  ;;  %v2088_v58 = vpop.f32.mrf.mxu1 }
 0xdac   :  { %4103 = vrcp.f32 %v2196_v48  ;;  %v2414_v42 = vsel %vm2411_vm8, %v2413_v43, %v2409_v0  ;;  %vm2423_vm6 = vmor %vm2421_vm9, %vm2422_vm10  ;;  %vm2436_vm5 = vweird.f32 %v2196_v48  ;;  %v2442_v51 = vand.u32 2147483648, %v2196_v48 }
 0xdad   :  { %v2744_v37 = vsub.f32 1.0, %v2414_v42  ;;  %2648 = vperm.xlu2 %3886, %v2414_v42   ;;  %v2418_v59 = vsub.f32 1.0, %v2417_v25 }
 0xdae   :  { %v1915_v39 = vpop.f32.mrf.mxu0 }
 0xdaf   :  { %v2083_v13 = vadd.f32 %v2082_v17, %v1915_v39  ;;  %2823 = vperm.xlu0 %3884, %v2744_v37   ;;  %v2419_v15 = vmul.f32 %v4100_v28, %v2418_v59 }
 0xdb1   :  { %v4102_v5 = vpop.eup %4101  ;;  %v3603_v30 = vmul.f32 -1.442695, %v2083_v13  ;;  %v2420_v3 = vadd.f32 %v4100_v28, %v2419_v15  ;;  %v2440_v13 = vand.u32 2147483647, %v2196_v48 }
 0xdb2   :  { %v4104_v19 = vpop.eup %4103  ;;  %v2197_v54 = vadd.f32 1.0, %v4102_v5 }
 0xdb3   :  { %4105 = vpow2.f32 %v3603_v30  ;;  %v2424_v4 = vsel %vm2423_vm6, %v4100_v28, %v2420_v3  ;;  %v2432_v43 = vmul.f32 %v4104_v19, %v2196_v48  ;;  %vm2437_vm12 = vweird.f32 %v4104_v19 }
 0xdb4   :  { %4107 = vrcp.f32 %v2197_v54  ;;  %v2429_v0 = vsel %vm2426_vm11, %v2428_v7, %v2424_v4  ;;  %vm2438_vm13 = vmor %vm2436_vm5, %vm2437_vm12  ;;  %v2443_v30 = vor.u32 1.1754944e-38, %v2442_v51  ;;  %vm2441_vm14 = vcmp.eq.f32.partialorder %v2440_v13, 8.507059e+37  ;;  %v2091_v4 = vpop.f32.mrf.mxu1  ;;  %v2594_v13 = vpop.permute.xlu2 %2593 }
 0xdb5   :  { %v2745_v25 = vsub.f32 1.0, %v2429_v0  ;;  %2653 = vperm.xlu1 %3885, %v2429_v0   ;;  %v2433_v17 = vsub.f32 1.0, %v2432_v43  ;;  %vm2451_vm15 = vweird.f32 %v2197_v54 }
 0xdb6   :  { %v1918_v42 = vpop.f32.mrf.mxu0 }
 0xdb7   :  { %v2086_v37 = vadd.f32 %v2085_v14, %v1918_v42  ;;  %2828 = vperm.xlu2 %3886, %v2745_v25   ;;  %v2584_v59 = vpop.permute.xlu0 %2583  ;;  %v2434_v39 = vmul.f32 %v4104_v19, %v2433_v17  ;;  %v2455_v25 = vand.u32 2147483647, %v2197_v54  ;;  %v2457_v17 = vand.u32 2147483648, %v2197_v54 }
 0xdb9   :  { %v4106_v55 = vpop.eup %4105  ;;  %v3604_v15 = vmul.f32 -1.442695, %v2086_v37  ;;  %v2435_v5 = vadd.f32 %v4104_v19, %v2434_v39  ;;  %vm2456_vm8 = vcmp.eq.f32.partialorder %v2455_v25, 8.507059e+37 }
 0xdba   :  { %v4108_v28 = vpop.eup %4107  ;;  %v5466_v22 = vadd.f32 1.0, %v4106_v55  ;;  %v2706_v55 = vmul.f32 %v5129_v60, %v2584_v59 }
 0xdbb   :  { %4109 = vpow2.f32 %v3604_v15  ;;  %v2439_v3 = vsel %vm2438_vm13, %v4104_v19, %v2435_v5  ;;  %v2447_v7 = vmul.f32 %v4108_v28, %v2197_v54  ;;  %vm2452_vm4 = vweird.f32 %v4108_v28 }
 0xdbc   :  { %4111 = vrcp.f32 %v5466_v22  ;;  %v2444_v14 = vsel %vm2441_vm14, %v2443_v30, %v2439_v3  ;;  %vm2453_vm7 = vmor %vm2451_vm15, %vm2452_vm4  ;;  %vm2466_vm9 = vweird.f32 %v5466_v22  ;;  %v2094_v25 = vpop.f32.mrf.mxu1 }
 0xdbd   :  { %v2746_v43 = vsub.f32 1.0, %v2444_v14  ;;  %2658 = vperm.xlu0 %3884, %v2444_v14   ;;  %v2448_v0 = vsub.f32 1.0, %v2447_v7 }
 0xdbe   :  { %v1921_v48 = vpop.f32.mrf.mxu0 }
 0xdbf   :  { %v2089_v42 = vadd.f32 %v2088_v58, %v1921_v48  ;;  %v2589_v37 = vpop.permute.xlu1 %2588  ;;  %2833 = vperm.xlu1 %3885, %v2746_v43   ;;  %v2449_v39 = vmul.f32 %v4108_v28, %v2448_v0  ;;  %v2759_v51 = vpop.permute.xlu0 %2758  ;;  %v2458_v58 = vor.u32 1.1754944e-38, %v2457_v17  ;;  %v2472_v48 = vand.u32 2147483648, %v5466_v22 }
 0xdc0   :  { %v2881_v5 = vmul.f32 %v5249_v36, %v2759_v51  ;;  %v2707_v51 = vmul.f32 %v5137_v1, %v2589_v37 }
 0xdc1   :  { %v4110_v19 = vpop.eup %4109  ;;  %v3605_v15 = vmul.f32 -1.442695, %v2089_v42  ;;  %v2450_v30 = vadd.f32 %v4108_v28, %v2449_v39  ;;  %v2470_v39 = vand.u32 2147483647, %v5466_v22 }
 0xdc2   :  { %v4112_v3 = vpop.eup %4111  ;;  %v5471_v7 = vadd.f32 1.0, %v4110_v19  ;;  %v2906_v14 = vadd.f32 %v2881_v5, %v2706_v55 }
 0xdc3   :  { %4113 = vpow2.f32 %v3605_v15  ;;  %v2454_v43 = vsel %vm2453_vm7, %v4108_v28, %v2450_v30  ;;  %v2462_v54 = vmul.f32 %v4112_v3, %v5466_v22  ;;  %vm2467_vm10 = vweird.f32 %v4112_v3 }
 0xdc4   :  { %4115 = vrcp.f32 %v5471_v7  ;;  %v2459_v0 = vsel %vm2456_vm8, %v2458_v58, %v2454_v43  ;;  %3611 = vmatmul.msk.f32.vlgmr.msrb.gmra.mxu2 %vm364_vm3, %v2906_v14  ;;  %vm2468_vm6 = vmor %vm2466_vm9, %vm2467_vm10  ;;  %v2769_v43 = vpop.permute.xlu2 %2768  ;;  %vm2471_vm11 = vcmp.eq.f32.partialorder %v2470_v39, 8.507059e+37  ;;  %vm2481_vm5 = vweird.f32 %v5471_v7 }
 0xdc5   :  { %v2747_v60 = vsub.f32 1.0, %v2459_v0  ;;  %2663 = vperm.xlu2 %3886, %v2459_v0   ;;  %v2463_v36 = vsub.f32 1.0, %v2462_v54  ;;  %v2487_v22 = vand.u32 2147483648, %v5471_v7 }
 0xdc6   :  { %v1924_v59 = vpop.f32.mrf.mxu0 }
 0xdc7   :  { %v2092_v17 = vadd.f32 %v2091_v4, %v1924_v59  ;;  %v2764_v42 = vpop.permute.xlu1 %2763  ;;  %2838 = vperm.xlu0 %3884, %v2747_v60   ;;  %v2464_v28 = vmul.f32 %v4112_v3, %v2463_v36  ;;  %v2473_v4 = vor.u32 1.1754944e-38, %v2472_v48  ;;  %v2883_v60 = vmul.f32 %v5271_v57, %v2769_v43 }
 0xdc8   :  { %v2882_v19 = vmul.f32 %v5260_v47, %v2764_v42  ;;  %v2485_v48 = vand.u32 2147483647, %v5471_v7 }
 0xdc9   :  { %v4114_v55 = vpop.eup %4113  ;;  %v3606_v15 = vmul.f32 -1.442695, %v2092_v17  ;;  %v2465_v5 = vadd.f32 %v4112_v3, %v2464_v28  ;;  %v2708_v17 = vmul.f32 %v5143_v10, %v2594_v13  ;;  %v2097_v28 = vpop.f32.mrf.mxu1 }
 0xdca   :  { %v4116_v30 = vpop.eup %4115  ;;  %v5481_v58 = vadd.f32 1.0, %v4114_v55  ;;  %v2907_v14 = vadd.f32 %v2882_v19, %v2707_v51  ;;  %vm2486_vm14 = vcmp.eq.f32.partialorder %v2485_v48, 8.507059e+37 }
 0xdcb   :  { %4117 = vpow2.f32 %v3606_v15  ;;  %v2469_v54 = vsel %vm2468_vm6, %v4112_v3, %v2465_v5  ;;  %v2477_v0 = vmul.f32 %v4116_v30, %v5471_v7  ;;  %vm2482_vm12 = vweird.f32 %v4116_v30 }
 0xdcc   :  { %4119 = vrcp.f32 %v5481_v58  ;;  %v2474_v1 = vsel %vm2471_vm11, %v2473_v4, %v2469_v54  ;;  %3612 = vmatmul.msk.f32.gmra.mxu2 %vm364_vm3, %v2907_v14  ;;  %v2908_v57 = vadd.f32 %v2883_v60, %v2708_v17  ;;  %vm2483_vm13 = vmor %vm2481_vm5, %vm2482_vm12  ;;  %v2488_v15 = vor.u32 1.1754944e-38, %v2487_v22 }
 0xdcd   :  { %v2748_v47 = vsub.f32 1.0, %v2474_v1  ;;  %2668 = vperm.xlu1 %3885, %v2474_v1   ;;  %v2478_v37 = vsub.f32 1.0, %v2477_v0  ;;  %v2500_v7 = vand.u32 2147483647, %v5481_v58  ;;  %v2502_v0 = vand.u32 2147483648, %v5481_v58 }
 0xdce   :  { %v1927_v36 = vpop.f32.mrf.mxu0  ;;  %vm2496_vm4 = vweird.f32 %v5481_v58 }
 0xdcf   :  { %v2095_v59 = vadd.f32 %v2094_v25, %v1927_v36  ;;  %2843 = vperm.xlu2 %3886, %v2748_v47   ;;  %v2479_v3 = vmul.f32 %v4116_v30, %v2478_v37  ;;  %v2599_v10 = vpop.permute.xlu0 %2598  ;;  %vm2501_vm8 = vcmp.eq.f32.partialorder %v2500_v7, 8.507059e+37  ;;  %v2503_v48 = vor.u32 1.1754944e-38, %v2502_v0 }
 0xdd0   :  { %v2709_v60 = vmul.f32 %v5152_v16, %v2599_v10 }
 0xdd1   :  { %v4118_v42 = vpop.eup %4117  ;;  %v3607_v39 = vmul.f32 -1.442695, %v2095_v59  ;;  %v2480_v51 = vadd.f32 %v4116_v30, %v2479_v3  ;;  %v2774_v13 = vpop.permute.xlu1 %2773 }
 0xdd2   :  { %v4120_v19 = vpop.eup %4119  ;;  %v5493_v55 = vadd.f32 1.0, %v4118_v42  ;;  %v2100_v17 = vpop.f32.mrf.mxu1 }
 0xdd3   :  { %4121 = vpow2.f32 %v3607_v39  ;;  %v2484_v25 = vsel %vm2483_vm13, %v4116_v30, %v2480_v51  ;;  %v2492_v5 = vmul.f32 %v4120_v19, %v5481_v58  ;;  %v2884_v30 = vmul.f32 %v5282_v2, %v2774_v13 }
 0xdd4   :  { %4123 = vrcp.f32 %v5493_v55  ;;  %v2489_v14 = vsel %vm2486_vm14, %v2488_v15, %v2484_v25  ;;  %3613 = vmatmul.msk.f32.gmra.mxu2 %vm364_vm3, %v2908_v57  ;;  %vm2497_vm15 = vweird.f32 %v4120_v19  ;;  %v2604_v57 = vpop.permute.xlu2 %2603  ;;  %v2515_v25 = vand.u32 2147483647, %v5493_v55 }
 0xdd5   :  { %2673 = vperm.xlu0 %3884, %v2489_v14   ;;  %v2749_v4 = vsub.f32 1.0, %v2489_v14  ;;  %v2493_v43 = vsub.f32 1.0, %v2492_v5  ;;  %vm2498_vm7 = vmor %vm2496_vm4, %vm2497_vm15  ;;  %v2909_v2 = vadd.f32 %v2884_v30, %v2709_v60  ;;  %v2517_v5 = vand.u32 2147483648, %v5493_v55 }
 0xdd6   :  { %v1930_v54 = vpop.f32.mrf.mxu0  ;;  %vm2511_vm10 = vweird.f32 %v5493_v55  ;;  %vm2516_vm11 = vcmp.eq.f32.partialorder %v2515_v25, 8.507059e+37 }
 0xdd7   :  { %v2098_v1 = vadd.f32 %v2097_v28, %v1930_v54  ;;  %2848 = vperm.xlu1 %3885, %v2749_v4   ;;  %v2494_v47 = vmul.f32 %v4120_v19, %v2493_v43  ;;  %v2710_v4 = vmul.f32 %v5160_v23, %v2604_v57  ;;  %v2518_v30 = vor.u32 1.1754944e-38, %v2517_v5 }
 0xdd9   :  { %v4122_v37 = vpop.eup %4121  ;;  %v3608_v36 = vmul.f32 -1.442695, %v2098_v1  ;;  %v2495_v22 = vadd.f32 %v4120_v19, %v2494_v47  ;;  %v2779_v39 = vpop.permute.xlu0 %2778 }
 0xdda   :  { %v4124_v59 = vpop.eup %4123  ;;  %v5505_v3 = vadd.f32 1.0, %v4122_v37  ;;  %v2885_v10 = vmul.f32 %v5294_v12, %v2779_v39  ;;  %v2103_v23 = vpop.f32.mrf.mxu1 }
 0xddb   :  { %4125 = vpow2.f32 %v3608_v36  ;;  %v2499_v42 = vsel %vm2498_vm7, %v4120_v19, %v2495_v22  ;;  %v2507_v28 = vmul.f32 %v4124_v59, %v5493_v55  ;;  %vm2512_vm9 = vweird.f32 %v4124_v59 }
 0xddc   :  { %4127 = vrcp.f32 %v5505_v3  ;;  %v2504_v16 = vsel %vm2501_vm8, %v2503_v48, %v2499_v42  ;;  %3614 = vmatmul.msk.f32.gmra.mxu2 %vm364_vm3, %v2909_v2  ;;  %vm2513_vm6 = vmor %vm2511_vm10, %vm2512_vm9  ;;  %v2910_v1 = vadd.f32 %v2885_v10, %v2710_v4  ;;  %v2784_v22 = vpop.permute.xlu2 %2783  ;;  %v2532_v2 = vand.u32 2147483648, %v5505_v3 }
 0xddd   :  { %2678 = vperm.xlu2 %3886, %v2504_v16   ;;  %v2750_v58 = vsub.f32 1.0, %v2504_v16  ;;  %v2508_v51 = vsub.f32 1.0, %v2507_v28  ;;  %v2886_v16 = vmul.f32 %v5306_v20, %v2784_v22  ;;  %vm2526_vm12 = vweird.f32 %v5505_v3 }
 0xdde   :  { %v1933_v15 = vpop.f32.mrf.mxu0  ;;  %v2533_v25 = vor.u32 1.1754944e-38, %v2532_v2 }
 0xddf   :  { %v2101_v19 = vadd.f32 %v2100_v17, %v1933_v15  ;;  %2853 = vperm.xlu0 %3884, %v2750_v58   ;;  %v2509_v13 = vmul.f32 %v4124_v59, %v2508_v51  ;;  %v2609_v37 = vpop.permute.xlu1 %2608  ;;  %v2530_v17 = vand.u32 2147483647, %v5505_v3 }
 0xde1   :  { %v4126_v14 = vpop.eup %4125  ;;  %v3609_v43 = vmul.f32 -1.442695, %v2101_v19  ;;  %v2510_v54 = vadd.f32 %v4124_v59, %v2509_v13  ;;  %vm2531_vm14 = vcmp.eq.f32.partialorder %v2530_v17, 8.507059e+37 }
 0xde2   :  { %v4128_v7 = vpop.eup %4127  ;;  %v5515_v0 = vadd.f32 1.0, %v4126_v14 }
 0xde3   :  { %4129 = vpow2.f32 %v3609_v43  ;;  %v2514_v12 = vsel %vm2513_vm6, %v4124_v59, %v2510_v54  ;;  %v2522_v47 = vmul.f32 %v4128_v7, %v5505_v3  ;;  %v2711_v59 = vmul.f32 %v5168_v26, %v2609_v37 }
 0xde4   :  { %4131 = vrcp.f32 %v5515_v0  ;;  %v2519_v60 = vsel %vm2516_vm11, %v2518_v30, %v2514_v12  ;;  %3615 = vmatmul.msk.f32.gmra.mxu2 %vm364_vm3, %v2910_v1  ;;  %vm2527_vm5 = vweird.f32 %v4128_v7  ;;  %v2547_v3 = vand.u32 2147483648, %v5515_v0 }
 0xde5   :  { %2683 = vperm.xlu1 %3885, %v2519_v60   ;;  %v2751_v55 = vsub.f32 1.0, %v2519_v60  ;;  %v2523_v36 = vsub.f32 1.0, %v2522_v47  ;;  %vm2528_vm13 = vmor %vm2526_vm12, %vm2527_vm5  ;;  %v2911_v5 = vadd.f32 %v2886_v16, %v2711_v59  ;;  %vm2541_vm4 = vweird.f32 %v5515_v0 }
 0xde6   :  { %v1936_v48 = vpop.f32.mrf.mxu0  ;;  %v2548_v60 = vor.u32 1.1754944e-38, %v2547_v3 }
 0xde7   :  { %v2104_v42 = vadd.f32 %v2103_v23, %v1936_v48  ;;  %2858 = vperm.xlu2 %3886, %v2751_v55   ;;  %v2524_v28 = vmul.f32 %v4128_v7, %v2523_v36  ;;  %v2614_v19 = vpop.permute.xlu0 %2613 }
 0xde8   :  { %v2712_v1 = vmul.f32 %v5176_v9, %v2614_v19  ;;  %v2619_v9 = vpop.permute.xlu2 %2618 }
 0xde9   :  { %v4130_v39 = vpop.eup %4129  ;;  %v3610_v58 = vmul.f32 -1.442695, %v2104_v42  ;;  %v2525_v51 = vadd.f32 %v4128_v7, %v2524_v28  ;;  %v2789_v13 = vpop.permute.xlu1 %2788  ;;  %v2713_v28 = vmul.f32 %v5183_v35, %v2619_v9 }
 0xdea   :  { %v4132_v57 = vpop.eup %4131  ;;  %v2204_v15 = vadd.f32 1.0, %v4130_v39  ;;  %v2887_v43 = vmul.f32 %v5318_v50, %v2789_v13 }
 0xdeb   :  { %4133 = vpow2.f32 %v3610_v58  ;;  %v2529_v10 = vsel %vm2528_vm13, %v4128_v7, %v2525_v51  ;;  %v2537_v26 = vmul.f32 %v4132_v57, %v5515_v0  ;;  %vm2542_vm15 = vweird.f32 %v4132_v57 }
 0xdec   :  { %4135 = vrcp.f32 %v2204_v15  ;;  %v2534_v14 = vsel %vm2531_vm14, %v2533_v25, %v2529_v10  ;;  %3616 = vmatmul.msk.f32.gmra.mxu2 %vm364_vm3, %v2911_v5  ;;  %v2545_v7 = vand.u32 2147483647, %v5515_v0  ;;  %vm2543_vm7 = vmor %vm2541_vm4, %vm2542_vm15  ;;  %v2912_v23 = vadd.f32 %v2887_v43, %v2712_v1 }
 0xded   :  { %2688 = vperm.xlu0 %3884, %v2534_v14   ;;  %v2752_v20 = vsub.f32 1.0, %v2534_v14  ;;  %v2538_v4 = vsub.f32 1.0, %v2537_v26  ;;  %v2562_v2 = vand.u32 2147483648, %v2204_v15  ;;  %v2560_v42 = vand.u32 2147483647, %v2204_v15 }
 0xdee   :  { %vm2546_vm8 = vcmp.eq.f32.partialorder %v2545_v7, 8.507059e+37  ;;  %vm2556_vm10 = vweird.f32 %v2204_v15 }
 0xdef   :  { %2863 = vperm.xlu1 %3885, %v2752_v20   ;;  %v2539_v54 = vmul.f32 %v4132_v57, %v2538_v4  ;;  %v2563_v58 = vor.u32 1.1754944e-38, %v2562_v2  ;;  %vm2561_vm11 = vcmp.eq.f32.partialorder %v2560_v42, 8.507059e+37 }
 0xdf0   :  { %v2799_v19 = vpop.permute.xlu2 %2798 }
 0xdf1   :  { %v4134_v30 = vpop.eup %4133  ;;  %v2540_v12 = vadd.f32 %v4132_v57, %v2539_v54  ;;  %v2794_v50 = vpop.permute.xlu0 %2793  ;;  %v2889_v20 = vmul.f32 %v5337_v27, %v2799_v19 }
 0xdf2   :  { %v4136_v47 = vpop.eup %4135  ;;  %v2205_v37 = vadd.f32 1.0, %v4134_v30  ;;  %v2888_v0 = vmul.f32 %v5328_v29, %v2794_v50 }
 0xdf3   :  { %v2544_v55 = vsel %vm2543_vm7, %v4132_v57, %v2540_v12  ;;  %v2552_v36 = vmul.f32 %v4136_v47, %v2204_v15  ;;  %vm2557_vm9 = vweird.f32 %v4136_v47 }
 0xdf4   :  { %4137 = vrcp.f32 %v2205_v37  ;;  %v2549_v22 = vsel %vm2546_vm8, %v2548_v60, %v2544_v55  ;;  %3617 = vmatmul.msk.f32.gmra.mxu2 %vm364_vm3, %v2912_v23  ;;  %vm2558_vm6 = vmor %vm2556_vm10, %vm2557_vm9  ;;  %v2913_v51 = vadd.f32 %v2888_v0, %v2713_v28  ;;  %v2577_v13 = vand.u32 2147483648, %v2205_v37 }
 0xdf5   :  { %2693 = vperm.xlu2 %3886, %v2549_v22   ;;  %v2753_v48 = vsub.f32 1.0, %v2549_v22  ;;  %v2553_v17 = vsub.f32 1.0, %v2552_v36  ;;  %v2575_v14 = vand.u32 2147483647, %v2205_v37  ;;  %vm2571_vm12 = vweird.f32 %v2205_v37 }
 0xdf6   :  { %v2578_v3 = vor.u32 1.1754944e-38, %v2577_v13 }
 0xdf7   :  { %2868 = vperm.xlu0 %3884, %v2753_v48   ;;  %v2554_v59 = vmul.f32 %v4136_v47, %v2553_v17  ;;  %v2624_v5 = vpop.permute.xlu1 %2623  ;;  %vm2576_vm14 = vcmp.eq.f32.partialorder %v2575_v14, 8.507059e+37 }
 0xdf8   :  { %v2714_v35 = vmul.f32 %v5191_v41, %v2624_v5 }
 0xdf9   :  { %v2555_v39 = vadd.f32 %v4136_v47, %v2554_v59 }
 0xdfa   :  { %v4138_v16 = vpop.eup %4137  ;;  %v2914_v43 = vadd.f32 %v2889_v20, %v2714_v35 }
 0xdfb   :  { %v2559_v57 = vsel %vm2558_vm6, %v4136_v47, %v2555_v39  ;;  %v2567_v25 = vmul.f32 %v4138_v16, %v2205_v37  ;;  %vm2572_vm5 = vweird.f32 %v4138_v16  ;;  %v2634_v37 = vpop.permute.xlu2 %2633 }
 0xdfc   :  { %v2564_v10 = vsel %vm2561_vm11, %v2563_v58, %v2559_v57  ;;  %3618 = vmatmul.msk.f32.gmra.mxu2 %vm364_vm3, %v2913_v51  ;;  %vm2573_vm13 = vmor %vm2571_vm12, %vm2572_vm5  ;;  %v2716_v55 = vmul.f32 %v5207_v56, %v2634_v37 }
 0xdfd   :  { %2698 = vperm.xlu1 %3885, %v2564_v10   ;;  %v2754_v29 = vsub.f32 1.0, %v2564_v10  ;;  %v2568_v26 = vsub.f32 1.0, %v2567_v25 }
 0xdff   :  { %2873 = vperm.xlu2 %3886, %v2754_v29   ;;  %v2569_v15 = vmul.f32 %v4138_v16, %v2568_v26  ;;  %v2629_v7 = vpop.permute.xlu0 %2628  ;;  %v5564_v26 = vld [vmem:[%s4699_s29] ss:$0 sm:$0xff]  ;;  %s3363_s29 = sshll.u32 %s4552_s13, 4  ;;  %s3364_s29 = int_to_ptr.vmem [resolvable:$true] %s3363_s29 }
 0xe00   :  { %v2715_v47 = vmul.f32 %v5199_v49, %v2629_v7 }
 0xe01   :  { %v2570_v4 = vadd.f32 %v4138_v16, %v2569_v15  ;;  %v2804_v30 = vpop.permute.xlu1 %2803 }
 0xe02   :  { %v2890_v12 = vmul.f32 %v5346_v32, %v2804_v30  ;;  %v5902_v30 = vld [vmem:[#allocation59_spill] sm:$0xff] }
 0xe03   :  { %v2574_v54 = vsel %vm2573_vm13, %v4138_v16, %v2570_v4  ;;  %v2814_v22 = vpop.permute.xlu2 %2813 }
 0xe04   :  { %v2579_v1 = vsel %vm2576_vm14, %v2578_v3, %v2574_v54  ;;  %3619 = vmatmul.msk.f32.gmra.mxu2 %vm364_vm3, %v2914_v43  ;;  %v2915_v27 = vadd.f32 %v2890_v12, %v2715_v47  ;;  %v2892_v32 = vmul.f32 %v5354_v38, %v2814_v22  ;;  %v5903_v12 = vld [vmem:[#allocation53_spill] sm:$0xff] }
 0xe05   :  { %2703 = vperm.xlu0 %3884, %v2579_v1   ;;  %v2755_v41 = vsub.f32 1.0, %v2579_v1 }
 0xe07   :  { %2878 = vperm.xlu1 %3885, %v2755_v41  }
 0xe09   :  { %v2809_v60 = vpop.permute.xlu0 %2808 }
 0xe0a   :  { %v2891_v23 = vmul.f32 %v5350_v34, %v2809_v60 }
 0xe0b   :  { %v2649_v59 = vpop.permute.xlu2 %2648 }
 0xe0c   :  { %3620 = vmatmul.msk.f32.gmra.mxu2 %vm364_vm3, %v2915_v27  ;;  %v2916_v36 = vadd.f32 %v2891_v23, %v2716_v55  ;;  %v5904_v23 = vld [vmem:[#allocation54_spill] sm:$0xff] }
 0xe0f   :  { %v2639_v50 = vpop.permute.xlu1 %2638 }
 0xe10   :  { %v2717_v48 = vmul.f32 %v5215_v63, %v2639_v50  ;;  %v2719_v63 = vmul.f32 %v5229_v18, %v2649_v59  ;;  %v5905_v50 = vld [vmem:[#allocation60_spill] sm:$0xff] }
 0xe12   :  { %v2917_v17 = vadd.f32 %v2892_v32, %v2717_v48 }
 0xe13   :  { %v2829_v39 = vpop.permute.xlu2 %2828 }
 0xe14   :  { %3621 = vmatmul.msk.f32.gmra.mxu2 %vm364_vm3, %v2916_v36 }
 0xe17   :  { %v2644_v49 = vpop.permute.xlu0 %2643 }
 0xe18   :  { %v2718_v34 = vmul.f32 %v5221_v11, %v2644_v49 }
 0xe19   :  { %v2819_v9 = vpop.permute.xlu1 %2818 }
 0xe1a   :  { %v2893_v2 = vmul.f32 %v5358_v45, %v2819_v9  ;;  %v2895_v45 = vmul.f32 %v5367_v62, %v2829_v39 }
 0xe1c   :  { %3622 = vmatmul.msk.f32.gmra.mxu2 %vm364_vm3, %v2917_v17  ;;  %v2918_v0 = vadd.f32 %v2893_v2, %v2718_v34 }
 0xe1f   :  { %v2664_v5 = vpop.permute.xlu2 %2663 }
 0xe21   :  { %v2824_v56 = vpop.permute.xlu0 %2823 }
 0xe22   :  { %v2894_v42 = vmul.f32 %v5362_v52, %v2824_v56 }
 0xe24   :  { %3623 = vmatmul.msk.f32.gmra.mxu2 %vm364_vm3, %v2918_v0  ;;  %v2919_v28 = vadd.f32 %v2894_v42, %v2719_v63  ;;  %v5906_v0 = vld [vmem:[#allocation55_spill] sm:$0xff] }
 0xe27   :  { %v2654_v38 = vpop.permute.xlu1 %2653 }
 0xe28   :  { %v2720_v16 = vmul.f32 %v5237_v24, %v2654_v38  ;;  %v2722_v24 = vmul.f32 %v5255_v44, %v2664_v5 }
 0xe29   :  { %v2844_v19 = vpop.permute.xlu2 %2843 }
 0xe2a   :  { %v2920_v11 = vadd.f32 %v2895_v45, %v2720_v16  ;;  %v5907_v45 = vld [vmem:[#allocation56_spill] sm:$0xff] }
 0xe2c   :  { %3624 = vmatmul.msk.f32.gmra.mxu2 %vm364_vm3, %v2919_v28 }
 0xe2f   :  { %v2659_v58 = vpop.permute.xlu0 %2658 }
 0xe30   :  { %v2721_v52 = vmul.f32 %v5243_v31, %v2659_v58  ;;  %v2898_v31 = vmul.f32 %v5383_v33, %v2844_v19 }
 0xe31   :  { %v2834_v51 = vpop.permute.xlu1 %2833 }
 0xe32   :  { %v2896_v57 = vmul.f32 %v5373_v6, %v2834_v51 }
 0xe34   :  { %3625 = vmatmul.msk.f32.gmra.mxu2 %vm364_vm3, %v2920_v11  ;;  %v2921_v18 = vadd.f32 %v2896_v57, %v2721_v52 }
 0xe37   :  { %v2679_v7 = vpop.permute.xlu2 %2678 }
 0xe39   :  { %v2839_v25 = vpop.permute.xlu0 %2838 }
 0xe3a   :  { %v2897_v10 = vmul.f32 %v5379_v21, %v2839_v25 }
 0xe3c   :  { %3626 = vmatmul.msk.f32.gmra.mxu2 %vm364_vm3, %v2921_v18  ;;  %v2922_v62 = vadd.f32 %v2897_v10, %v2722_v24  ;;  %v5908_v18 = vld [vmem:[#allocation57_spill] sm:$0xff] }
 0xe3d   :  { %v5909_v10 = vld [vmem:[#allocation61_spill] sm:$0xff] }
 0xe3f   :  { %v2669_v29 = vpop.permute.xlu1 %2668 }
 0xe40   :  { %v2723_v6 = vmul.f32 %v5266_v53, %v2669_v29 }
 0xe41   :  { %v2859_v37 = vpop.permute.xlu2 %2858 }
 0xe42   :  { %v2923_v15 = vadd.f32 %v2898_v31, %v2723_v6  ;;  %v2901_v22 = vmul.f32 %v5905_v50, %v2859_v37 }
 0xe44   :  { %3627 = vmatmul.msk.f32.gmra.mxu2 %vm364_vm3, %v2922_v62 }
 0xe47   :  { %v3031_v13 = vpop.f32.mrf.mxu2  ;;  %v2674_v44 = vpop.permute.xlu0 %2673 }
 0xe48   :  { %v5569_v35 = vadd.f32 %v5564_v26, %v3031_v13  ;;  %v2724_v53 = vmul.f32 %v5277_v61, %v2674_v44  ;;  %v5910_v13 = vld [vmem:[#allocation62_spill] sm:$0xff] }
 0xe49   :  { %v2849_v14 = vpop.permute.xlu1 %2848 }
 0xe4a   :  { %v3106_v21 = vsel %vm324_vm2, %v5569_v35, -inf  ;;  %v2899_v20 = vmul.f32 %v5389_v40, %v2849_v14  ;;  %v2725_v40 = vmul.f32 %v5903_v12, %v2679_v7 }
 0xe4b   :  { %3107 = vmax.xlane.f32.xlu2 %v3106_v21  ;;  %v5911_v21 = vld [vmem:[#allocation58_spill] sm:$0xff] }
 0xe4c   :  { %3628 = vmatmul.msk.f32.gmra.mxu2 %vm364_vm3, %v2923_v15  ;;  %v2924_v33 = vadd.f32 %v2899_v20, %v2724_v53 }
 0xe4f   :  { %v3034_v4 = vpop.f32.mrf.mxu2  ;;  %v2694_v38 = vpop.permute.xlu2 %2693 }
 0xe50   :  { %v5577_v3 = vadd.f32 %v5564_v26, %v3034_v4 }
 0xe51   :  { %v2854_v54 = vpop.permute.xlu0 %2853 }
 0xe52   :  { %v3109_v43 = vsel %vm324_vm2, %v5577_v3, -inf  ;;  %v2900_v1 = vmul.f32 %v5902_v30, %v2854_v54 }
 0xe53   :  { %3110 = vmax.xlane.f32.xlu0 %v3109_v43 }
 0xe54   :  { %3629 = vmatmul.msk.f32.gmra.mxu2 %vm364_vm3, %v2924_v33  ;;  %v2925_v61 = vadd.f32 %v2900_v1, %v2725_v40 }
 0xe57   :  { %v3037_v41 = vpop.f32.mrf.mxu2  ;;  %v2684_v60 = vpop.permute.xlu1 %2683 }
 0xe58   :  { %v5585_v47 = vadd.f32 %v5564_v26, %v3037_v41  ;;  %v2726_v55 = vmul.f32 %v5904_v23, %v2684_v60 }
 0xe59   :  { %v2874_v52 = vpop.permute.xlu2 %2873 }
 0xe5a   :  { %v3112_v27 = vsel %vm324_vm2, %v5585_v47, -inf  ;;  %v2926_v32 = vadd.f32 %v2901_v22, %v2726_v55 }
 0xe5b   :  { %3113 = vmax.xlane.f32.xlu1 %v3112_v27 }
 0xe5c   :  { %3630 = vmatmul.msk.f32.gmra.mxu2 %vm364_vm3, %v2925_v61 }
 0xe5f   :  { %v3040_v36 = vpop.f32.mrf.mxu2  ;;  %v2689_v49 = vpop.permute.xlu0 %2688 }
 0xe60   :  { %v5593_v48 = vadd.f32 %v5564_v26, %v3040_v36  ;;  %v2727_v56 = vmul.f32 %v5906_v0, %v2689_v49 }
 0xe61   :  { %v2864_v9 = vpop.permute.xlu1 %2863 }
 0xe62   :  { %v3115_v17 = vsel %vm324_vm2, %v5593_v48, -inf  ;;  %v2902_v2 = vmul.f32 %v5410_v8, %v2864_v9  ;;  %v2728_v8 = vmul.f32 %v5907_v45, %v2694_v38 }
 0xe63   :  { %3116 = vmax.xlane.f32.xlu2 %v3115_v17 }
 0xe64   :  { %3631 = vmatmul.msk.f32.gmra.mxu2 %vm364_vm3, %v2926_v32  ;;  %v2927_v42 = vadd.f32 %v2902_v2, %v2727_v56 }
 0xe67   :  { %v3043_v34 = vpop.f32.mrf.mxu2 }
 0xe68   :  { %v5601_v59 = vadd.f32 %v5564_v26, %v3043_v34  ;;  %v5912_v34 = vld [vmem:[#allocation52_spill] sm:$0xff] }
 0xe69   :  { %v2869_v28 = vpop.permute.xlu0 %2868 }
 0xe6a   :  { %v3118_v63 = vsel %vm324_vm2, %v5601_v59, -inf  ;;  %v2903_v39 = vmul.f32 %v5418_v46, %v2869_v28  ;;  %v2904_v46 = vmul.f32 %v5909_v10, %v2874_v52 }
 0xe6b   :  { %3119 = vmax.xlane.f32.xlu2 %v3118_v63 }
 0xe6c   :  { %3632 = vmatmul.msk.f32.gmra.mxu2 %vm364_vm3, %v2927_v42  ;;  %v2928_v58 = vadd.f32 %v2903_v39, %v2728_v8 }
 0xe6f   :  { %v3046_v16 = vpop.f32.mrf.mxu2  ;;  %v2699_v57 = vpop.permute.xlu1 %2698 }
 0xe70   :  { %v5609_v11 = vadd.f32 %v5564_v26, %v3046_v16  ;;  %v2729_v25 = vmul.f32 %v5908_v18, %v2699_v57 }
 0xe72   :  { %v3121_v51 = vsel %vm324_vm2, %v5609_v11, -inf  ;;  %v2929_v62 = vadd.f32 %v2904_v46, %v2729_v25 }
 0xe73   :  { %3122 = vmax.xlane.f32.xlu0 %v3121_v51 }
 0xe74   :  { %3633 = vmatmul.msk.f32.gmra.mxu2 %vm364_vm3, %v2928_v58 }
 0xe77   :  { %v3049_v5 = vpop.f32.mrf.mxu2  ;;  %v2704_v6 = vpop.permute.xlu0 %2703 }
 0xe78   :  { %v5617_v24 = vadd.f32 %v5564_v26, %v3049_v5  ;;  %v2730_v44 = vmul.f32 %v5911_v21, %v2704_v6 }
 0xe79   :  { %v2879_v19 = vpop.permute.xlu1 %2878 }
 0xe7a   :  { %v3124_v29 = vsel %vm324_vm2, %v5617_v24, -inf  ;;  %v2905_v31 = vmul.f32 %v5910_v13, %v2879_v19 }
 0xe7b   :  { %3125 = vmax.xlane.f32.xlu1 %v3124_v29 }
 0xe7c   :  { %3634 = vmatmul.msk.f32.gmra.mxu2 %vm364_vm3, %v2929_v62  ;;  %v2930_v20 = vadd.f32 %v2905_v31, %v2730_v44 }
 0xe7f   :  { %v3052_v15 = vpop.f32.mrf.mxu2 }
 0xe80   :  { %v5625_v14 = vadd.f32 %v5564_v26, %v3052_v15 }
 0xe82   :  { %v3127_v4 = vsel %vm324_vm2, %v5625_v14, -inf }
 0xe83   :  { %3128 = vmax.xlane.f32.xlu2 %v3127_v4 }
 0xe84   :  { %3635 = vmatmul.msk.f32.gmra.mxu2 %vm364_vm3, %v2930_v20 }
 0xe87   :  { %v3055_v53 = vpop.f32.mrf.mxu2 }
 0xe88   :  { %v5631_v33 = vadd.f32 %v5564_v26, %v3055_v53 }
 0xe8a   :  { %v3130_v43 = vsel %vm324_vm2, %v5631_v33, -inf }
 0xe8b   :  { %3131 = vmax.xlane.f32.xlu0 %v3130_v43 }
 0xe8f   :  { %v3058_v54 = vpop.f32.mrf.mxu2 }
 0xe90   :  { %v5636_v7 = vadd.f32 %v5564_v26, %v3058_v54 }
 0xe92   :  { %v3133_v30 = vsel %vm324_vm2, %v5636_v7, -inf }
 0xe93   :  { %3134 = vmax.xlane.f32.xlu1 %v3133_v30 }
 0xe97   :  { %v3061_v1 = vpop.f32.mrf.mxu2 }
 0xe98   :  { %v5641_v41 = vadd.f32 %v5564_v26, %v3061_v1 }
 0xe9a   :  { %v3136_v12 = vsel %vm324_vm2, %v5641_v41, -inf }
 0xe9b   :  { %3137 = vmax.xlane.f32.xlu2 %v3136_v12 }
 0xe9f   :  { %v3064_v40 = vpop.f32.mrf.mxu2 }
 0xea0   :  { %v5646_v61 = vadd.f32 %v5564_v26, %v3064_v40 }
 0xea2   :  { %v3139_v27 = vsel %vm324_vm2, %v5646_v61, -inf }
 0xea3   :  { %3140 = vmax.xlane.f32.xlu0 %v3139_v27 }
 0xea7   :  { %v3067_v60 = vpop.f32.mrf.mxu2 }
 0xea8   :  { %v5651_v37 = vadd.f32 %v5564_v26, %v3067_v60 }
 0xeaa   :  { %v3142_v23 = vsel %vm324_vm2, %v5651_v37, -inf }
 0xeab   :  { %3143 = vmax.xlane.f32.xlu1 %v3142_v23 }
 0xeaf   :  { %v3070_v55 = vpop.f32.mrf.mxu2 }
 0xeb0   :  { %v5656_v36 = vadd.f32 %v5564_v26, %v3070_v55 }
 0xeb2   :  { %v3145_v50 = vsel %vm324_vm2, %v5656_v36, -inf }
 0xeb3   :  { %3146 = vmax.xlane.f32.xlu2 %v3145_v50 }
 0xeb7   :  { %v3073_v22 = vpop.f32.mrf.mxu2 }
 0xeb8   :  { %v5661_v32 = vadd.f32 %v5564_v26, %v3073_v22 }
 0xeba   :  { %v3148_v17 = vsel %vm324_vm2, %v5661_v32, -inf }
 0xebb   :  { %3149 = vmax.xlane.f32.xlu0 %v3148_v17 }
 0xebe   :  { %v3108_v49 = vpop.xlane.xlu2 %3107 }
 0xebf   :  { %vm3181_vm3 = vcmp.eq.f32.partialorder %v5569_v35, %v3108_v49  ;;  %v3076_v9 = vpop.f32.mrf.mxu2 }
 0xec0   :  { %v5667_v2 = vadd.f32 %v5564_v26, %v3076_v9  ;;  %v3206_v0 = vsel %vm3181_vm3, %v5912_v34, 16.0 }
 0xec1   :  { %v3231_v56 = vsel %vm324_vm2, %v3206_v0, inf }
 0xec2   :  { %3232 = vmin.xlane.f32.xlu2 %v3231_v56  ;;  %v3151_v42 = vsel %vm324_vm2, %v5667_v2, -inf }
 0xec3   :  { %3152 = vmax.xlane.f32.xlu1 %v3151_v42 }
 0xec6   :  { %v3111_v63 = vpop.xlane.xlu0 %3110 }
 0xec7   :  { %vm3182_vm15 = vcmp.eq.f32.partialorder %v5577_v3, %v3111_v63  ;;  %v3079_v28 = vpop.f32.mrf.mxu2 }
 0xec8   :  { %v5675_v38 = vadd.f32 %v5564_v26, %v3079_v28  ;;  %v3207_v35 = vsel %vm3182_vm15, %v5912_v34, 16.0 }
 0xec9   :  { %v3234_v39 = vsel %vm324_vm2, %v3207_v35, inf }
 0xeca   :  { %3235 = vmin.xlane.f32.xlu0 %v3234_v39  ;;  %v3154_v16 = vsel %vm324_vm2, %v5675_v38, -inf }
 0xecb   :  { %3155 = vmax.xlane.f32.xlu2 %v3154_v16 }
 0xece   :  { %v3114_v45 = vpop.xlane.xlu1 %3113 }
 0xecf   :  { %vm3183_vm4 = vcmp.eq.f32.partialorder %v5585_v47, %v3114_v45  ;;  %v3082_v8 = vpop.f32.mrf.mxu2 }
 0xed0   :  { %v5683_v58 = vadd.f32 %v5564_v26, %v3082_v8  ;;  %v3208_v3 = vsel %vm3183_vm4, %v5912_v34, 16.0 }
 0xed1   :  { %v3237_v51 = vsel %vm324_vm2, %v3208_v3, inf }
 0xed2   :  { %3238 = vmin.xlane.f32.xlu1 %v3237_v51  ;;  %v3157_v57 = vsel %vm324_vm2, %v5683_v58, -inf }
 0xed3   :  { %3158 = vmax.xlane.f32.xlu0 %v3157_v57 }
 0xed6   :  { %v3117_v52 = vpop.xlane.xlu2 %3116 }
 0xed7   :  { %vm3184_vm7 = vcmp.eq.f32.partialorder %v5593_v48, %v3117_v52  ;;  %v3085_v18 = vpop.f32.mrf.mxu2 }
 0xed8   :  { %v5691_v25 = vadd.f32 %v5564_v26, %v3085_v18  ;;  %v3209_v47 = vsel %vm3184_vm7, %v5912_v34, 16.0 }
 0xed9   :  { %v3240_v5 = vsel %vm324_vm2, %v3209_v47, inf }
 0xeda   :  { %3241 = vmin.xlane.f32.xlu2 %v3240_v5  ;;  %v3160_v10 = vsel %vm324_vm2, %v5691_v25, -inf }
 0xedb   :  { %3161 = vmax.xlane.f32.xlu1 %v3160_v10 }
 0xede   :  { %v3120_v46 = vpop.xlane.xlu2 %3119 }
 0xedf   :  { %vm3185_vm8 = vcmp.eq.f32.partialorder %v5601_v59, %v3120_v46  ;;  %v3088_v62 = vpop.f32.mrf.mxu2 }
 0xee0   :  { %v5699_v29 = vadd.f32 %v5564_v26, %v3088_v62  ;;  %v3210_v48 = vsel %vm3185_vm8, %v5912_v34, 16.0 }
 0xee1   :  { %v3243_v19 = vsel %vm324_vm2, %v3210_v48, inf }
 0xee2   :  { %3244 = vmin.xlane.f32.xlu0 %v3243_v19  ;;  %v3163_v6 = vsel %vm324_vm2, %v5699_v29, -inf }
 0xee3   :  { %3164 = vmax.xlane.f32.xlu2 %v3163_v6 }
 0xee6   :  { %v3123_v13 = vpop.xlane.xlu0 %3122 }
 0xee7   :  { %vm3186_vm9 = vcmp.eq.f32.partialorder %v5609_v11, %v3123_v13  ;;  %v3091_v31 = vpop.f32.mrf.mxu2 }
 0xee8   :  { %v5707_v15 = vadd.f32 %v5564_v26, %v3091_v31  ;;  %v3211_v59 = vsel %vm3186_vm9, %v5912_v34, 16.0 }
 0xee9   :  { %v3246_v21 = vsel %vm324_vm2, %v3211_v59, inf }
 0xeea   :  { %3247 = vmin.xlane.f32.xlu1 %v3246_v21  ;;  %v3166_v44 = vsel %vm324_vm2, %v5707_v15, -inf }
 0xeeb   :  { %3167 = vmax.xlane.f32.xlu0 %v3166_v44 }
 0xeee   :  { %v3126_v20 = vpop.xlane.xlu1 %3125 }
 0xeef   :  { %vm3187_vm10 = vcmp.eq.f32.partialorder %v5617_v24, %v3126_v20  ;;  %v3094_v4 = vpop.f32.mrf.mxu2 }
 0xef0   :  { %v5715_v53 = vadd.f32 %v5564_v26, %v3094_v4  ;;  %v3212_v11 = vsel %vm3187_vm10, %v5912_v34, 16.0 }
 0xef1   :  { %v3249_v43 = vsel %vm324_vm2, %v3212_v11, inf }
 0xef2   :  { %3250 = vmin.xlane.f32.xlu2 %v3249_v43  ;;  %v3169_v54 = vsel %vm324_vm2, %v5715_v53, -inf }
 0xef3   :  { %3170 = vmax.xlane.f32.xlu1 %v3169_v54 }
 0xef6   :  { %v3129_v27 = vpop.xlane.xlu2 %3128 }
 0xef7   :  { %v3097_v30 = vpop.f32.mrf.mxu2  ;;  %vm3188_vm6 = vcmp.eq.f32.partialorder %v5625_v14, %v3129_v27 }
 0xef8   :  { %v5722_v1 = vadd.f32 %v5564_v26, %v3097_v30  ;;  %v3213_v50 = vsel %vm3188_vm6, %v5912_v34, 16.0 }
 0xef9   :  { %v3252_v0 = vsel %vm324_vm2, %v3213_v50, inf }
 0xefa   :  { %v3172_v24 = vsel %vm324_vm2, %v5722_v1, -inf }
 0xefb   :  { %3173 = vmax.xlane.f32.xlu2 %v3172_v24 }
 0xefe   :  { %v3132_v49 = vpop.xlane.xlu0 %3131 }
 0xeff   :  { %v3100_v12 = vpop.f32.mrf.mxu2  ;;  %vm3189_vm5 = vcmp.eq.f32.partialorder %v5631_v33, %v3132_v49 }
 0xf00   :  { %v5727_v40 = vadd.f32 %v5564_v26, %v3100_v12 }
 0xf02   :  { %v3175_v60 = vsel %vm324_vm2, %v5727_v40, -inf }
 0xf03   :  { %3176 = vmax.xlane.f32.xlu0 %v3175_v60 }
 0xf06   :  { %v3135_v23 = vpop.xlane.xlu1 %3134 }
 0xf07   :  { %vm3190_vm11 = vcmp.eq.f32.partialorder %v5636_v7, %v3135_v23  ;;  %v3103_v55 = vpop.f32.mrf.mxu2 }
 0xf08   :  { %v5735_v22 = vadd.f32 %v5564_v26, %v3103_v55  ;;  %v3215_v17 = vsel %vm3190_vm11, %v5912_v34, 16.0  ;;  %v3214_v26 = vsel %vm3189_vm5, %v5912_v34, 16.0 }
 0xf09   :  { %v3258_v9 = vsel %vm324_vm2, %v3215_v17, inf  ;;  %v3255_v63 = vsel %vm324_vm2, %v3214_v26, inf }
 0xf0a   :  { %3259 = vmin.xlane.f32.xlu2 %v3258_v9  ;;  %v3178_v14 = vsel %vm324_vm2, %v5735_v22, -inf }
 0xf0b   :  { %3253 = vmin.xlane.f32.xlu0 %v3252_v0  ;;  %3179 = vmax.xlane.f32.xlu1 %v3178_v14 }
 0xf0e   :  { %v3138_v7 = vpop.xlane.xlu2 %3137 }
 0xf0f   :  { %vm3191_vm12 = vcmp.eq.f32.partialorder %v5641_v41, %v3138_v7 }
 0xf10   :  { %v3216_v56 = vsel %vm3191_vm12, %v5912_v34, 16.0 }
 0xf11   :  { %v3261_v42 = vsel %vm324_vm2, %v3216_v56, inf }
 0xf13   :  { %3262 = vmin.xlane.f32.xlu0 %v3261_v42  ;;  %3256 = vmin.xlane.f32.xlu1 %v3255_v63 }
 0xf16   :  { %v3141_v28 = vpop.xlane.xlu0 %3140 }
 0xf17   :  { %vm3192_vm13 = vcmp.eq.f32.partialorder %v5646_v61, %v3141_v28 }
 0xf18   :  { %v3217_v35 = vsel %vm3192_vm13, %v5912_v34, 16.0 }
 0xf19   :  { %v3264_v33 = vsel %vm324_vm2, %v3217_v35, inf }
 0xf1b   :  { %3265 = vmin.xlane.f32.xlu1 %v3264_v33 }
 0xf1e   :  { %v3144_v39 = vpop.xlane.xlu1 %3143 }
 0xf1f   :  { %vm3193_vm14 = vcmp.eq.f32.partialorder %v5651_v37, %v3144_v39 }
 0xf20   :  { %v3218_v41 = vsel %vm3193_vm14, %v5912_v34, 16.0 }
 0xf21   :  { %v3267_v16 = vsel %vm324_vm2, %v3218_v41, inf }
 0xf22   :  { %3268 = vmin.xlane.f32.xlu2 %v3267_v16 }
 0xf26   :  { %v3147_v45 = vpop.xlane.xlu2 %3146 }
 0xf27   :  { %vm3194_vm3 = vcmp.eq.f32.partialorder %v5656_v36, %v3147_v45 }
 0xf28   :  { %v3219_v8 = vsel %vm3194_vm3, %v5912_v34, 16.0 }
 0xf29   :  { %v3270_v61 = vsel %vm324_vm2, %v3219_v8, inf }
 0xf2a   :  { %3271 = vmin.xlane.f32.xlu0 %v3270_v61 }
 0xf2e   :  { %v3150_v3 = vpop.xlane.xlu0 %3149 }
 0xf2f   :  { %vm3195_vm15 = vcmp.eq.f32.partialorder %v5661_v32, %v3150_v3 }
 0xf30   :  { %v3220_v51 = vsel %vm3195_vm15, %v5912_v34, 16.0 }
 0xf31   :  { %v3273_v37 = vsel %vm324_vm2, %v3220_v51, inf }
 0xf32   :  { %3274 = vmin.xlane.f32.xlu1 %v3273_v37 }
 0xf35   :  { %v3233_v57 = vpop.xlane.xlu2 %3232 }
 0xf36   :  { %vm3661_vm4 = vcmp.lt.s32.totalorder %v3233_v57, 0  ;;  %v3662_v52 = vceil.f32 %v3233_v57  ;;  %v3663_v18 = vfloor.f32 %v3233_v57  ;;  %v3153_v47 = vpop.xlane.xlu1 %3152 }
 0xf37   :  { %vm3196_vm7 = vcmp.eq.f32.partialorder %v5667_v2, %v3153_v47 }
 0xf38   :  { %v3664_v36 = vsel %vm3661_vm4, %v3662_v52, %v3663_v18  ;;  %v3221_v5 = vsel %vm3196_vm7, %v5912_v34, 16.0 }
 0xf39   :  { %v3665_v10 = vcvt.f32.s32 %v3664_v36  ;;  %v3276_v46 = vsel %vm324_vm2, %v3221_v5, inf }
 0xf3a   :  { %3277 = vmin.xlane.f32.xlu2 %v3276_v46 }
 0xf3b   :  { %3331 = vst.msk [vmem:[%s4704_s7] sm:$0xff] %vm448_vm0, %v3665_v10 }
 0xf3d   :  { %v3236_v32 = vpop.xlane.xlu0 %3235 }
 0xf3e   :  { %vm3666_vm8 = vcmp.lt.s32.totalorder %v3236_v32, 0  ;;  %v3667_v62 = vceil.f32 %v3236_v32  ;;  %v3668_v48 = vfloor.f32 %v3236_v32  ;;  %v3156_v19 = vpop.xlane.xlu2 %3155 }
 0xf3f   :  { %vm3197_vm9 = vcmp.eq.f32.partialorder %v5675_v38, %v3156_v19 }
 0xf40   :  { %v3669_v6 = vsel %vm3666_vm8, %v3667_v62, %v3668_v48  ;;  %v3222_v2 = vsel %vm3197_vm9, %v5912_v34, 16.0 }
 0xf41   :  { %v3670_v13 = vcvt.f32.s32 %v3669_v6  ;;  %v3279_v31 = vsel %vm324_vm2, %v3222_v2, inf }
 0xf42   :  { %3280 = vmin.xlane.f32.xlu0 %v3279_v31 }
 0xf43   :  { %3332 = vst.msk [vmem:[%s4704_s7 + $0x8] sm:$0xff] %vm448_vm0, %v3670_v13 }
 0xf45   :  { %v3239_v59 = vpop.xlane.xlu1 %3238 }
 0xf46   :  { %vm3671_vm10 = vcmp.lt.s32.totalorder %v3239_v59, 0  ;;  %v3672_v21 = vceil.f32 %v3239_v59  ;;  %v3673_v44 = vfloor.f32 %v3239_v59  ;;  %v3159_v20 = vpop.xlane.xlu0 %3158 }
 0xf47   :  { %vm3198_vm6 = vcmp.eq.f32.partialorder %v5683_v58, %v3159_v20 }
 0xf48   :  { %v3674_v4 = vsel %vm3671_vm10, %v3672_v21, %v3673_v44  ;;  %v3223_v38 = vsel %vm3198_vm6, %v5912_v34, 16.0 }
 0xf49   :  { %v3675_v11 = vcvt.f32.s32 %v3674_v4  ;;  %v3282_v43 = vsel %vm324_vm2, %v3223_v38, inf }
 0xf4a   :  { %3283 = vmin.xlane.f32.xlu1 %v3282_v43 }
 0xf4b   :  { %3333 = vst.msk [vmem:[%s4704_s7 + $0x10] sm:$0xff] %vm448_vm0, %v3675_v11 }
 0xf4d   :  { %v3242_v54 = vpop.xlane.xlu2 %3241 }
 0xf4e   :  { %vm3676_vm11 = vcmp.lt.s32.totalorder %v3242_v54, 0  ;;  %v3677_v30 = vceil.f32 %v3242_v54  ;;  %v3678_v24 = vfloor.f32 %v3242_v54  ;;  %v3162_v12 = vpop.xlane.xlu1 %3161 }
 0xf4f   :  { %vm3199_vm5 = vcmp.eq.f32.partialorder %v5691_v25, %v3162_v12 }
 0xf50   :  { %v3679_v27 = vsel %vm3676_vm11, %v3677_v30, %v3678_v24  ;;  %v3224_v58 = vsel %vm3199_vm5, %v5912_v34, 16.0 }
 0xf51   :  { %v3680_v60 = vcvt.f32.s32 %v3679_v27  ;;  %v3285_v23 = vsel %vm324_vm2, %v3224_v58, inf }
 0xf52   :  { %3286 = vmin.xlane.f32.xlu2 %v3285_v23 }
 0xf53   :  { %3334 = vst.msk [vmem:[%s4704_s7 + $0x18] sm:$0xff] %vm448_vm0, %v3680_v60 }
 0xf55   :  { %v3245_v55 = vpop.xlane.xlu0 %3244 }
 0xf56   :  { %vm3681_vm12 = vcmp.lt.s32.totalorder %v3245_v55, 0  ;;  %v3682_v50 = vceil.f32 %v3245_v55  ;;  %v3683_v17 = vfloor.f32 %v3245_v55  ;;  %v3165_v49 = vpop.xlane.xlu2 %3164 }
 0xf57   :  { %vm3200_vm13 = vcmp.eq.f32.partialorder %v5699_v29, %v3165_v49 }
 0xf58   :  { %v3684_v9 = vsel %vm3681_vm12, %v3682_v50, %v3683_v17  ;;  %v3225_v25 = vsel %vm3200_vm13, %v5912_v34, 16.0 }
 0xf59   :  { %v3685_v0 = vcvt.f32.s32 %v3684_v9  ;;  %v3288_v14 = vsel %vm324_vm2, %v3225_v25, inf }
 0xf5a   :  { %3289 = vmin.xlane.f32.xlu0 %v3288_v14 }
 0xf5b   :  { %3335 = vst.msk [vmem:[%s4704_s7 + $0x20] sm:$0xff] %vm448_vm0, %v3685_v0 }
 0xf5d   :  { %v3248_v7 = vpop.xlane.xlu1 %3247 }
 0xf5e   :  { %vm3686_vm14 = vcmp.lt.s32.totalorder %v3248_v7, 0  ;;  %v3687_v26 = vceil.f32 %v3248_v7  ;;  %v3688_v56 = vfloor.f32 %v3248_v7  ;;  %v3168_v42 = vpop.xlane.xlu0 %3167 }
 0xf5f   :  { %vm3201_vm3 = vcmp.eq.f32.partialorder %v5707_v15, %v3168_v42 }
 0xf60   :  { %v3689_v63 = vsel %vm3686_vm14, %v3687_v26, %v3688_v56  ;;  %v3226_v29 = vsel %vm3201_vm3, %v5912_v34, 16.0 }
 0xf61   :  { %v3690_v28 = vcvt.f32.s32 %v3689_v63  ;;  %v3291_v35 = vsel %vm324_vm2, %v3226_v29, inf }
 0xf62   :  { %3292 = vmin.xlane.f32.xlu1 %v3291_v35 }
 0xf63   :  { %3336 = vst.msk [vmem:[%s4704_s7 + $0x28] sm:$0xff] %vm448_vm0, %v3690_v28 }
 0xf65   :  { %v3251_v33 = vpop.xlane.xlu2 %3250 }
 0xf66   :  { %vm3691_vm15 = vcmp.lt.s32.totalorder %v3251_v33, 0  ;;  %v3692_v39 = vceil.f32 %v3251_v33  ;;  %v3693_v41 = vfloor.f32 %v3251_v33  ;;  %v3171_v16 = vpop.xlane.xlu1 %3170 }
 0xf67   :  { %vm3202_vm4 = vcmp.eq.f32.partialorder %v5715_v53, %v3171_v16 }
 0xf68   :  { %v3694_v45 = vsel %vm3691_vm15, %v3692_v39, %v3693_v41  ;;  %v3227_v15 = vsel %vm3202_vm4, %v5912_v34, 16.0 }
 0xf69   :  { %v3695_v8 = vcvt.f32.s32 %v3694_v45  ;;  %v3294_v61 = vsel %vm324_vm2, %v3227_v15, inf }
 0xf6a   :  { %3295 = vmin.xlane.f32.xlu2 %v3294_v61 }
 0xf6b   :  { %3337 = vst.msk [vmem:[%s4704_s7 + $0x30] sm:$0xff] %vm448_vm0, %v3695_v8 }
 0xf6e   :  { %v3174_v3 = vpop.xlane.xlu2 %3173 }
 0xf6f   :  { %vm3203_vm7 = vcmp.eq.f32.partialorder %v5722_v1, %v3174_v3 }
 0xf70   :  { %v3228_v51 = vsel %vm3203_vm7, %v5912_v34, 16.0 }
 0xf71   :  { %v3297_v37 = vsel %vm324_vm2, %v3228_v51, inf }
 0xf72   :  { %3298 = vmin.xlane.f32.xlu0 %v3297_v37 }
 0xf76   :  { %v3177_v57 = vpop.xlane.xlu0 %3176 }
 0xf77   :  { %vm3204_vm8 = vcmp.eq.f32.partialorder %v5727_v40, %v3177_v57 }
 0xf78   :  { %v3229_v53 = vsel %vm3204_vm8, %v5912_v34, 16.0 }
 0xf79   :  { %v3300_v52 = vsel %vm324_vm2, %v3229_v53, inf }
 0xf7a   :  { %3301 = vmin.xlane.f32.xlu1 %v3300_v52 }
 0xf7d   :  { %v3260_v18 = vpop.xlane.xlu2 %3259 }
 0xf7e   :  { %vm3706_vm9 = vcmp.lt.s32.totalorder %v3260_v18, 0  ;;  %v3707_v47 = vceil.f32 %v3260_v18  ;;  %v3708_v36 = vfloor.f32 %v3260_v18  ;;  %v3254_v1 = vpop.xlane.xlu0 %3253  ;;  %v3180_v5 = vpop.xlane.xlu1 %3179 }
 0xf7f   :  { %vm3696_vm10 = vcmp.lt.s32.totalorder %v3254_v1, 0  ;;  %v3697_v10 = vceil.f32 %v3254_v1  ;;  %v3698_v46 = vfloor.f32 %v3254_v1  ;;  %vm3205_vm6 = vcmp.eq.f32.partialorder %v5735_v22, %v3180_v5 }
 0xf80   :  { %v3709_v32 = vsel %vm3706_vm9, %v3707_v47, %v3708_v36  ;;  %v3230_v40 = vsel %vm3205_vm6, %v5912_v34, 16.0 }
 0xf81   :  { %v3710_v62 = vcvt.f32.s32 %v3709_v32  ;;  %v3699_v48 = vsel %vm3696_vm10, %v3697_v10, %v3698_v46  ;;  %v3303_v19 = vsel %vm324_vm2, %v3230_v40, inf  ;;  %v950_v10 = vld [vmem:[#allocation8] sm:$0x1] }
 0xf82   :  { %v3700_v6 = vcvt.f32.s32 %v3699_v48  ;;  %3304 = vmin.xlane.f32.xlu2 %v3303_v19  ;;  %v3657_v40 = vceil.f32 %v950_v10  ;;  %vm3656_vm10 = vcmp.lt.s32.totalorder %v950_v10, 0 }
 0xf83   :  { %3340 = vst.msk [vmem:[%s4704_s7 + $0x48] sm:$0xff] %vm448_vm0, %v3710_v62  ;;  %v3658_v62 = vfloor.f32 %v950_v10 }
 0xf84   :  { %3338 = vst.msk [vmem:[%s4704_s7 + $0x38] sm:$0xff] %vm448_vm0, %v3700_v6 }
 0xf85   :  { %v3659_v6 = vsel %vm3656_vm10, %v3657_v40, %v3658_v62 }
 0xf86   :  { %v3263_v2 = vpop.xlane.xlu0 %3262  ;;  %v3257_v13 = vpop.xlane.xlu1 %3256 }
 0xf87   :  { %vm3711_vm11 = vcmp.lt.s32.totalorder %v3263_v2, 0  ;;  %v3712_v31 = vceil.f32 %v3263_v2  ;;  %v3713_v22 = vfloor.f32 %v3263_v2  ;;  %vm3701_vm5 = vcmp.lt.s32.totalorder %v3257_v13, 0 }
 0xf88   :  { %v3702_v34 = vceil.f32 %v3257_v13  ;;  %v3703_v59 = vfloor.f32 %v3257_v13  ;;  %v3660_v2 = vcvt.f32.s32 %v3659_v6 }
 0xf89   :  { %v3714_v21 = vsel %vm3711_vm11, %v3712_v31, %v3713_v22 }
 0xf8a   :  { %v3715_v44 = vcvt.f32.s32 %v3714_v21  ;;  %v3704_v20 = vsel %vm3701_vm5, %v3702_v34, %v3703_v59  ;;  %952 = vst.msk [vmem:[#allocation31] sm:$0x1] %vm451_vm1, %v3660_v2 }
 0xf8b   :  { %v3705_v4 = vcvt.f32.s32 %v3704_v20 }
 0xf8c   :  { %3341 = vst.msk [vmem:[%s4704_s7 + $0x50] sm:$0xff] %vm448_vm0, %v3715_v44 }
 0xf8d   :  { %3339 = vst.msk [vmem:[%s4704_s7 + $0x40] sm:$0xff] %vm448_vm0, %v3705_v4 }
 0xf8e   :  { %v3266_v38 = vpop.xlane.xlu1 %3265 }
 0xf8f   :  { %vm3716_vm2 = vcmp.lt.s32.totalorder %v3266_v38, 0  ;;  %v3717_v11 = vceil.f32 %v3266_v38  ;;  %v3718_v43 = vfloor.f32 %v3266_v38 }
 0xf91   :  { %v3719_v54 = vsel %vm3716_vm2, %v3717_v11, %v3718_v43 }
 0xf92   :  { %v3720_v30 = vcvt.f32.s32 %v3719_v54 }
 0xf94   :  { %3342 = vst.msk [vmem:[%s4704_s7 + $0x58] sm:$0xff] %vm448_vm0, %v3720_v30 }
 0xf95   :  { %v3269_v24 = vpop.xlane.xlu2 %3268 }
 0xf96   :  { %vm3721_vm12 = vcmp.lt.s32.totalorder %v3269_v24, 0  ;;  %v3722_v12 = vceil.f32 %v3269_v24  ;;  %v3723_v27 = vfloor.f32 %v3269_v24 }
 0xf98   :  { %v3724_v58 = vsel %vm3721_vm12, %v3722_v12, %v3723_v27 }
 0xf99   :  { %v3725_v60 = vcvt.f32.s32 %v3724_v58 }
 0xf9b   :  { %3343 = vst.msk [vmem:[%s4704_s7 + $0x60] sm:$0xff] %vm448_vm0, %v3725_v60 }
 0xf9d   :  { %v3272_v23 = vpop.xlane.xlu0 %3271 }
 0xf9e   :  { %vm3726_vm13 = vcmp.lt.s32.totalorder %v3272_v23, 0  ;;  %v3727_v55 = vceil.f32 %v3272_v23  ;;  %v3728_v50 = vfloor.f32 %v3272_v23 }
 0xfa0   :  { %v3729_v17 = vsel %vm3726_vm13, %v3727_v55, %v3728_v50 }
 0xfa1   :  { %v3730_v49 = vcvt.f32.s32 %v3729_v17 }
 0xfa3   :  { %3344 = vst.msk [vmem:[%s4704_s7 + $0x68] sm:$0xff] %vm448_vm0, %v3730_v49 }
 0xfa5   :  { %v3275_v9 = vpop.xlane.xlu1 %3274 }
 0xfa6   :  { %vm3731_vm14 = vcmp.lt.s32.totalorder %v3275_v9, 0  ;;  %v3732_v25 = vceil.f32 %v3275_v9  ;;  %v3733_v0 = vfloor.f32 %v3275_v9 }
 0xfa8   :  { %v3734_v14 = vsel %vm3731_vm14, %v3732_v25, %v3733_v0 }
 0xfa9   :  { %v3735_v7 = vcvt.f32.s32 %v3734_v14 }
 0xfab   :  { %3345 = vst.msk [vmem:[%s4704_s7 + $0x70] sm:$0xff] %vm448_vm0, %v3735_v7 }
 0xfad   :  { %v3278_v26 = vpop.xlane.xlu2 %3277 }
 0xfae   :  { %vm3736_vm3 = vcmp.lt.s32.totalorder %v3278_v26, 0  ;;  %v3737_v56 = vceil.f32 %v3278_v26  ;;  %v3738_v42 = vfloor.f32 %v3278_v26 }
 0xfb0   :  { %v3739_v63 = vsel %vm3736_vm3, %v3737_v56, %v3738_v42 }
 0xfb1   :  { %v3740_v29 = vcvt.f32.s32 %v3739_v63 }
 0xfb3   :  { %3346 = vst.msk [vmem:[%s4704_s7 + $0x78] sm:$0xff] %vm448_vm0, %v3740_v29 }
 0xfb5   :  { %v3281_v28 = vpop.xlane.xlu0 %3280 }
 0xfb6   :  { %vm3741_vm15 = vcmp.lt.s32.totalorder %v3281_v28, 0  ;;  %v3742_v35 = vceil.f32 %v3281_v28  ;;  %v3743_v33 = vfloor.f32 %v3281_v28 }
 0xfb8   :  { %v3744_v39 = vsel %vm3741_vm15, %v3742_v35, %v3743_v33 }
 0xfb9   :  { %v3745_v41 = vcvt.f32.s32 %v3744_v39 }
 0xfbb   :  { %3347 = vst.msk [vmem:[%s4704_s7 + $0x80] sm:$0xff] %vm448_vm0, %v3745_v41 }
 0xfbd   :  { %v3284_v16 = vpop.xlane.xlu1 %3283 }
 0xfbe   :  { %vm3746_vm4 = vcmp.lt.s32.totalorder %v3284_v16, 0  ;;  %v3747_v45 = vceil.f32 %v3284_v16  ;;  %v3748_v15 = vfloor.f32 %v3284_v16 }
 0xfc0   :  { %v3749_v8 = vsel %vm3746_vm4, %v3747_v45, %v3748_v15 }
 0xfc1   :  { %v3750_v61 = vcvt.f32.s32 %v3749_v8 }
 0xfc3   :  { %3348 = vst.msk [vmem:[%s4704_s7 + $0x88] sm:$0xff] %vm448_vm0, %v3750_v61 }
 0xfc5   :  { %v3287_v3 = vpop.xlane.xlu2 %3286 }
 0xfc6   :  { %vm3751_vm7 = vcmp.lt.s32.totalorder %v3287_v3, 0  ;;  %v3752_v51 = vceil.f32 %v3287_v3  ;;  %v3753_v37 = vfloor.f32 %v3287_v3 }
 0xfc8   :  { %v3754_v57 = vsel %vm3751_vm7, %v3752_v51, %v3753_v37 }
 0xfc9   :  { %v3755_v53 = vcvt.f32.s32 %v3754_v57 }
 0xfcb   :  { %3349 = vst.msk [vmem:[%s4704_s7 + $0x90] sm:$0xff] %vm448_vm0, %v3755_v53 }
 0xfcd   :  { %v3290_v52 = vpop.xlane.xlu0 %3289 }
 0xfce   :  { %vm3756_vm8 = vcmp.lt.s32.totalorder %v3290_v52, 0  ;;  %v3757_v18 = vceil.f32 %v3290_v52  ;;  %v3758_v47 = vfloor.f32 %v3290_v52 }
 0xfd0   :  { %v3759_v36 = vsel %vm3756_vm8, %v3757_v18, %v3758_v47 }
 0xfd1   :  { %v3760_v1 = vcvt.f32.s32 %v3759_v36 }
 0xfd3   :  { %3350 = vst.msk [vmem:[%s4704_s7 + $0x98] sm:$0xff] %vm448_vm0, %v3760_v1 }
 0xfd5   :  { %v3293_v5 = vpop.xlane.xlu1 %3292 }
 0xfd6   :  { %vm3761_vm9 = vcmp.lt.s32.totalorder %v3293_v5, 0  ;;  %v3762_v46 = vceil.f32 %v3293_v5  ;;  %v3763_v32 = vfloor.f32 %v3293_v5 }
 0xfd8   :  { %v3764_v48 = vsel %vm3761_vm9, %v3762_v46, %v3763_v32 }
 0xfd9   :  { %v3765_v19 = vcvt.f32.s32 %v3764_v48 }
 0xfdb   :  { %3351 = vst.msk [vmem:[%s4704_s7 + $0xa0] sm:$0xff] %vm448_vm0, %v3765_v19 }
 0xfdd   :  { %v3296_v13 = vpop.xlane.xlu2 %3295 }
 0xfde   :  { %4474 = shalt.err (!%p4471_p1)
}
 0xfdf   :  { %3368 = dma.vmem_to_hbm [thread:$0]  %s3364_s29, 16, %s3366_s26, [#allocation12]   ;;  %vm3766_vm6 = vcmp.lt.s32.totalorder %v3296_v13, 0  ;;  %v3767_v31 = vceil.f32 %v3296_v13  ;;  %v3768_v22 = vfloor.f32 %v3296_v13 }
 0xfe1   :  { %v3769_v34 = vsel %vm3766_vm6, %v3767_v31, %v3768_v22 }
 0xfe2   :  { %v3770_v59 = vcvt.f32.s32 %v3769_v34 }
 0xfe4   :  { %3352 = vst.msk [vmem:[%s4704_s7 + $0xa8] sm:$0xff] %vm448_vm0, %v3770_v59 }
 0xfe5   :  { %v3299_v21 = vpop.xlane.xlu0 %3298 }
 0xfe6   :  { %vm3771_vm1 = vcmp.lt.s32.totalorder %v3299_v21, 0  ;;  %v3772_v44 = vceil.f32 %v3299_v21  ;;  %v3773_v20 = vfloor.f32 %v3299_v21 }
 0xfe8   :  { %v3774_v4 = vsel %vm3771_vm1, %v3772_v44, %v3773_v20 }
 0xfe9   :  { %v3775_v38 = vcvt.f32.s32 %v3774_v4 }
 0xfeb   :  { %3353 = vst.msk [vmem:[%s4704_s7 + $0xb0] sm:$0xff] %vm448_vm0, %v3775_v38 }
 0xfed   :  { %v3302_v11 = vpop.xlane.xlu1 %3301 }
 0xfee   :  { %vm3776_vm11 = vcmp.lt.s32.totalorder %v3302_v11, 0  ;;  %v3777_v43 = vceil.f32 %v3302_v11  ;;  %v3778_v54 = vfloor.f32 %v3302_v11 }
 0xff0   :  { %v3779_v30 = vsel %vm3776_vm11, %v3777_v43, %v3778_v54 }
 0xff1   :  { %v3780_v24 = vcvt.f32.s32 %v3779_v30 }
 0xff3   :  { %3354 = vst.msk [vmem:[%s4704_s7 + $0xb8] sm:$0xff] %vm448_vm0, %v3780_v24 }
 0xff5   :  { %v3305_v12 = vpop.xlane.xlu2 %3304 }
 0xff6   :  { %vm3781_vm5 = vcmp.lt.s32.totalorder %v3305_v12, 0  ;;  %v3782_v27 = vceil.f32 %v3305_v12  ;;  %v3783_v58 = vfloor.f32 %v3305_v12 }
 0xff8   :  { %v3784_v60 = vsel %vm3781_vm5, %v3782_v27, %v3783_v58 }
 0xff9   :  { %v3785_v23 = vcvt.f32.s32 %v3784_v60 }
 0xffb   :  { %3355 = vst.msk [vmem:[%s4704_s7 + $0xc0] sm:$0xff] %vm448_vm0, %v3785_v23 }
 0xffc   :  { %4493 = dma.done.wait [#allocation12], 16  }
 0xffd   :  { %4494 = vsyncadd [#allocation12], 4294967280 }
 0xffe   :  { %3375 = vsyncpa [#allocation11], 1 }
 0xfff   :  { %3376 = vsyncpa [#allocation14], 1 }
0x1000   :  { %3377 = vsyncpa [#allocation17], 1 }
0x1001   :  { %3378 = vsyncpa [#allocation20], 1 }
0x1002   :  { %3379 = vsyncpa [#allocation23], 1 }
0x1003   :  { %3380 = vsyncpa [#allocation26], 1 }
0x1004   :  { %3381 = vsyncpa [#allocation29], 1 }
0x1005   :  { %3382 = vsyncpa [#allocation12], 1 }

</bundles_post_ra>
